<compile_context>
chip_gen: v7x
topology: tpu7x:2x2x1
jax: 0.10.0
libtpu: 0.0.40
codegen_flags: <defaults>
</compile_context>

<pallas_src>
import jax
import jax.numpy as jnp
from jax.experimental import pallas as pl
from jax.experimental.pallas import tpu as pltpu


def _round_up(n, m):
    return ((n + m - 1) // m) * m


def _se_bottleneck_kernel(
    x_ref,     # (Nb, H, W, Cp)       bf16 channel-padded NHWC input block
    w1_ref,    # (Cp, Pp)             bf16 conv1 1x1 weight (bn1 scale folded)
    b1_ref,    # (1, Pp)              f32  bn1 shift
    w2_ref,    # (9*Pp, Pp)           bf16 conv2 3x3 weight, (ky,kx,cin) x cout
    b2_ref,    # (1, Pp)              f32  bn2 shift
    w3_ref,    # (Pp, Cp)             bf16 conv3 1x1 weight (bn3 scale folded)
    b3_ref,    # (1, Cp)              f32  bn3 shift
    wf1_ref,   # (Cp, Hp)             bf16 SE fc1 weight
    wf2_ref,   # (Hp, Cp)             bf16 SE fc2 weight
    o_ref,     # (Nb, H, W, Cp)       bf16 output block
    pad_ref,   # (Nb, H+2, Wp2, Pp)   bf16 persistent per-image halo scratch
):
    Nb, H, W, Cp = x_ref.shape
    Pp = w1_ref.shape[1]
    Wp2 = pad_ref.shape[2]
    M = Nb * H * W

    x = x_ref[...]                                   # (Nb, H, W, Cp) bf16
    xm = x.reshape(M, Cp)                            # bf16, feeds conv1 + residual

    # ---- conv1 (1x1, bn1 scale pre-folded) + shift + relu -------------------
    h1 = jnp.dot(xm, w1_ref[...], preferred_element_type=jnp.float32)
    h1 = jnp.maximum(h1 + b1_ref[...], 0.0)          # (M, Pp) f32

    # ---- conv2 (3x3, stride 1, pad 1): halo scratch + 9 accumulated matmuls -
    # Re-zero only the thin halo border each step (cheap, and correct even
    # when the "parallel" batch axis is split across TensorCores).
    zrow = jnp.zeros((Nb, 1, Wp2, Pp), jnp.bfloat16)
    zcol = jnp.zeros((Nb, H + 2, 1, Pp), jnp.bfloat16)
    pad_ref[:, 0:1, :, :] = zrow
    pad_ref[:, H + 1:H + 2, :, :] = zrow
    pad_ref[:, :, 0:1, :] = zcol
    pad_ref[:, :, W + 1:W + 2, :] = zcol
    pad_ref[:, 1:H + 1, 1:W + 1, :] = (
        h1.reshape(Nb, H, W, Pp).astype(jnp.bfloat16))

    acc = jnp.zeros((M, Pp), jnp.float32)
    k = 0
    for ky in range(3):
        for kx in range(3):
            patch = pad_ref[:, ky:ky + H, kx:kx + W, :].reshape(M, Pp)
            acc = acc + jnp.dot(patch, w2_ref[k * Pp:(k + 1) * Pp, :],
                                preferred_element_type=jnp.float32)
            k += 1
    h2 = jnp.maximum(acc + b2_ref[...], 0.0)         # (M, Pp) f32

    # ---- conv3 (1x1, bn3 scale pre-folded) + shift --------------------------
    h3 = jnp.dot(h2.astype(jnp.bfloat16), w3_ref[...],
                 preferred_element_type=jnp.float32) + b3_ref[...]   # (M, Cp)
    h3 = h3.reshape(Nb, H * W, Cp)

    # ---- SE: per-image global avg pool -> fc1 -> relu -> fc2 -> sigmoid -----
    y = jnp.mean(h3, axis=1)                         # (Nb, Cp) f32
    y = jnp.maximum(jnp.dot(y.astype(jnp.bfloat16), wf1_ref[...],
                            preferred_element_type=jnp.float32), 0.0)
    y = jax.nn.sigmoid(jnp.dot(y.astype(jnp.bfloat16), wf2_ref[...],
                               preferred_element_type=jnp.float32))  # (Nb, Cp)

    # ---- channel scale + residual add + final relu --------------------------
    res = xm.astype(jnp.float32).reshape(Nb, H * W, Cp)
    out = jnp.maximum(h3 * y.reshape(Nb, 1, Cp) + res, 0.0)  # padded lanes stay 0
    o_ref[...] = out.reshape(Nb, H, W, Cp).astype(o_ref.dtype)


def _prepare_kernel_params(params, Cin):
    """Fold BN scales into conv weights, zero-pad lane dims to 128, cast bf16."""
    (w1, s1, b1, w2, s2, b2, w3, s3, b3, wf1, wf2) = params
    P = w1.shape[1]
    Cout = w3.shape[1]
    hidden = wf1.shape[1]

    Cp = _round_up(max(Cin, Cout), 128)
    Pp = _round_up(P, 128)
    Hp = _round_up(hidden, 128)

    # Fold BN scale (per output channel) into the conv weights.
    w1f = w1 * s1                                    # (Cin, P)
    w2f = w2 * s2.reshape(1, 1, 1, P)                # (3, 3, Pin, Pout)
    w3f = w3 * s3                                    # (P, Cout)

    # Zero-pad lane dims; pack conv2 as (ky, kx, cin) x cout row blocks.
    w1p = jnp.pad(w1f, ((0, Cp - Cin), (0, Pp - P)))
    w2p = jnp.pad(w2f, ((0, 0), (0, 0), (0, Pp - P), (0, Pp - P)))
    w2p = w2p.reshape(9 * Pp, Pp)
    w3p = jnp.pad(w3f, ((0, Pp - P), (0, Cp - Cout)))
    wf1p = jnp.pad(wf1, ((0, Cp - Cout), (0, Hp - hidden)))
    wf2p = jnp.pad(wf2, ((0, Hp - hidden), (0, Cp - Cout)))

    b1p = jnp.pad(b1, ((0, 0), (0, Pp - P)))
    b2p = jnp.pad(b2, ((0, 0), (0, Pp - P)))
    b3p = jnp.pad(b3, ((0, 0), (0, Cp - Cout)))      # zero pad keeps padded lanes 0

    bf16 = jnp.bfloat16
    w1p, w2p, w3p, wf1p, wf2p = (a.astype(bf16)
                                 for a in (w1p, w2p, w3p, wf1p, wf2p))
    kparams = (w1p, b1p, w2p, b2p, w3p, b3p, wf1p, wf2p)
    return kparams, Cp, Pp, Cout


def se_bottleneck_forward(x_nchw, params, *, batch_block=None):
    """x_nchw: (N, C, H, W) float32. Returns (N, C, H, W) float32."""
    N, C, H, W = x_nchw.shape
    kparams, Cp, Pp, Cout = _prepare_kernel_params(params, C)
    (w1p, b1p, w2p, b2p, w3p, b3p, wf1p, wf2p) = kparams
    assert C == Cout, "identity residual requires inplanes == planes * 4"

    # Pack enough images per grid step that matmul M = Nb*H*W is reasonably
    # large (MXU row utilization), while keeping the batch axis evenly split.
    if batch_block is None:
        target_rows = 512
        nb = min(N, max(1, target_rows // (H * W)))
        while N % nb:
            nb -= 1
        batch_block = nb
    Nb = batch_block
    assert N % Nb == 0

    # NCHW f32 -> NHWC bf16, zero-pad channels to Cp (lane-dense blocks).
    x_nhwc = jnp.transpose(x_nchw, (0, 2, 3, 1))
    x_pad = jnp.pad(x_nhwc, ((0, 0), (0, 0), (0, 0), (0, Cp - C)))
    x_pad = x_pad.astype(jnp.bfloat16)

    # Halo scratch row stride padded to a multiple of 8 (sublane alignment).
    Wp2 = _round_up(W + 2, 8)

    def full_spec(arr):
        nd = arr.ndim
        return pl.BlockSpec(arr.shape, lambda n, _nd=nd: (0,) * _nd)

    out = pl.pallas_call(
        _se_bottleneck_kernel,
        out_shape=jax.ShapeDtypeStruct((N, H, W, Cp), jnp.bfloat16),
        grid_spec=pltpu.PrefetchScalarGridSpec(
            num_scalar_prefetch=0,
            grid=(N // Nb,),
            in_specs=[
                pl.BlockSpec((Nb, H, W, Cp), lambda n: (n, 0, 0, 0)),
                full_spec(w1p), full_spec(b1p),
                full_spec(w2p), full_spec(b2p),
                full_spec(w3p), full_spec(b3p),
                full_spec(wf1p), full_spec(wf2p),
            ],
            out_specs=pl.BlockSpec((Nb, H, W, Cp), lambda n: (n, 0, 0, 0)),
            scratch_shapes=[pltpu.VMEM((Nb, H + 2, Wp2, Pp), jnp.bfloat16)],
        ),
        compiler_params=pltpu.CompilerParams(
            dimension_semantics=("parallel",),
            vmem_limit_bytes=32 * 1024 * 1024,
        ),
    )(x_pad, w1p, b1p, w2p, b2p, w3p, b3p, wf1p, wf2p)

    # Back to PyTorch NCHW / f32 (a fused pipeline would stay NHWC/bf16).
    out = out[..., :Cout].astype(jnp.float32)
    return jnp.transpose(out, (0, 3, 1, 2))


def _folded_bn(key, c, eps=1e-5):
    k1, k2, k3, k4 = jax.random.split(key, 4)
    gamma = 1.0 + 0.1 * jax.random.normal(k1, (c,), jnp.float32)
    beta = 0.1 * jax.random.normal(k2, (c,), jnp.float32)
    mean = 0.1 * jax.random.normal(k3, (c,), jnp.float32)
    var = 1.0 + 0.1 * jnp.abs(jax.random.normal(k4, (c,), jnp.float32))
    scale = gamma / jnp.sqrt(var + eps)
    shift = beta - mean * scale
    return scale.reshape(1, c), shift.reshape(1, c)


def make_params(key, inplanes, planes, reduction=16):
    expansion = 4
    cout = planes * expansion
    hidden = cout // reduction
    ks = jax.random.split(key, 8)

    # PyTorch-shaped weights, then transposed into matmul layout.
    conv1_w = 0.1 * jax.random.normal(ks[0], (planes, inplanes), jnp.float32)
    conv2_w = 0.1 * jax.random.normal(ks[1], (planes, planes, 3, 3), jnp.float32)
    conv3_w = 0.1 * jax.random.normal(ks[2], (cout, planes), jnp.float32)
    fc1_w = 0.1 * jax.random.normal(ks[3], (hidden, cout), jnp.float32)
    fc2_w = 0.1 * jax.random.normal(ks[4], (cout, hidden), jnp.float32)

    s1, b1 = _folded_bn(ks[5], planes)
    s2, b2 = _folded_bn(ks[6], planes)
    s3, b3 = _folded_bn(ks[7], cout)

    w1 = conv1_w.T                                   # (Cin, P)
    w2 = jnp.transpose(conv2_w, (2, 3, 1, 0))        # (3, 3, Pin, Pout)
    w3 = conv3_w.T                                   # (P, 4P)
    wf1 = fc1_w.T                                    # (4P, hidden)
    wf2 = fc2_w.T                                    # (hidden, 4P)
    return (w1, s1, b1, w2, s2, b2, w3, s3, b3, wf1, wf2)


def _reference(x_nchw, params):
    """Pure-JAX f32 reference mirroring the PyTorch forward (inference BN)."""
    (w1, s1, b1, w2, s2, b2, w3, s3, b3, wf1, wf2) = params
    N, C, H, W = x_nchw.shape
    x = jnp.transpose(x_nchw, (0, 2, 3, 1)).astype(jnp.float32)  # NHWC
    xm = x.reshape(N, H * W, C)
    h1 = jnp.maximum(jnp.einsum("nsc,cp->nsp", xm, w1) * s1 + b1, 0.0)
    P = h1.shape[-1]
    h1_img = jnp.pad(h1.reshape(N, H, W, P), ((0, 0), (1, 1), (1, 1), (0, 0)))
    acc = jnp.zeros((N, H * W, P), jnp.float32)
    for ky in range(3):
        for kx in range(3):
            patch = h1_img[:, ky:ky + H, kx:kx + W, :].reshape(N, H * W, P)
            acc += jnp.einsum("nsp,pq->nsq", patch, w2[ky, kx])
    h2 = jnp.maximum(acc * s2 + b2, 0.0)
    h3 = jnp.einsum("nsp,pc->nsc", h2, w3) * s3 + b3
    y = jnp.mean(h3, axis=1, keepdims=True)
    y = jnp.maximum(jnp.einsum("nsc,ch->nsh", y, wf1), 0.0)
    y = jax.nn.sigmoid(jnp.einsum("nsh,hc->nsc", y, wf2))
    out = jnp.maximum(h3 * y + xm, 0.0)
    return jnp.transpose(out.reshape(N, H, W, -1), (0, 3, 1, 2))


if __name__ == "__main__":
    # Small shapes consistent with the module: inplanes must equal
    # planes * expansion for the identity residual (downsample=None).
    planes, reduction = 8, 16
    inplanes = planes * 4          # 32
    N, H, W = 2, 8, 8

    key = jax.random.PRNGKey(0)
    kx, kp = jax.random.split(key)
    x = jax.random.normal(kx, (N, inplanes, H, W), jnp.float32)
    params = make_params(kp, inplanes, planes, reduction)

    out = se_bottleneck_forward(x, params)
    out = jax.block_until_ready(out)

    ref = jax.block_until_ready(_reference(x, params))
    assert out.shape == (N, inplanes, H, W)
    # End-to-end bf16 activations + bf16 matmul inputs (f32 accumulation)
    # vs the pure-f32 reference -> slightly relaxed tolerance.
    assert jnp.allclose(out, ref, rtol=3e-2, atol=3e-2)

    print("KERNEL_OK")
</pallas_src>

<mosaic_0001>
module attributes {stable_mosaic.version = 11 : i64} {
  func.func @_se_bottleneck_kernel(%arg0: i32, %arg1: memref<2x8x8x128xbf16, #tpu.memory_space<vmem>>, %arg2: memref<128x128xbf16, #tpu.memory_space<vmem>>, %arg3: memref<1x128xf32, #tpu.memory_space<vmem>>, %arg4: memref<1152x128xbf16, #tpu.memory_space<vmem>>, %arg5: memref<1x128xf32, #tpu.memory_space<vmem>>, %arg6: memref<128x128xbf16, #tpu.memory_space<vmem>>, %arg7: memref<1x128xf32, #tpu.memory_space<vmem>>, %arg8: memref<128x128xbf16, #tpu.memory_space<vmem>>, %arg9: memref<128x128xbf16, #tpu.memory_space<vmem>>, %arg10: memref<2x8x8x128xbf16, #tpu.memory_space<vmem>>, %arg11: memref<2x10x16x128xbf16, #tpu.memory_space<vmem>>) attributes {dimension_semantics = [#tpu.dimension_semantics<parallel>], iteration_bounds = array<i64: 1>, scalar_prefetch = 0 : i64, scratch_operands = 1 : i64, tpu.core_type = #tpu.core_type<tc>, window_params = [{transform_indices = @transform_0, window_bounds = array<i64: 2, 8, 8, 128>}, {pipeline_mode = #tpu.pipeline_mode<synchronous>, transform_indices = @transform_1, window_bounds = array<i64: 128, 128>}, {pipeline_mode = #tpu.pipeline_mode<synchronous>, transform_indices = @transform_2, window_bounds = array<i64: 1, 128>}, {pipeline_mode = #tpu.pipeline_mode<synchronous>, transform_indices = @transform_3, window_bounds = array<i64: 1152, 128>}, {pipeline_mode = #tpu.pipeline_mode<synchronous>, transform_indices = @transform_4, window_bounds = array<i64: 1, 128>}, {pipeline_mode = #tpu.pipeline_mode<synchronous>, transform_indices = @transform_5, window_bounds = array<i64: 128, 128>}, {pipeline_mode = #tpu.pipeline_mode<synchronous>, transform_indices = @transform_6, window_bounds = array<i64: 1, 128>}, {pipeline_mode = #tpu.pipeline_mode<synchronous>, transform_indices = @transform_7, window_bounds = array<i64: 128, 128>}, {pipeline_mode = #tpu.pipeline_mode<synchronous>, transform_indices = @transform_8, window_bounds = array<i64: 128, 128>}, {transform_indices = @transform_9, window_bounds = array<i64: 2, 8, 8, 128>}]} {
    %c0 = arith.constant 0 : index
    %c0_0 = arith.constant 0 : index
    %c0_1 = arith.constant 0 : index
    %c0_2 = arith.constant 0 : index
    %0 = vector.load %arg1[%c0, %c0_0, %c0_1, %c0_2] : memref<2x8x8x128xbf16, #tpu.memory_space<vmem>>, vector<2x8x8x128xbf16>
    %1 = vector.shape_cast %0 : vector<2x8x8x128xbf16> to vector<128x128xbf16>
    %c0_3 = arith.constant 0 : index
    %c0_4 = arith.constant 0 : index
    %2 = vector.load %arg2[%c0_3, %c0_4] : memref<128x128xbf16, #tpu.memory_space<vmem>>, vector<128x128xbf16>
    %cst = arith.constant dense<0.000000e+00> : vector<128x128xf32>
    %3 = tpu.matmul %1, %2, %cst {dimension_numbers = #tpu.dot_dimension_numbers<[1], [0], [0], [1], [0, 0, 1, 1], [], []>} : vector<128x128xbf16>, vector<128x128xbf16>, vector<128x128xf32> -> vector<128x128xf32>
    %c0_5 = arith.constant 0 : index
    %c0_6 = arith.constant 0 : index
    %4 = vector.load %arg3[%c0_5, %c0_6] : memref<1x128xf32, #tpu.memory_space<vmem>>, vector<1x128xf32>
    %5 = vector.broadcast %4 : vector<1x128xf32> to vector<128x128xf32>
    %6 = arith.addf %3, %5 : vector<128x128xf32>
    %cst_7 = arith.constant 0.000000e+00 : f32
    %7 = vector.broadcast %cst_7 : f32 to vector<128x128xf32>
    %8 = arith.maximumf %6, %7 : vector<128x128xf32>
    %cst_8 = arith.constant 0.000000e+00 : bf16
    %9 = vector.broadcast %cst_8 : bf16 to vector<2x1x16x128xbf16>
    %cst_9 = arith.constant 0.000000e+00 : bf16
    %10 = vector.broadcast %cst_9 : bf16 to vector<2x10x1x128xbf16>
    %c0_10 = arith.constant 0 : index
    %c0_11 = arith.constant 0 : index
    %c0_12 = arith.constant 0 : index
    %c0_13 = arith.constant 0 : index
    %11 = vector.load %arg11[%c0_10, %c0_11, %c0_12, %c0_13] : memref<2x10x16x128xbf16, #tpu.memory_space<vmem>>, vector<2x1x16x128xbf16>
    tpu.vector_store %arg11[%c0_10, %c0_11, %c0_12, %c0_13], %9 {strides = array<i32>} : memref<2x10x16x128xbf16, #tpu.memory_space<vmem>>, vector<2x1x16x128xbf16>,
    %c0_14 = arith.constant 0 : index
    %c9 = arith.constant 9 : index
    %c0_15 = arith.constant 0 : index
    %c0_16 = arith.constant 0 : index
    %12 = vector.load %arg11[%c0_14, %c9, %c0_15, %c0_16] : memref<2x10x16x128xbf16, #tpu.memory_space<vmem>>, vector<2x1x16x128xbf16>
    tpu.vector_store %arg11[%c0_14, %c9, %c0_15, %c0_16], %9 {strides = array<i32>} : memref<2x10x16x128xbf16, #tpu.memory_space<vmem>>, vector<2x1x16x128xbf16>,
    %c0_17 = arith.constant 0 : index
    %c0_18 = arith.constant 0 : index
    %c0_19 = arith.constant 0 : index
    %c0_20 = arith.constant 0 : index
    %13 = vector.load %arg11[%c0_17, %c0_18, %c0_19, %c0_20] : memref<2x10x16x128xbf16, #tpu.memory_space<vmem>>, vector<2x10x1x128xbf16>
    tpu.vector_store %arg11[%c0_17, %c0_18, %c0_19, %c0_20], %10 {strides = array<i32>} : memref<2x10x16x128xbf16, #tpu.memory_space<vmem>>, vector<2x10x1x128xbf16>,
    %c0_21 = arith.constant 0 : index
    %c0_22 = arith.constant 0 : index
    %c9_23 = arith.constant 9 : index
    %c0_24 = arith.constant 0 : index
    %14 = vector.load %arg11[%c0_21, %c0_22, %c9_23, %c0_24] : memref<2x10x16x128xbf16, #tpu.memory_space<vmem>>, vector<2x10x1x128xbf16>
    tpu.vector_store %arg11[%c0_21, %c0_22, %c9_23, %c0_24], %10 {strides = array<i32>} : memref<2x10x16x128xbf16, #tpu.memory_space<vmem>>, vector<2x10x1x128xbf16>,
    %15 = vector.shape_cast %8 : vector<128x128xf32> to vector<2x8x8x128xf32>
    %16 = arith.truncf %15 : vector<2x8x8x128xf32> to vector<2x8x8x128xbf16>
    %c0_25 = arith.constant 0 : index
    %c1 = arith.constant 1 : index
    %c1_26 = arith.constant 1 : index
    %c0_27 = arith.constant 0 : index
    %17 = vector.load %arg11[%c0_25, %c1, %c1_26, %c0_27] : memref<2x10x16x128xbf16, #tpu.memory_space<vmem>>, vector<2x8x8x128xbf16>
    tpu.vector_store %arg11[%c0_25, %c1, %c1_26, %c0_27], %16 {strides = array<i32>} : memref<2x10x16x128xbf16, #tpu.memory_space<vmem>>, vector<2x8x8x128xbf16>,
    %cst_28 = arith.constant 0.000000e+00 : f32
    %18 = vector.broadcast %cst_28 : f32 to vector<128x128xf32>
    %c0_29 = arith.constant 0 : index
    %c0_30 = arith.constant 0 : index
    %c0_31 = arith.constant 0 : index
    %c0_32 = arith.constant 0 : index
    %19 = vector.load %arg11[%c0_29, %c0_30, %c0_31, %c0_32] : memref<2x10x16x128xbf16, #tpu.memory_space<vmem>>, vector<2x8x8x128xbf16>
    %20 = vector.shape_cast %19 : vector<2x8x8x128xbf16> to vector<128x128xbf16>
    %c0_33 = arith.constant 0 : index
    %c0_34 = arith.constant 0 : index
    %21 = vector.load %arg4[%c0_33, %c0_34] : memref<1152x128xbf16, #tpu.memory_space<vmem>>, vector<128x128xbf16>
    %cst_35 = arith.constant dense<0.000000e+00> : vector<128x128xf32>
    %22 = tpu.matmul %20, %21, %cst_35 {dimension_numbers = #tpu.dot_dimension_numbers<[1], [0], [0], [1], [0, 0, 1, 1], [], []>} : vector<128x128xbf16>, vector<128x128xbf16>, vector<128x128xf32> -> vector<128x128xf32>
    %23 = arith.addf %18, %22 : vector<128x128xf32>
    %c0_36 = arith.constant 0 : index
    %c0_37 = arith.constant 0 : index
    %c1_38 = arith.constant 1 : index
    %c0_39 = arith.constant 0 : index
    %24 = vector.load %arg11[%c0_36, %c0_37, %c1_38, %c0_39] : memref<2x10x16x128xbf16, #tpu.memory_space<vmem>>, vector<2x8x8x128xbf16>
    %25 = vector.shape_cast %24 : vector<2x8x8x128xbf16> to vector<128x128xbf16>
    %c128 = arith.constant 128 : index
    %c0_40 = arith.constant 0 : index
    %26 = vector.load %arg4[%c128, %c0_40] : memref<1152x128xbf16, #tpu.memory_space<vmem>>, vector<128x128xbf16>
    %cst_41 = arith.constant dense<0.000000e+00> : vector<128x128xf32>
    %27 = tpu.matmul %25, %26, %cst_41 {dimension_numbers = #tpu.dot_dimension_numbers<[1], [0], [0], [1], [0, 0, 1, 1], [], []>} : vector<128x128xbf16>, vector<128x128xbf16>, vector<128x128xf32> -> vector<128x128xf32>
    %28 = arith.addf %23, %27 : vector<128x128xf32>
    %c0_42 = arith.constant 0 : index
    %c0_43 = arith.constant 0 : index
    %c2 = arith.constant 2 : index
    %c0_44 = arith.constant 0 : index
    %29 = vector.load %arg11[%c0_42, %c0_43, %c2, %c0_44] : memref<2x10x16x128xbf16, #tpu.memory_space<vmem>>, vector<2x8x8x128xbf16>
    %30 = vector.shape_cast %29 : vector<2x8x8x128xbf16> to vector<128x128xbf16>
    %c256 = arith.constant 256 : index
    %c0_45 = arith.constant 0 : index
    %31 = vector.load %arg4[%c256, %c0_45] : memref<1152x128xbf16, #tpu.memory_space<vmem>>, vector<128x128xbf16>
    %cst_46 = arith.constant dense<0.000000e+00> : vector<128x128xf32>
    %32 = tpu.matmul %30, %31, %cst_46 {dimension_numbers = #tpu.dot_dimension_numbers<[1], [0], [0], [1], [0, 0, 1, 1], [], []>} : vector<128x128xbf16>, vector<128x128xbf16>, vector<128x128xf32> -> vector<128x128xf32>
    %33 = arith.addf %28, %32 : vector<128x128xf32>
    %c0_47 = arith.constant 0 : index
    %c1_48 = arith.constant 1 : index
    %c0_49 = arith.constant 0 : index
    %c0_50 = arith.constant 0 : index
    %34 = vector.load %arg11[%c0_47, %c1_48, %c0_49, %c0_50] : memref<2x10x16x128xbf16, #tpu.memory_space<vmem>>, vector<2x8x8x128xbf16>
    %35 = vector.shape_cast %34 : vector<2x8x8x128xbf16> to vector<128x128xbf16>
    %c384 = arith.constant 384 : index
    %c0_51 = arith.constant 0 : index
    %36 = vector.load %arg4[%c384, %c0_51] : memref<1152x128xbf16, #tpu.memory_space<vmem>>, vector<128x128xbf16>
    %cst_52 = arith.constant dense<0.000000e+00> : vector<128x128xf32>
    %37 = tpu.matmul %35, %36, %cst_52 {dimension_numbers = #tpu.dot_dimension_numbers<[1], [0], [0], [1], [0, 0, 1, 1], [], []>} : vector<128x128xbf16>, vector<128x128xbf16>, vector<128x128xf32> -> vector<128x128xf32>
    %38 = arith.addf %33, %37 : vector<128x128xf32>
    %c0_53 = arith.constant 0 : index
    %c1_54 = arith.constant 1 : index
    %c1_55 = arith.constant 1 : index
    %c0_56 = arith.constant 0 : index
    %39 = vector.load %arg11[%c0_53, %c1_54, %c1_55, %c0_56] : memref<2x10x16x128xbf16, #tpu.memory_space<vmem>>, vector<2x8x8x128xbf16>
    %40 = vector.shape_cast %39 : vector<2x8x8x128xbf16> to vector<128x128xbf16>
    %c512 = arith.constant 512 : index
    %c0_57 = arith.constant 0 : index
    %41 = vector.load %arg4[%c512, %c0_57] : memref<1152x128xbf16, #tpu.memory_space<vmem>>, vector<128x128xbf16>
    %cst_58 = arith.constant dense<0.000000e+00> : vector<128x128xf32>
    %42 = tpu.matmul %40, %41, %cst_58 {dimension_numbers = #tpu.dot_dimension_numbers<[1], [0], [0], [1], [0, 0, 1, 1], [], []>} : vector<128x128xbf16>, vector<128x128xbf16>, vector<128x128xf32> -> vector<128x128xf32>
    %43 = arith.addf %38, %42 : vector<128x128xf32>
    %c0_59 = arith.constant 0 : index
    %c1_60 = arith.constant 1 : index
    %c2_61 = arith.constant 2 : index
    %c0_62 = arith.constant 0 : index
    %44 = vector.load %arg11[%c0_59, %c1_60, %c2_61, %c0_62] : memref<2x10x16x128xbf16, #tpu.memory_space<vmem>>, vector<2x8x8x128xbf16>
    %45 = vector.shape_cast %44 : vector<2x8x8x128xbf16> to vector<128x128xbf16>
    %c640 = arith.constant 640 : index
    %c0_63 = arith.constant 0 : index
    %46 = vector.load %arg4[%c640, %c0_63] : memref<1152x128xbf16, #tpu.memory_space<vmem>>, vector<128x128xbf16>
    %cst_64 = arith.constant dense<0.000000e+00> : vector<128x128xf32>
    %47 = tpu.matmul %45, %46, %cst_64 {dimension_numbers = #tpu.dot_dimension_numbers<[1], [0], [0], [1], [0, 0, 1, 1], [], []>} : vector<128x128xbf16>, vector<128x128xbf16>, vector<128x128xf32> -> vector<128x128xf32>
    %48 = arith.addf %43, %47 : vector<128x128xf32>
    %c0_65 = arith.constant 0 : index
    %c2_66 = arith.constant 2 : index
    %c0_67 = arith.constant 0 : index
    %c0_68 = arith.constant 0 : index
    %49 = vector.load %arg11[%c0_65, %c2_66, %c0_67, %c0_68] : memref<2x10x16x128xbf16, #tpu.memory_space<vmem>>, vector<2x8x8x128xbf16>
    %50 = vector.shape_cast %49 : vector<2x8x8x128xbf16> to vector<128x128xbf16>
    %c768 = arith.constant 768 : index
    %c0_69 = arith.constant 0 : index
    %51 = vector.load %arg4[%c768, %c0_69] : memref<1152x128xbf16, #tpu.memory_space<vmem>>, vector<128x128xbf16>
    %cst_70 = arith.constant dense<0.000000e+00> : vector<128x128xf32>
    %52 = tpu.matmul %50, %51, %cst_70 {dimension_numbers = #tpu.dot_dimension_numbers<[1], [0], [0], [1], [0, 0, 1, 1], [], []>} : vector<128x128xbf16>, vector<128x128xbf16>, vector<128x128xf32> -> vector<128x128xf32>
    %53 = arith.addf %48, %52 : vector<128x128xf32>
    %c0_71 = arith.constant 0 : index
    %c2_72 = arith.constant 2 : index
    %c1_73 = arith.constant 1 : index
    %c0_74 = arith.constant 0 : index
    %54 = vector.load %arg11[%c0_71, %c2_72, %c1_73, %c0_74] : memref<2x10x16x128xbf16, #tpu.memory_space<vmem>>, vector<2x8x8x128xbf16>
    %55 = vector.shape_cast %54 : vector<2x8x8x128xbf16> to vector<128x128xbf16>
    %c896 = arith.constant 896 : index
    %c0_75 = arith.constant 0 : index
    %56 = vector.load %arg4[%c896, %c0_75] : memref<1152x128xbf16, #tpu.memory_space<vmem>>, vector<128x128xbf16>
    %cst_76 = arith.constant dense<0.000000e+00> : vector<128x128xf32>
    %57 = tpu.matmul %55, %56, %cst_76 {dimension_numbers = #tpu.dot_dimension_numbers<[1], [0], [0], [1], [0, 0, 1, 1], [], []>} : vector<128x128xbf16>, vector<128x128xbf16>, vector<128x128xf32> -> vector<128x128xf32>
    %58 = arith.addf %53, %57 : vector<128x128xf32>
    %c0_77 = arith.constant 0 : index
    %c2_78 = arith.constant 2 : index
    %c2_79 = arith.constant 2 : index
    %c0_80 = arith.constant 0 : index
    %59 = vector.load %arg11[%c0_77, %c2_78, %c2_79, %c0_80] : memref<2x10x16x128xbf16, #tpu.memory_space<vmem>>, vector<2x8x8x128xbf16>
    %60 = vector.shape_cast %59 : vector<2x8x8x128xbf16> to vector<128x128xbf16>
    %c1024 = arith.constant 1024 : index
    %c0_81 = arith.constant 0 : index
    %61 = vector.load %arg4[%c1024, %c0_81] : memref<1152x128xbf16, #tpu.memory_space<vmem>>, vector<128x128xbf16>
    %cst_82 = arith.constant dense<0.000000e+00> : vector<128x128xf32>
    %62 = tpu.matmul %60, %61, %cst_82 {dimension_numbers = #tpu.dot_dimension_numbers<[1], [0], [0], [1], [0, 0, 1, 1], [], []>} : vector<128x128xbf16>, vector<128x128xbf16>, vector<128x128xf32> -> vector<128x128xf32>
    %63 = arith.addf %58, %62 : vector<128x128xf32>
    %c0_83 = arith.constant 0 : index
    %c0_84 = arith.constant 0 : index
    %64 = vector.load %arg5[%c0_83, %c0_84] : memref<1x128xf32, #tpu.memory_space<vmem>>, vector<1x128xf32>
    %65 = vector.broadcast %64 : vector<1x128xf32> to vector<128x128xf32>
    %66 = arith.addf %63, %65 : vector<128x128xf32>
    %cst_85 = arith.constant 0.000000e+00 : f32
    %67 = vector.broadcast %cst_85 : f32 to vector<128x128xf32>
    %68 = arith.maximumf %66, %67 : vector<128x128xf32>
    %69 = arith.truncf %68 : vector<128x128xf32> to vector<128x128xbf16>
    %c0_86 = arith.constant 0 : index
    %c0_87 = arith.constant 0 : index
    %70 = vector.load %arg6[%c0_86, %c0_87] : memref<128x128xbf16, #tpu.memory_space<vmem>>, vector<128x128xbf16>
    %cst_88 = arith.constant dense<0.000000e+00> : vector<128x128xf32>
    %71 = tpu.matmul %69, %70, %cst_88 {dimension_numbers = #tpu.dot_dimension_numbers<[1], [0], [0], [1], [0, 0, 1, 1], [], []>} : vector<128x128xbf16>, vector<128x128xbf16>, vector<128x128xf32> -> vector<128x128xf32>
    %c0_89 = arith.constant 0 : index
    %c0_90 = arith.constant 0 : index
    %72 = vector.load %arg7[%c0_89, %c0_90] : memref<1x128xf32, #tpu.memory_space<vmem>>, vector<1x128xf32>
    %73 = vector.broadcast %72 : vector<1x128xf32> to vector<128x128xf32>
    %74 = arith.addf %71, %73 : vector<128x128xf32>
    %75 = vector.shape_cast %74 : vector<128x128xf32> to vector<2x64x128xf32>
    %cst_91 = arith.constant dense<0.000000e+00> : vector<2x128xf32>
    %76 = vector.multi_reduction <add>, %75, %cst_91 [1] : vector<2x64x128xf32> to vector<2x128xf32>
    %cst_92 = arith.constant 6.400000e+01 : f32
    %77 = vector.broadcast %cst_92 : f32 to vector<2x128xf32>
    %78 = arith.divf %76, %77 : vector<2x128xf32>
    %79 = arith.truncf %78 : vector<2x128xf32> to vector<2x128xbf16>
    %c0_93 = arith.constant 0 : index
    %c0_94 = arith.constant 0 : index
    %80 = vector.load %arg8[%c0_93, %c0_94] : memref<128x128xbf16, #tpu.memory_space<vmem>>, vector<128x128xbf16>
    %cst_95 = arith.constant dense<0.000000e+00> : vector<2x128xf32>
    %81 = tpu.matmul %79, %80, %cst_95 {dimension_numbers = #tpu.dot_dimension_numbers<[1], [0], [0], [1], [0, 0, 1, 1], [], []>} : vector<2x128xbf16>, vector<128x128xbf16>, vector<2x128xf32> -> vector<2x128xf32>
    %cst_96 = arith.constant 0.000000e+00 : f32
    %82 = vector.broadcast %cst_96 : f32 to vector<2x128xf32>
    %83 = arith.maximumf %81, %82 : vector<2x128xf32>
    %84 = arith.truncf %83 : vector<2x128xf32> to vector<2x128xbf16>
    %c0_97 = arith.constant 0 : index
    %c0_98 = arith.constant 0 : index
    %85 = vector.load %arg9[%c0_97, %c0_98] : memref<128x128xbf16, #tpu.memory_space<vmem>>, vector<128x128xbf16>
    %cst_99 = arith.constant dense<0.000000e+00> : vector<2x128xf32>
    %86 = tpu.matmul %84, %85, %cst_99 {dimension_numbers = #tpu.dot_dimension_numbers<[1], [0], [0], [1], [0, 0, 1, 1], [], []>} : vector<2x128xbf16>, vector<128x128xbf16>, vector<2x128xf32> -> vector<2x128xf32>
    %87 = arith.negf %86 : vector<2x128xf32>
    %88 = math.exp %87 : vector<2x128xf32>
    %cst_100 = arith.constant 1.000000e+00 : f32
    %89 = vector.broadcast %cst_100 : f32 to vector<2x128xf32>
    %90 = arith.addf %89, %88 : vector<2x128xf32>
    %91 = arith.divf %89, %90 : vector<2x128xf32>
    %92 = arith.extf %1 : vector<128x128xbf16> to vector<128x128xf32>
    %93 = vector.shape_cast %92 : vector<128x128xf32> to vector<2x64x128xf32>
    %94 = vector.shape_cast %91 : vector<2x128xf32> to vector<2x1x128xf32>
    %95 = vector.broadcast %94 : vector<2x1x128xf32> to vector<2x64x128xf32>
    %96 = arith.mulf %75, %95 : vector<2x64x128xf32>
    %97 = arith.addf %96, %93 : vector<2x64x128xf32>
    %cst_101 = arith.constant 0.000000e+00 : f32
    %98 = vector.broadcast %cst_101 : f32 to vector<2x64x128xf32>
    %99 = arith.maximumf %97, %98 : vector<2x64x128xf32>
    %100 = vector.shape_cast %99 : vector<2x64x128xf32> to vector<2x8x8x128xf32>
    %101 = arith.truncf %100 : vector<2x8x8x128xf32> to vector<2x8x8x128xbf16>
    %c0_102 = arith.constant 0 : index
    %c0_103 = arith.constant 0 : index
    %c0_104 = arith.constant 0 : index
    %c0_105 = arith.constant 0 : index
    %102 = vector.load %arg10[%c0_102, %c0_103, %c0_104, %c0_105] : memref<2x8x8x128xbf16, #tpu.memory_space<vmem>>, vector<2x8x8x128xbf16>
    tpu.vector_store %arg10[%c0_102, %c0_103, %c0_104, %c0_105], %101 {strides = array<i32>} : memref<2x8x8x128xbf16, #tpu.memory_space<vmem>>, vector<2x8x8x128xbf16>,
    return
  }
  func.func @transform_0(%arg0: i32) -> (i32, i32, i32, i32) {
    %c0_i32 = arith.constant 0 : i32
    %c0_i32_0 = arith.constant 0 : i32
    %c0_i32_1 = arith.constant 0 : i32
    %c0_i32_2 = arith.constant 0 : i32
    return %arg0, %c0_i32, %c0_i32_0, %c0_i32_1 : i32, i32, i32, i32
  }
  func.func @transform_1(%arg0: i32) -> (i32, i32) {
    %c0_i32 = arith.constant 0 : i32
    %c0_i32_0 = arith.constant 0 : i32
    %c0_i32_1 = arith.constant 0 : i32
    return %c0_i32, %c0_i32_0 : i32, i32
  }
  func.func @transform_2(%arg0: i32) -> (i32, i32) {
    %c0_i32 = arith.constant 0 : i32
    %c0_i32_0 = arith.constant 0 : i32
    %c0_i32_1 = arith.constant 0 : i32
    return %c0_i32, %c0_i32_0 : i32, i32
  }
  func.func @transform_3(%arg0: i32) -> (i32, i32) {
    %c0_i32 = arith.constant 0 : i32
    %c0_i32_0 = arith.constant 0 : i32
    %c0_i32_1 = arith.constant 0 : i32
    return %c0_i32, %c0_i32_0 : i32, i32
  }
  func.func @transform_4(%arg0: i32) -> (i32, i32) {
    %c0_i32 = arith.constant 0 : i32
    %c0_i32_0 = arith.constant 0 : i32
    %c0_i32_1 = arith.constant 0 : i32
    return %c0_i32, %c0_i32_0 : i32, i32
  }
  func.func @transform_5(%arg0: i32) -> (i32, i32) {
    %c0_i32 = arith.constant 0 : i32
    %c0_i32_0 = arith.constant 0 : i32
    %c0_i32_1 = arith.constant 0 : i32
    return %c0_i32, %c0_i32_0 : i32, i32
  }
  func.func @transform_6(%arg0: i32) -> (i32, i32) {
    %c0_i32 = arith.constant 0 : i32
    %c0_i32_0 = arith.constant 0 : i32
    %c0_i32_1 = arith.constant 0 : i32
    return %c0_i32, %c0_i32_0 : i32, i32
  }
  func.func @transform_7(%arg0: i32) -> (i32, i32) {
    %c0_i32 = arith.constant 0 : i32
    %c0_i32_0 = arith.constant 0 : i32
    %c0_i32_1 = arith.constant 0 : i32
    return %c0_i32, %c0_i32_0 : i32, i32
  }
  func.func @transform_8(%arg0: i32) -> (i32, i32) {
    %c0_i32 = arith.constant 0 : i32
    %c0_i32_0 = arith.constant 0 : i32
    %c0_i32_1 = arith.constant 0 : i32
    return %c0_i32, %c0_i32_0 : i32, i32
  }
  func.func @transform_9(%arg0: i32) -> (i32, i32, i32, i32) {
    %c0_i32 = arith.constant 0 : i32
    %c0_i32_0 = arith.constant 0 : i32
    %c0_i32_1 = arith.constant 0 : i32
    %c0_i32_2 = arith.constant 0 : i32
    return %arg0, %c0_i32, %c0_i32_0, %c0_i32_1 : i32, i32, i32, i32
  }
}

</mosaic_0001>

<bundles_post_ra>
// kernel: tpu_custom_call.1
= control target key start
LH: loop header
LB: loop body
LE: loop exit
PB: predicated region body
PF: predicated region fallthrough
CT: control target
= control target key end

     0   :  { %14 = vsyncpa [#allocation4], 0  ;;  %s7176_s0 = inlined_call_operand.hbm [shape: bf16[2,8,8,128], index: 0, kind: input, shape index: {}]   ;;  %s7177_s1 = inlined_call_operand.hbm [shape: bf16[128,128], index: 1, kind: input, shape index: {}]   ;;  %s7178_s2 = inlined_call_operand.vmem [shape: f32[1,128], index: 2, kind: input, shape index: {}]   ;;  %s7179_s3 = inlined_call_operand.hbm [shape: bf16[1152,128], index: 3, kind: input, shape index: {}]   ;;  %s7180_s4 = inlined_call_operand.vmem [shape: f32[1,128], index: 4, kind: input, shape index: {}]   ;;  %s7181_s5 = inlined_call_operand.hbm [shape: bf16[128,128], index: 5, kind: input, shape index: {}]   ;;  %s7182_s6 = inlined_call_operand.vmem [shape: f32[1,128], index: 6, kind: input, shape index: {}]   ;;  %s7183_s7 = inlined_call_operand.hbm [shape: bf16[128,128], index: 7, kind: input, shape index: {}]   ;;  %s7184_s8 = inlined_call_operand.hbm [shape: bf16[128,128], index: 8, kind: input, shape index: {}]   ;;  %s7185_s9 = inlined_call_operand.hbm [shape: bf16[2,8,8,128], index: 9, kind: output, shape index: {}]  }
   0x1   :  { %15 = vsyncpa [#allocation7], 0 }
   0x2   :  { %16 = vsyncpa [#allocation10], 0 }
   0x3   :  { %17 = vsyncpa [#allocation13], 0 }
   0x4   :  { %18 = vsyncpa [#allocation5], 0  ;;  %s6416_s30 = smov [#allocation6]   ;;  %s6417_s11 = smov [#allocation9]  }
   0x5   :  { %s36_s10 = sshll.u32 %s6416_s30, 4  ;;  %s64_s12 = sshll.u32 %s6417_s11, 4  ;;  %s37_s10 = int_to_ptr.vmem [resolvable:$true] %s36_s10  ;;  %s6479_s12 = int_to_ptr.vmem [resolvable:$true] %s64_s12 }
   0x6   :  { %s6252_s15 = scalar_lea.hbm %s7177_s1, 1024 }
   0x7   :  { %p6253_p0 = scmp.ne.s32.totalorder %s7177_s1, %s6252_s15  ;;  %p6256_p1 = scmp.lt.u32.totalorder %s6252_s15, %s7177_s1 }
   0x9   :  { %p6258_p2 = pnand %p6256_p1, %p6253_p0 }
   0xb   :  { %6261 = shalt.err (!%p6258_p2)
}
   0xc   :  { %s6262_s20 = scalar_lea.vmem %s37_s10, 1024  ;;  %p6267_p4 = scmp.lt.s32.totalorder %s37_s10, %s37_s10 }
   0xd   :  { %p6263_p3 = scmp.ne.s32.totalorder %s37_s10, %s6262_s20  ;;  %p6268_p5 = scmp.lt.s32.totalorder %s6262_s20, %s6262_s20 }
   0xf   :  { %p6269_p6 = por %p6268_p5, %p6267_p4 }
  0x11   :  { %p6270_p7 = pnand %p6269_p6, %p6263_p3 }
  0x13   :  { %6273 = shalt.err (!%p6270_p7)
}
  0x14   :  { %s6418_s21 = smov 64   ;;  %s6419_s22 = smov 4  }
  0x15   :  { %42 = dma.hbm_to_vmem [thread:$0]  %s7177_s1, 1024, %s37_s10, [#allocation7], %s6418_s21, %s6418_s21, %s6419_s22  }
  0x16   :  { %s6274_s27 = scalar_lea.hbm %s7181_s5, 1024 }
  0x17   :  { %p6275_p8 = scmp.ne.s32.totalorder %s7181_s5, %s6274_s27  ;;  %p6278_p9 = scmp.lt.u32.totalorder %s6274_s27, %s7181_s5 }
  0x19   :  { %p6280_p10 = pnand %p6278_p9, %p6275_p8 }
  0x1b   :  { %6283 = shalt.err (!%p6280_p10)
}
  0x1c   :  { %s6284_s13 = scalar_lea.vmem %s6479_s12, 1024  ;;  %p6289_p12 = scmp.lt.s32.totalorder %s6479_s12, %s6479_s12 }
  0x1d   :  { %p6285_p11 = scmp.ne.s32.totalorder %s6479_s12, %s6284_s13  ;;  %p6290_p13 = scmp.lt.s32.totalorder %s6284_s13, %s6284_s13 }
  0x1f   :  { %p6291_p0 = por %p6290_p13, %p6289_p12 }
  0x21   :  { %p6292_p1 = pnand %p6291_p0, %p6285_p11 }
  0x23   :  { %6295 = shalt.err (!%p6292_p1)
}
  0x24   :  { %70 = dma.hbm_to_vmem [thread:$0]  %s7181_s5, 1024, %s6479_s12, [#allocation10], %s6418_s21, %s6418_s21, %s6419_s22  }
  0x25   :  { %s6420_s14 = smov [#allocation3]   ;;  %s6421_s16 = smov [#allocation8]  }
  0x26   :  { %s24_s15 = sshll.u32 %s6420_s14, 4  ;;  %s50_s17 = sshll.u32 %s6421_s16, 4  ;;  %s25_s15 = int_to_ptr.vmem [resolvable:$true] %s24_s15  ;;  %s6516_s17 = int_to_ptr.vmem [resolvable:$true] %s50_s17 }
  0x27   :  { %s6296_s20 = scalar_lea.hbm %s7176_s0, 1024 }
  0x28   :  { %p6297_p2 = scmp.ne.s32.totalorder %s7176_s0, %s6296_s20  ;;  %p6300_p3 = scmp.lt.u32.totalorder %s6296_s20, %s7176_s0 }
  0x2a   :  { %p6302_p4 = pnand %p6300_p3, %p6297_p2 }
  0x2c   :  { %6305 = shalt.err (!%p6302_p4)
}
  0x2d   :  { %s6306_s5 = scalar_lea.vmem %s25_s15, 1024  ;;  %p6311_p6 = scmp.lt.s32.totalorder %s25_s15, %s25_s15 }
  0x2e   :  { %p6307_p5 = scmp.ne.s32.totalorder %s25_s15, %s6306_s5  ;;  %p6312_p7 = scmp.lt.s32.totalorder %s6306_s5, %s6306_s5 }
  0x30   :  { %p6313_p8 = por %p6312_p7, %p6311_p6 }
  0x32   :  { %p6314_p9 = pnand %p6313_p8, %p6307_p5 }
  0x34   :  { %6317 = shalt.err (!%p6314_p9)
}
  0x35   :  { %30 = dma.hbm_to_vmem [thread:$0]  %s7176_s0, 1024, %s25_s15, [#allocation4], %s6418_s21, %s6418_s21, %s6419_s22  }
  0x36   :  { %s6318_s30 = scalar_lea.hbm %s7179_s3, 9216 }
  0x37   :  { %p6319_p10 = scmp.ne.s32.totalorder %s7179_s3, %s6318_s30  ;;  %p6322_p11 = scmp.lt.u32.totalorder %s6318_s30, %s7179_s3 }
  0x39   :  { %p6324_p12 = pnand %p6322_p11, %p6319_p10 }
  0x3b   :  { %6327 = shalt.err (!%p6324_p12)
}
  0x3c   :  { %s6328_s14 = scalar_lea.vmem %s6516_s17, 9216  ;;  %p6333_p0 = scmp.lt.s32.totalorder %s6516_s17, %s6516_s17 }
  0x3d   :  { %p6329_p13 = scmp.ne.s32.totalorder %s6516_s17, %s6328_s14  ;;  %p6334_p1 = scmp.lt.s32.totalorder %s6328_s14, %s6328_s14 }
  0x3f   :  { %p6335_p2 = por %p6334_p1, %p6333_p0 }
  0x41   :  { %p6336_p3 = pnand %p6335_p2, %p6329_p13 }
  0x43   :  { %6339 = shalt.err (!%p6336_p3)
}
  0x44   :  { %56 = dma.hbm_to_vmem [thread:$0]  %s7179_s3, 9216, %s6516_s17, [#allocation7], %s6418_s21, %s6418_s21, %s6419_s22  }
  0x45   :  { %s6422_s16 = smov [#allocation11]   ;;  %s6423_s19 = smov [#allocation12]  }
  0x46   :  { %s78_s18 = sshll.u32 %s6422_s16, 4  ;;  %s90_s20 = sshll.u32 %s6423_s19, 4  ;;  %s79_s18 = int_to_ptr.vmem [resolvable:$true] %s78_s18  ;;  %s6553_s20 = int_to_ptr.vmem [resolvable:$true] %s90_s20 }
  0x47   :  { %s6340_s25 = scalar_lea.hbm %s7183_s7, 1024 }
  0x48   :  { %p6341_p4 = scmp.ne.s32.totalorder %s7183_s7, %s6340_s25  ;;  %p6344_p5 = scmp.lt.u32.totalorder %s6340_s25, %s7183_s7 }
  0x4a   :  { %p6346_p6 = pnand %p6344_p5, %p6341_p4 }
  0x4c   :  { %6349 = shalt.err (!%p6346_p6)
}
  0x4d   :  { %s6350_s3 = scalar_lea.vmem %s79_s18, 1024  ;;  %p6355_p8 = scmp.lt.s32.totalorder %s79_s18, %s79_s18 }
  0x4e   :  { %p6351_p7 = scmp.ne.s32.totalorder %s79_s18, %s6350_s3  ;;  %p6356_p9 = scmp.lt.s32.totalorder %s6350_s3, %s6350_s3 }
  0x50   :  { %p6357_p10 = por %p6356_p9, %p6355_p8 }
  0x52   :  { %p6358_p11 = pnand %p6357_p10, %p6351_p7 }
  0x54   :  { %6361 = shalt.err (!%p6358_p11)
}
  0x55   :  { %84 = dma.hbm_to_vmem [thread:$0]  %s7183_s7, 1024, %s79_s18, [#allocation10], %s6418_s21, %s6418_s21, %s6419_s22  }
  0x56   :  { %s6362_s11 = scalar_lea.hbm %s7184_s8, 1024 }
  0x57   :  { %p6363_p12 = scmp.ne.s32.totalorder %s7184_s8, %s6362_s11  ;;  %p6366_p13 = scmp.lt.u32.totalorder %s6362_s11, %s7184_s8 }
  0x59   :  { %p6368_p0 = pnand %p6366_p13, %p6363_p12 }
  0x5b   :  { %6371 = shalt.err (!%p6368_p0)
}
  0x5c   :  { %s6372_s0 = scalar_lea.vmem %s6553_s20, 1024  ;;  %p6377_p2 = scmp.lt.s32.totalorder %s6553_s20, %s6553_s20 }
  0x5d   :  { %p6373_p1 = scmp.ne.s32.totalorder %s6553_s20, %s6372_s0  ;;  %p6378_p3 = scmp.lt.s32.totalorder %s6372_s0, %s6372_s0 }
  0x5f   :  { %p6379_p4 = por %p6378_p3, %p6377_p2 }
  0x61   :  { %p6380_p5 = pnand %p6379_p4, %p6373_p1 }
  0x63   :  { %6383 = shalt.err (!%p6380_p5)
}
  0x64   :  { %96 = dma.hbm_to_vmem [thread:$0]  %s7184_s8, 1024, %s6553_s20, [#allocation13], %s6418_s21, %s6418_s21, %s6419_s22  }
  0x65   :  { %6406 = dma.done.wait [#allocation4], 1024  }
  0x66   :  { %6407 = vsyncadd [#allocation4], 4294966272 }
  0x67   :  { %6408 = dma.done.wait [#allocation7], 10240  }
  0x68   :  { %6409 = vsyncadd [#allocation7], 4294957056 }
  0x69   :  { %6410 = dma.done.wait [#allocation10], 2048  }
  0x6a   :  { %6411 = vsyncadd [#allocation10], 4294965248 }
  0x6b   :  { %6412 = dma.done.wait [#allocation13], 1024  }
  0x6c   :  { %6413 = vsyncadd [#allocation13], 4294966272  ;;  %v5904_v0 = vld [vmem:[#allocation6] sm:$0xff]   ;;  %v5905_v1 = vld [vmem:[#allocation6 + $0x8] sm:$0xff]   ;;  %vm369_vm0 = vcmask 1040384   ;;  %vm432_vm2 = vcmask 1044484  }
  0x6d   :  { %5371 = vmatprep.subr.bf16.mxu0 %v5904_v0  ;;  %v5906_v2 = vld [vmem:[#allocation6 + $0x10] sm:$0xff]   ;;  %v5907_v3 = vld [vmem:[#allocation6 + $0x18] sm:$0xff]   ;;  %v116_v4 = vld [vmem:[#allocation3] sm:$0xff]   ;;  %vm370_vm1 = vsmask.f32 256  ;;  %v6424_v40 = vmov 0  }
  0x6e   :  { %5372 = vmatpush3.bf16.msra.mxu0 %v5904_v0  ;;  %v5908_v5 = vld [vmem:[#allocation6 + $0x20] sm:$0xff]   ;;  %5387 = vmatprep.mubr.bf16.mxu0 %v116_v4  ;;  %v5921_v7 = vld [vmem:[#allocation8 + $0xc8] sm:$0xff]   ;;  %v5910_v9 = vld [vmem:[#allocation6 + $0x30] sm:$0xff]   ;;  %vm433_vm3 = vsmask.f32 7954  ;;  %364 = vst [vmem:[#allocation2] sm:$0xff] %v6424_v40 }
  0x6f   :  { %5373 = vmatprep.subr.bf16.mxu0 %v5905_v1  ;;  %v5920_v6 = vld [vmem:[#allocation8 + $0xc0] sm:$0xff]   ;;  %v5909_v8 = vld [vmem:[#allocation6 + $0x28] sm:$0xff]   ;;  %v5911_v10 = vld [vmem:[#allocation6 + $0x38] sm:$0xff]   ;;  %365 = vst [vmem:[#allocation2 + $0x50] sm:$0xff] %v6424_v40  ;;  %vm819_vm6 = vsmask.f32 3328 }
  0x70   :  { %5499 = vmatprep.subr.bf16.mxu1 %v5920_v6  ;;  %v118_v11 = vld [vmem:[#allocation3 + $0x8] sm:$0xff]   ;;  %v120_v12 = vld [vmem:[#allocation3 + $0x10] sm:$0xff]   ;;  %v122_v13 = vld [vmem:[#allocation3 + $0x18] sm:$0xff]   ;;  %367 = vst [vmem:[#allocation2 + $0x48] sm:$0xff] %v6424_v40  ;;  %vm820_vm7 = vsmask.f32 7440 }
  0x71   :  { %5500 = vmatpush3.bf16.msra.mxu1 %v5920_v6  ;;  %v124_v14 = vld [vmem:[#allocation3 + $0x20] sm:$0xff]   ;;  %v126_v15 = vld [vmem:[#allocation3 + $0x28] sm:$0xff]   ;;  %v128_v16 = vld [vmem:[#allocation3 + $0x30] sm:$0xff]   ;;  %368 = vst [vmem:[#allocation2 + $0x98] sm:$0xff] %v6424_v40  ;;  %vm1528_vm8 = vcmask 1042432   ;;  %vm1529_vm9 = vcmask 1046532  }
  0x72   :  { %5374 = vmatpush3.bf16.msra.mxu0 %v5905_v1  ;;  %5501 = vmatprep.subr.bf16.mxu1 %v5921_v7  ;;  %v130_v17 = vld [vmem:[#allocation3 + $0x38] sm:$0xff]   ;;  %v5922_v18 = vld [vmem:[#allocation8 + $0xd0] sm:$0xff]   ;;  %vm6590_vm4 = vmand %vm369_vm0, %vm370_vm1  ;;  %vm640_vm12 = vcmask 1044480   ;;  %vm641_vm13 = vsmask.f32 4354  ;;  %vm6426_vm15 = vmmov 0  }
  0x73   :  { %5375 = vmatprep.subr.bf16.mxu0 %v5906_v2  ;;  %v381_v20 = vld [vmem:[#allocation2 + $0x18] sm:$0x1]  ;;  %v444_v21 = vld [vmem:[#allocation2 + $0x18] sm:$0x10]  ;;  %vm6596_vm5 = vmand %vm432_vm2, %vm433_vm3  ;;  %vm4349_vm0 = vcmask 1041409  }
  0x74   :  { %v382_v22 = vsel %vm6590_vm4, 0, %v381_v20  ;;  %v375_v24 = vld [vmem:[#allocation2 + $0x8] sm:$0x1]  ;;  %v438_v25 = vld [vmem:[#allocation2 + $0x8] sm:$0x10]  ;;  %v445_v26 = vsel %vm6596_vm5, 0, %v444_v21  ;;  %vm6685_vm10 = vmor %vm819_vm6, %vm820_vm7 }
  0x75   :  { %5502 = vmatpush3.bf16.msra.mxu1 %v5921_v7  ;;  %383 = vst [vmem:[#allocation2 + $0x18] sm:$0x1] %v382_v22  ;;  %v376_v27 = vsel %vm6590_vm4, 0, %v375_v24  ;;  %v439_v28 = vsel %vm6596_vm5, 0, %v438_v25  ;;  %v384_v29 = vld [vmem:[#allocation2 + $0x20] sm:$0x1]  ;;  %vm6690_vm11 = vmor %vm1528_vm8, %vm1529_vm9 }
  0x76   :  { %5376 = vmatpush3.bf16.msra.mxu0 %v5906_v2  ;;  %5503 = vmatprep.subr.bf16.mxu1 %v5922_v18  ;;  %v5923_v30 = vld [vmem:[#allocation8 + $0x40] sm:$0xff]   ;;  %446 = vst [vmem:[#allocation2 + $0x18] sm:$0x10] %v445_v26  ;;  %377 = vst [vmem:[#allocation2 + $0x8] sm:$0x1] %v376_v27  ;;  %v385_v31 = vsel %vm6590_vm4, 0, %v384_v29 }
  0x77   :  { %5377 = vmatprep.subr.bf16.mxu0 %v5907_v3  ;;  %440 = vst [vmem:[#allocation2 + $0x8] sm:$0x10] %v439_v28  ;;  %v447_v32 = vld [vmem:[#allocation2 + $0x20] sm:$0x10]  ;;  %v378_v33 = vld [vmem:[#allocation2 + $0x10] sm:$0x1]  ;;  %vm6713_vm14 = vmand %vm640_vm12, %vm641_vm13 }
  0x78   :  { %v5924_v34 = vld [vmem:[#allocation8 + $0xd8] sm:$0xff]   ;;  %386 = vst [vmem:[#allocation2 + $0x20] sm:$0x1] %v385_v31  ;;  %v448_v35 = vsel %vm6596_vm5, 0, %v447_v32  ;;  %v379_v36 = vsel %vm6590_vm4, 0, %v378_v33  ;;  %v5925_v39 = vld [vmem:[#allocation8 + $0x48] sm:$0xff]  }
  0x79   :  { %5504 = vmatpush3.bf16.msra.mxu1 %v5922_v18  ;;  %v441_v37 = vld [vmem:[#allocation2 + $0x10] sm:$0x10]  ;;  %449 = vst [vmem:[#allocation2 + $0x20] sm:$0x10] %v448_v35  ;;  %380 = vst [vmem:[#allocation2 + $0x10] sm:$0x1] %v379_v36 }
  0x7a   :  { %5378 = vmatpush3.bf16.msra.mxu0 %v5907_v3  ;;  %v442_v38 = vsel %vm6596_vm5, 0, %v441_v37  ;;  %5505 = vmatprep.subr.bf16.mxu1 %v5924_v34  ;;  %v5926_v41 = vld [vmem:[#allocation8 + $0xe0] sm:$0xff]   ;;  %v393_v42 = vld [vmem:[#allocation2 + $0x38] sm:$0x1]  ;;  %v456_v44 = vld [vmem:[#allocation2 + $0x38] sm:$0x10] }
  0x7b   :  { %5379 = vmatprep.subr.bf16.mxu0 %v5908_v5  ;;  %443 = vst [vmem:[#allocation2 + $0x10] sm:$0x10] %v442_v38  ;;  %v394_v43 = vsel %vm6590_vm4, 0, %v393_v42  ;;  %v387_v45 = vld [vmem:[#allocation2 + $0x28] sm:$0x1]  ;;  %v457_v46 = vsel %vm6596_vm5, 0, %v456_v44 }
  0x7c   :  { %395 = vst [vmem:[#allocation2 + $0x38] sm:$0x1] %v394_v43  ;;  %v388_v47 = vsel %vm6590_vm4, 0, %v387_v45  ;;  %458 = vst [vmem:[#allocation2 + $0x38] sm:$0x10] %v457_v46  ;;  %v5927_v54 = vld [vmem:[#allocation8 + $0x50] sm:$0xff]  }
  0x7d   :  { %5506 = vmatpush3.bf16.msra.mxu1 %v5924_v34  ;;  %389 = vst [vmem:[#allocation2 + $0x28] sm:$0x1] %v388_v47  ;;  %v450_v48 = vld [vmem:[#allocation2 + $0x28] sm:$0x10]  ;;  %v396_v49 = vld [vmem:[#allocation2 + $0x40] sm:$0x1] }
  0x7e   :  { %5380 = vmatpush3.bf16.msra.mxu0 %v5908_v5  ;;  %5507 = vmatprep.subr.bf16.mxu1 %v5926_v41  ;;  %v459_v50 = vld [vmem:[#allocation2 + $0x40] sm:$0x10]  ;;  %v451_v51 = vsel %vm6596_vm5, 0, %v450_v48  ;;  %v397_v52 = vsel %vm6590_vm4, 0, %v396_v49  ;;  %v390_v55 = vld [vmem:[#allocation2 + $0x30] sm:$0x1] }
  0x7f   :  { %5381 = vmatprep.subr.bf16.mxu0 %v5909_v8  ;;  %v460_v53 = vsel %vm6596_vm5, 0, %v459_v50  ;;  %452 = vst [vmem:[#allocation2 + $0x28] sm:$0x10] %v451_v51  ;;  %398 = vst [vmem:[#allocation2 + $0x40] sm:$0x1] %v397_v52  ;;  %v391_v57 = vsel %vm6590_vm4, 0, %v390_v55 }
  0x80   :  { %461 = vst [vmem:[#allocation2 + $0x40] sm:$0x10] %v460_v53  ;;  %v453_v56 = vld [vmem:[#allocation2 + $0x30] sm:$0x10]  ;;  %v5928_v59 = vld [vmem:[#allocation8 + $0xe8] sm:$0xff]   ;;  %v5929_v60 = vld [vmem:[#allocation8 + $0x58] sm:$0xff]  }
  0x81   :  { %5508 = vmatpush3.bf16.msra.mxu1 %v5926_v41  ;;  %v454_v58 = vsel %vm6596_vm5, 0, %v453_v56  ;;  %v5930_v61 = vld [vmem:[#allocation8 + $0xf0] sm:$0xff]   ;;  %392 = vst [vmem:[#allocation2 + $0x30] sm:$0x1] %v391_v57  ;;  %v372_v62 = vld [vmem:[#allocation2] sm:$0x1] }
  0x82   :  { %5382 = vmatpush3.bf16.msra.mxu0 %v5909_v8  ;;  %455 = vst [vmem:[#allocation2 + $0x30] sm:$0x10] %v454_v58  ;;  %v435_v63 = vld [vmem:[#allocation2] sm:$0x10]  ;;  %5509 = vmatprep.subr.bf16.mxu1 %v5928_v59  ;;  %v411_v0 = vld [vmem:[#allocation2 + $0x68] sm:$0x1] }
  0x83   :  { %5383 = vmatprep.subr.bf16.mxu0 %v5910_v9  ;;  %v474_v1 = vld [vmem:[#allocation2 + $0x68] sm:$0x10]  ;;  %v373_v2 = vsel %vm6590_vm4, 0, %v372_v62  ;;  %v436_v3 = vsel %vm6596_vm5, 0, %v435_v63  ;;  %v412_v4 = vsel %vm6590_vm4, 0, %v411_v0  ;;  %v5932_v18 = vld [vmem:[#allocation8 + $0xf8] sm:$0xff]  }
  0x84   :  { %v475_v5 = vsel %vm6596_vm5, 0, %v474_v1  ;;  %v405_v6 = vld [vmem:[#allocation2 + $0x58] sm:$0x1]  ;;  %v468_v7 = vld [vmem:[#allocation2 + $0x58] sm:$0x10]  ;;  %v5933_v20 = vld [vmem:[#allocation8 + $0x68] sm:$0xff]  }
  0x85   :  { %5510 = vmatpush3.bf16.msra.mxu1 %v5928_v59  ;;  %374 = vst [vmem:[#allocation2] sm:$0x1] %v373_v2  ;;  %437 = vst [vmem:[#allocation2] sm:$0x10] %v436_v3  ;;  %v406_v8 = vsel %vm6590_vm4, 0, %v405_v6  ;;  %v6650_v22 = vld [vmem:[#allocation8 + $0x100] sm:$0xff]  }
  0x86   :  { %5384 = vmatpush3.bf16.msra.mxu0 %v5910_v9  ;;  %413 = vst [vmem:[#allocation2 + $0x68] sm:$0x1] %v412_v4  ;;  %476 = vst [vmem:[#allocation2 + $0x68] sm:$0x10] %v475_v5  ;;  %v469_v9 = vsel %vm6596_vm5, 0, %v468_v7  ;;  %5511 = vmatprep.subr.bf16.mxu1 %v5930_v61  ;;  %v5937_v31 = vld [vmem:[#allocation8 + $0x70] sm:$0xff]  }
  0x87   :  { %5385 = vmatprep.subr.bf16.mxu0 %v5911_v10  ;;  %407 = vst [vmem:[#allocation2 + $0x58] sm:$0x1] %v406_v8  ;;  %470 = vst [vmem:[#allocation2 + $0x58] sm:$0x10] %v469_v9  ;;  %v423_v24 = vld [vmem:[#allocation2 + $0x88] sm:$0x1] }
  0x88   :  { %v486_v25 = vld [vmem:[#allocation2 + $0x88] sm:$0x10]  ;;  %v424_v26 = vsel %vm6590_vm4, 0, %v423_v24  ;;  %v417_v28 = vld [vmem:[#allocation2 + $0x78] sm:$0x1]  ;;  %v6673_v46 = vld [vmem:[#allocation8] sm:$0xff]  }
  0x89   :  { %5512 = vmatpush3.bf16.msra.mxu1 %v5930_v61  ;;  %v487_v27 = vsel %vm6596_vm5, 0, %v486_v25  ;;  %425 = vst [vmem:[#allocation2 + $0x88] sm:$0x1] %v424_v26  ;;  %v418_v29 = vsel %vm6590_vm4, 0, %v417_v28  ;;  %v426_v33 = vld [vmem:[#allocation2 + $0x90] sm:$0x1] }
  0x8a   :  { %5386 = vmatpush3.bf16.msra.mxu0 %v5911_v10  ;;  %v414_v10 = vld [vmem:[#allocation2 + $0x70] sm:$0x1]  ;;  %5513 = vmatprep.subr.bf16.mxu1 %v5932_v18  ;;  %488 = vst [vmem:[#allocation2 + $0x88] sm:$0x10] %v487_v27  ;;  %419 = vst [vmem:[#allocation2 + $0x78] sm:$0x1] %v418_v29 }
  0x8b   :  { %5403 = vmatprep.subr.bf16.mxu0 %v5923_v30  ;;  %v489_v34 = vld [vmem:[#allocation2 + $0x90] sm:$0x10]  ;;  %v427_v35 = vsel %vm6590_vm4, 0, %v426_v33  ;;  %v420_v37 = vld [vmem:[#allocation2 + $0x80] sm:$0x1]  ;;  %v5939_v41 = vld [vmem:[#allocation8 + $0x78] sm:$0xff]  }
  0x8c   :  { %v490_v36 = vsel %vm6596_vm5, 0, %v489_v34  ;;  %428 = vst [vmem:[#allocation2 + $0x90] sm:$0x1] %v427_v35  ;;  %v421_v38 = vsel %vm6590_vm4, 0, %v420_v37  ;;  %v402_v42 = vld [vmem:[#allocation2 + $0x50] sm:$0x1] }
  0x8d   :  { %5388 = vmatmul.mubr.bf16.vlgmr.msra.gmra.mrb[0].mxu0 %v118_v11  ;;  %v415_v11 = vsel %vm6590_vm4, 0, %v414_v10  ;;  %5514 = vmatpush3.bf16.msra.mxu1 %v5932_v18  ;;  %491 = vst [vmem:[#allocation2 + $0x90] sm:$0x10] %v490_v36  ;;  %422 = vst [vmem:[#allocation2 + $0x80] sm:$0x1] %v421_v38  ;;  %v403_v44 = vsel %vm6590_vm4, 0, %v402_v42 }
  0x8e   :  { %5391 = vmatprep.mubr.bf16.mxu0 %v120_v12  ;;  %5404 = vmatpush3.bf16.msra.mxu0 %v5923_v30  ;;  %v477_v12 = vld [vmem:[#allocation2 + $0x70] sm:$0x10]  ;;  %416 = vst [vmem:[#allocation2 + $0x70] sm:$0x1] %v415_v11  ;;  %v480_v30 = vld [vmem:[#allocation2 + $0x78] sm:$0x10] }
  0x8f   :  { %5405 = vmatprep.subr.bf16.mxu0 %v5925_v39  ;;  %5531 = vmatprep.subr.bf16.mxu1 %v6650_v22  ;;  %v481_v32 = vsel %vm6596_vm5, 0, %v480_v30  ;;  %v465_v43 = vld [vmem:[#allocation2 + $0x50] sm:$0x10]  ;;  %404 = vst [vmem:[#allocation2 + $0x50] sm:$0x1] %v403_v44  ;;  %v6124_v19 = vld [vmem:[#allocation8 + $0x1c8] sm:$0xff]  }
  0x90   :  { %482 = vst [vmem:[#allocation2 + $0x78] sm:$0x10] %v481_v32  ;;  %v466_v45 = vsel %vm6596_vm5, 0, %v465_v43  ;;  %v723_v47 = vld [vmem:[#allocation2] sm:$0x1f] }
  0x91   :  { %467 = vst [vmem:[#allocation2 + $0x50] sm:$0x10] %v466_v45  ;;  %v4719_v49 = vcombine.low %v723_v47, %v723_v47  ;;  %v4720_v55 = vcombine.high %v723_v47, %v723_v47  ;;  %v1432_v61 = vld [vmem:[#allocation2] sm:$0x1e]  ;;  %v6679_v62 = vld [vmem:[%s7178_s2] ss:$0 sm:$0xff] }
  0x92   :  { %5406 = vmatpush3.bf16.msra.mxu0 %v5925_v39  ;;  %v483_v39 = vld [vmem:[#allocation2 + $0x80] sm:$0x10]  ;;  %v4783_v4 = vcombine.low %v1432_v61, %v1432_v61  ;;  %v4784_v5 = vcombine.high %v1432_v61, %v1432_v61  ;;  %v649_v47 = vld [vmem:[#allocation2 + $0x18] sm:$0x1f] }
  0x93   :  { %5407 = vmatprep.subr.bf16.mxu0 %v5927_v54  ;;  %v484_v40 = vsel %vm6596_vm5, 0, %v483_v39  ;;  %v823_v51 = vshrl.u32 %v4719_v49, 16  ;;  %v826_v52 = vshll.u32 %v4719_v49, 16  ;;  %v832_v0 = vshll.u32 %v4720_v55, 16 }
  0x94   :  { %485 = vst [vmem:[#allocation2 + $0x80] sm:$0x10] %v484_v40  ;;  %v6694_v24 = vrot.slane %v4783_v4, 9  ;;  %v6696_v25 = vrot.slane %v4784_v5, 5 }
  0x95   :  { %5392 = vmatmul.mubr.bf16.gmra.mrb[4].mxu0 %v122_v13  ;;  %v408_v13 = vld [vmem:[#allocation2 + $0x60] sm:$0x1]  ;;  %v825_v56 = vrot.slane %v823_v51, 4  ;;  %v828_v57 = vrot.slane %v826_v52, 5  ;;  %v834_v11 = vrot.slane %v832_v0, 5 }
  0x96   :  { %5395 = vmatprep.mubr.bf16.mxu0 %v124_v14  ;;  %5408 = vmatpush3.bf16.msra.mxu0 %v5927_v54  ;;  %v5931_v14 = vld [vmem:[#allocation8 + $0x60] sm:$0xff]   ;;  %v1534_v34 = vsel %vm6690_vm11, %v6694_v24, %v6696_v25 }
  0x97   :  { %5409 = vmatprep.subr.bf16.mxu0 %v5929_v60  ;;  %v829_v63 = vor.u32 %v828_v57, %v825_v56 }
  0x98   :  { %v731_v48 = vld [vmem:[#allocation2 + $0x50] sm:$0x1f] }
  0x99   :  { %v4735_v50 = vcombine.low %v731_v48, %v731_v48  ;;  %v4736_v58 = vcombine.high %v731_v48, %v731_v48  ;;  %v830_v10 = vrot.slane %v829_v63, 4 }
  0x9a   :  { %5410 = vmatpush3.bf16.msra.mxu0 %v5929_v60 }
  0x9b   :  { %5411 = vmatprep.subr.bf16.mxu0 %v5931_v14  ;;  %v935_v53 = vshrl.u32 %v4735_v50, 16  ;;  %v938_v54 = vshll.u32 %v4735_v50, 16  ;;  %v944_v2 = vshll.u32 %v4736_v58, 16  ;;  %v6700_v30 = vsel %vm6685_vm10, %v830_v10, %v834_v11 }
  0x9d   :  { %5396 = vmatmul.mubr.bf16.gmra.mrb[8].mxu0 %v126_v15  ;;  %v478_v15 = vsel %vm6596_vm5, 0, %v477_v12  ;;  %v937_v59 = vrot.slane %v935_v53, 4  ;;  %v940_v60 = vrot.slane %v938_v54, 5  ;;  %v643_v54 = vld [vmem:[#allocation2 + $0x8] sm:$0x1f] }
  0x9e   :  { %5399 = vmatprep.mubr.bf16.mxu0 %v128_v16  ;;  %v409_v16 = vsel %vm6590_vm4, 0, %v408_v13  ;;  %479 = vst [vmem:[#allocation2 + $0x70] sm:$0x10] %v478_v15  ;;  %5412 = vmatpush3.bf16.msra.mxu0 %v5931_v14 }
  0x9f   :  { %410 = vst [vmem:[#allocation2 + $0x60] sm:$0x1] %v409_v16  ;;  %5413 = vmatprep.subr.bf16.mxu0 %v5933_v20  ;;  %v941_v1 = vor.u32 %v940_v60, %v937_v59  ;;  %v652_v60 = vld [vmem:[#allocation2 + $0x20] sm:$0x1f] }
  0xa1   :  { %v942_v16 = vrot.slane %v941_v1, 4 }
  0xa2   :  { %5414 = vmatpush3.bf16.msra.mxu0 %v5933_v20 }
  0xa3   :  { %5415 = vmatprep.subr.bf16.mxu0 %v5937_v31 }
  0xa5   :  { %5400 = vmatmul.mubr.bf16.gmra.mrb[12].mxu0 %v130_v17  ;;  %v471_v17 = vld [vmem:[#allocation2 + $0x60] sm:$0x10] }
  0xa6   :  { %v472_v21 = vsel %vm6596_vm5, 0, %v471_v17  ;;  %5416 = vmatpush3.bf16.msra.mxu0 %v5937_v31  ;;  %v946_v17 = vrot.slane %v944_v2, 5 }
  0xa7   :  { %473 = vst [vmem:[#allocation2 + $0x60] sm:$0x10] %v472_v21  ;;  %5417 = vmatprep.subr.bf16.mxu0 %v5939_v41  ;;  %v6214_v21 = vld [vmem:[#allocation9 + $0x30] sm:$0xff]  }
  0xa8   :  { %v6704_v33 = vsel %vm6685_vm10, %v942_v16, %v946_v17 }
  0xaa   :  { %5418 = vmatpush3.bf16.msra.mxu0 %v5939_v41 }
  0xab   :  { %5435 = vmatprep.subr.bf16.mxu0 %v6673_v46 }
 0x160   :  { %v5389_v3 = vpop.f32.mrb[0].mxu0 }
 0x161   :  { %v294_v6 = vadd.f32 %v5389_v3, %v6679_v62  ;;  %v285_v7 = vpop.f32.mrb[1].mxu0  ;;  %v646_v3 = vld [vmem:[#allocation2 + $0x10] sm:$0x1f] }
 0x162   :  { %v286_v8 = vadd.f32 %v6679_v62, %v285_v7  ;;  %v5390_v9 = vpop.f32.mrb[2].mxu0 }
 0x163   :  { %v350_v12 = vmax.f32 %v294_v6, 0.0  ;;  %v297_v13 = vadd.f32 %v5390_v9, %v6679_v62  ;;  %v288_v14 = vpop.f32.mrb[3].mxu0 }
 0x164   :  { %v348_v18 = vmax.f32 %v286_v8, 0.0  ;;  %v289_v20 = vadd.f32 %v6679_v62, %v288_v14 }
 0x165   :  { %v497_v26 = vpack.c.bf16 %v350_v12, %v350_v12  ;;  %v351_v27 = vmax.f32 %v297_v13, 0.0 }
 0x166   :  { %v495_v28 = vpack.c.bf16 %v348_v18, %v348_v18  ;;  %v349_v29 = vmax.f32 %v289_v20, 0.0 }
 0x167   :  { %v526_v31 = vshrl.u32 %v497_v26, 16  ;;  %v498_v32 = vpack.c.bf16 %v351_v27, %v351_v27  ;;  %v529_v35 = vshll.u32 %v497_v26, 16 }
 0x168   :  { %v512_v36 = vshrl.u32 %v495_v28, 16  ;;  %v515_v37 = vshll.u32 %v495_v28, 16  ;;  %v496_v38 = vpack.c.bf16 %v349_v29, %v349_v29  ;;  %v5393_v39 = vpop.f32.mrb[4].mxu0 }
 0x169   :  { %v528_v40 = vrot.slane %v526_v31, 7  ;;  %v533_v41 = vshrl.u32 %v498_v32, 16  ;;  %v536_v42 = vshll.u32 %v498_v32, 16  ;;  %v310_v43 = vadd.f32 %v5393_v39, %v6679_v62  ;;  %v301_v44 = vpop.f32.mrb[5].mxu0  ;;  %v661_v32 = vld [vmem:[#allocation2 + $0x38] sm:$0x1f] }
 0x16a   :  { %v514_v48 = vrot.slane %v512_v36, 7  ;;  %v519_v49 = vshrl.u32 %v496_v38, 16  ;;  %v522_v50 = vshll.u32 %v496_v38, 16  ;;  %v302_v51 = vadd.f32 %v6679_v62, %v301_v44  ;;  %v5394_v52 = vpop.f32.mrb[6].mxu0 }
 0x16b   :  { %v531_v53 = vor.u32 %v529_v35, %v528_v40  ;;  %v535_v55 = vrot.slane %v533_v41, 7  ;;  %v354_v56 = vmax.f32 %v310_v43, 0.0  ;;  %v313_v57 = vadd.f32 %v5394_v52, %v6679_v62  ;;  %v304_v58 = vpop.f32.mrb[7].mxu0  ;;  %v655_v41 = vld [vmem:[#allocation2 + $0x28] sm:$0x1f] }
 0x16c   :  { %v517_v59 = vor.u32 %v515_v37, %v514_v48  ;;  %v521_v61 = vrot.slane %v519_v49, 7  ;;  %v352_v63 = vmax.f32 %v302_v51, 0.0  ;;  %v305_v0 = vadd.f32 %v6679_v62, %v304_v58  ;;  %v664_v49 = vld [vmem:[#allocation2 + $0x40] sm:$0x1f] }
 0x16d   :  { %v650_v1 = vsel %vm6713_vm14, %v531_v53, %v649_v47  ;;  %v538_v2 = vor.u32 %v536_v42, %v535_v55  ;;  %v501_v4 = vpack.c.bf16 %v354_v56, %v354_v56  ;;  %v355_v5 = vmax.f32 %v313_v57, 0.0  ;;  %v658_v55 = vld [vmem:[#allocation2 + $0x30] sm:$0x1f] }
 0x16e   :  { %651 = vst [vmem:[#allocation2 + $0x18] sm:$0x1f] %v650_v1  ;;  %v644_v6 = vsel %vm6713_vm14, %v517_v59, %v643_v54  ;;  %v524_v7 = vor.u32 %v522_v50, %v521_v61  ;;  %v499_v8 = vpack.c.bf16 %v352_v63, %v352_v63  ;;  %v353_v9 = vmax.f32 %v305_v0, 0.0 }
 0x16f   :  { %645 = vst [vmem:[#allocation2 + $0x8] sm:$0x1f] %v644_v6  ;;  %v653_v10 = vsel %vm6713_vm14, %v538_v2, %v652_v60  ;;  %v554_v11 = vshrl.u32 %v501_v4, 16  ;;  %v557_v12 = vshll.u32 %v501_v4, 16  ;;  %v502_v13 = vpack.c.bf16 %v355_v5, %v355_v5  ;;  %v673_v4 = vld [vmem:[#allocation2 + $0x68] sm:$0x1f] }
 0x170   :  { %654 = vst [vmem:[#allocation2 + $0x20] sm:$0x1f] %v653_v10  ;;  %v647_v14 = vsel %vm6713_vm14, %v524_v7, %v646_v3  ;;  %v540_v16 = vshrl.u32 %v499_v8, 16  ;;  %v543_v17 = vshll.u32 %v499_v8, 16  ;;  %v500_v18 = vpack.c.bf16 %v353_v9, %v353_v9  ;;  %v5397_v20 = vpop.f32.mrb[8].mxu0  ;;  %v5938_v9 = vld [vmem:[#allocation8 + $0x108] sm:$0xff]  }
 0x171   :  { %648 = vst [vmem:[#allocation2 + $0x10] sm:$0x1f] %v647_v14  ;;  %v556_v26 = vrot.slane %v554_v11, 7  ;;  %v561_v27 = vshrl.u32 %v502_v13, 16  ;;  %v564_v28 = vshll.u32 %v502_v13, 16  ;;  %v326_v29 = vadd.f32 %v5397_v20, %v6679_v62  ;;  %v317_v31 = vpop.f32.mrb[9].mxu0 }
 0x172   :  { %v542_v35 = vrot.slane %v540_v16, 7  ;;  %v547_v36 = vshrl.u32 %v500_v18, 16  ;;  %v550_v37 = vshll.u32 %v500_v18, 16  ;;  %v318_v38 = vadd.f32 %v6679_v62, %v317_v31  ;;  %v5398_v39 = vpop.f32.mrb[10].mxu0  ;;  %v667_v31 = vld [vmem:[#allocation2 + $0x58] sm:$0x1f] }
 0x173   :  { %v559_v40 = vor.u32 %v557_v12, %v556_v26  ;;  %v563_v42 = vrot.slane %v561_v27, 7  ;;  %v358_v43 = vmax.f32 %v326_v29, 0.0  ;;  %v329_v44 = vadd.f32 %v5398_v39, %v6679_v62  ;;  %v320_v47 = vpop.f32.mrb[11].mxu0  ;;  %v676_v39 = vld [vmem:[#allocation2 + $0x70] sm:$0x1f] }
 0x174   :  { %v545_v48 = vor.u32 %v543_v17, %v542_v35  ;;  %v549_v50 = vrot.slane %v547_v36, 7  ;;  %v356_v51 = vmax.f32 %v318_v38, 0.0  ;;  %v321_v52 = vadd.f32 %v6679_v62, %v320_v47  ;;  %v670_v47 = vld [vmem:[#allocation2 + $0x60] sm:$0x1f] }
 0x175   :  { %v662_v53 = vsel %vm6713_vm14, %v559_v40, %v661_v32  ;;  %v566_v54 = vor.u32 %v564_v28, %v563_v42  ;;  %v505_v56 = vpack.c.bf16 %v358_v43, %v358_v43  ;;  %v359_v57 = vmax.f32 %v329_v44, 0.0 }
 0x176   :  { %663 = vst [vmem:[#allocation2 + $0x38] sm:$0x1f] %v662_v53  ;;  %v656_v58 = vsel %vm6713_vm14, %v545_v48, %v655_v41  ;;  %v552_v59 = vor.u32 %v550_v37, %v549_v50  ;;  %v503_v60 = vpack.c.bf16 %v356_v51, %v356_v51  ;;  %v357_v61 = vmax.f32 %v321_v52, 0.0 }
 0x177   :  { %657 = vst [vmem:[#allocation2 + $0x28] sm:$0x1f] %v656_v58  ;;  %v665_v63 = vsel %vm6713_vm14, %v566_v54, %v664_v49  ;;  %v582_v0 = vshrl.u32 %v505_v56, 16  ;;  %v585_v1 = vshll.u32 %v505_v56, 16  ;;  %v506_v2 = vpack.c.bf16 %v359_v57, %v359_v57  ;;  %v5936_v28 = vld [vmem:[#allocation2 + $0x18] ss:$8 sps:$4 sm:$0xff]  }
 0x178   :  { %666 = vst [vmem:[#allocation2 + $0x40] sm:$0x1f] %v665_v63  ;;  %v659_v3 = vsel %vm6713_vm14, %v552_v59, %v658_v55  ;;  %v568_v5 = vshrl.u32 %v503_v60, 16  ;;  %v571_v6 = vshll.u32 %v503_v60, 16  ;;  %v504_v7 = vpack.c.bf16 %v357_v61, %v357_v61  ;;  %v5401_v8 = vpop.f32.mrb[12].mxu0  ;;  %v5941_v54 = vld [vmem:[#allocation8 + $0x110] sm:$0xff]  }
 0x179   :  { %660 = vst [vmem:[#allocation2 + $0x30] sm:$0x1f] %v659_v3  ;;  %v584_v10 = vrot.slane %v582_v0, 7  ;;  %v589_v11 = vshrl.u32 %v506_v2, 16  ;;  %v592_v12 = vshll.u32 %v506_v2, 16  ;;  %v342_v13 = vadd.f32 %v5401_v8, %v6679_v62  ;;  %v333_v14 = vpop.f32.mrb[13].mxu0 }
 0x17a   :  { %v5934_v16 = vld [vmem:[#allocation2 + $0x8] ss:$8 sps:$4 sm:$0xff]   ;;  %v570_v17 = vrot.slane %v568_v5, 7  ;;  %v575_v18 = vshrl.u32 %v504_v7, 16  ;;  %v578_v20 = vshll.u32 %v504_v7, 16  ;;  %v334_v26 = vadd.f32 %v6679_v62, %v333_v14  ;;  %v5402_v27 = vpop.f32.mrb[14].mxu0 }
 0x17b   :  { %v587_v29 = vor.u32 %v585_v1, %v584_v10  ;;  %v591_v32 = vrot.slane %v589_v11, 7  ;;  %v362_v35 = vmax.f32 %v342_v13, 0.0  ;;  %v345_v36 = vadd.f32 %v5402_v27, %v6679_v62  ;;  %v336_v37 = vpop.f32.mrb[15].mxu0  ;;  %5515 = vmatprep.mubr.bf16.mxu1 %v5934_v16  ;;  %v685_v59 = vld [vmem:[#allocation2 + $0x88] sm:$0x1f] }
 0x17c   :  { %v573_v38 = vor.u32 %v571_v6, %v570_v17  ;;  %v577_v40 = vrot.slane %v575_v18, 7  ;;  %v360_v41 = vmax.f32 %v334_v26, 0.0  ;;  %v337_v42 = vadd.f32 %v6679_v62, %v336_v37  ;;  %5516 = vmatmul.mubr.bf16.vlgmr.msra.gmra.mrb[0].mxu1 %v5936_v28  ;;  %v724_v62 = vld [vmem:[#allocation2 + $0x8] sm:$0x1f]  ;;  %v725_v5 = vld [vmem:[#allocation2 + $0x10] sm:$0x1f] }
 0x17d   :  { %v674_v43 = vsel %vm6713_vm14, %v587_v29, %v673_v4  ;;  %v594_v44 = vor.u32 %v592_v12, %v591_v32  ;;  %v509_v48 = vpack.c.bf16 %v362_v35, %v362_v35  ;;  %v363_v49 = vmax.f32 %v345_v36, 0.0  ;;  %5532 = vmatpush3.bf16.msra.mxu1 %v6650_v22  ;;  %v5952_v12 = vld [vmem:[#allocation8 + $0x118] sm:$0xff]   ;;  %v688_v26 = vld [vmem:[#allocation2 + $0x90] sm:$0x1f]  ;;  %v682_v35 = vld [vmem:[#allocation2 + $0x80] sm:$0x1f] }
 0x17e   :  { %675 = vst [vmem:[#allocation2 + $0x68] sm:$0x1f] %v674_v43  ;;  %v668_v50 = vsel %vm6713_vm14, %v573_v38, %v667_v31  ;;  %v580_v51 = vor.u32 %v578_v20, %v577_v40  ;;  %v507_v52 = vpack.c.bf16 %v360_v41, %v360_v41  ;;  %v361_v53 = vmax.f32 %v337_v42, 0.0  ;;  %5533 = vmatprep.subr.bf16.mxu1 %v5938_v9  ;;  %v679_v14 = vld [vmem:[#allocation2 + $0x78] sm:$0x1f]  ;;  %v5955_v42 = vld [vmem:[#allocation8 + $0x120] sm:$0xff]  }
 0x17f   :  { %669 = vst [vmem:[#allocation2 + $0x58] sm:$0x1f] %v668_v50  ;;  %v677_v55 = vsel %vm6713_vm14, %v594_v44, %v676_v39  ;;  %v610_v56 = vshrl.u32 %v509_v48, 16  ;;  %v613_v57 = vshll.u32 %v509_v48, 16  ;;  %v510_v58 = vpack.c.bf16 %v363_v49, %v363_v49  ;;  %v5946_v11 = vld [vmem:[#allocation2 + $0x38] ss:$8 sps:$4 sm:$0xff]  }
 0x180   :  { %678 = vst [vmem:[#allocation2 + $0x70] sm:$0x1f] %v677_v55  ;;  %v671_v22 = vsel %vm6713_vm14, %v580_v51, %v670_v47  ;;  %v596_v60 = vshrl.u32 %v507_v52, 16  ;;  %v599_v61 = vshll.u32 %v507_v52, 16  ;;  %v508_v63 = vpack.c.bf16 %v361_v53, %v361_v53  ;;  %v5940_v0 = vld [vmem:[#allocation2 + $0x28] ss:$8 sps:$4 sm:$0xff]  }
 0x181   :  { %672 = vst [vmem:[#allocation2 + $0x60] sm:$0x1f] %v671_v22  ;;  %v612_v1 = vrot.slane %v610_v56, 7  ;;  %v617_v2 = vshrl.u32 %v510_v58, 16  ;;  %v620_v3 = vshll.u32 %v510_v58, 16  ;;  %5534 = vmatpush3.bf16.msra.mxu1 %v5938_v9  ;;  %v4721_v4 = vcombine.low %v724_v62, %v724_v62  ;;  %5519 = vmatprep.mubr.bf16.mxu1 %v5940_v0  ;;  %v5966_v0 = vld [vmem:[#allocation8 + $0x128] sm:$0xff]  }
 0x182   :  { %v598_v6 = vrot.slane %v596_v60, 7  ;;  %v603_v7 = vshrl.u32 %v508_v63, 16  ;;  %v606_v8 = vshll.u32 %v508_v63, 16  ;;  %5535 = vmatprep.subr.bf16.mxu1 %v5941_v54  ;;  %v4722_v10 = vcombine.high %v724_v62, %v724_v62  ;;  %v726_v9 = vld [vmem:[#allocation2 + $0x18] sm:$0x1f] }
 0x183   :  { %v615_v13 = vor.u32 %v613_v57, %v612_v1  ;;  %v619_v16 = vrot.slane %v617_v2, 7  ;;  %v837_v17 = vshrl.u32 %v4721_v4, 16  ;;  %v840_v18 = vshll.u32 %v4721_v4, 16  ;;  %v727_v49 = vld [vmem:[#allocation2 + $0x20] sm:$0x1f] }
 0x184   :  { %v601_v20 = vor.u32 %v599_v61, %v598_v6  ;;  %v605_v27 = vrot.slane %v603_v7, 7  ;;  %v846_v28 = vshll.u32 %v4722_v10, 16  ;;  %5520 = vmatmul.mubr.bf16.gmra.mrb[4].mxu1 %v5946_v11  ;;  %v4723_v29 = vcombine.low %v725_v5, %v725_v5  ;;  %v728_v50 = vld [vmem:[#allocation2 + $0x28] sm:$0x1f] }
 0x185   :  { %v686_v31 = vsel %vm6713_vm14, %v615_v13, %v685_v59  ;;  %v622_v32 = vor.u32 %v620_v3, %v619_v16  ;;  %v839_v36 = vrot.slane %v837_v17, 4  ;;  %v842_v37 = vrot.slane %v840_v18, 5  ;;  %5536 = vmatpush3.bf16.msra.mxu1 %v5941_v54  ;;  %v730_v16 = vld [vmem:[#allocation2 + $0x38] sm:$0x1f] }
 0x186   :  { %687 = vst [vmem:[#allocation2 + $0x88] sm:$0x1f] %v686_v31  ;;  %v680_v38 = vsel %vm6713_vm14, %v601_v20, %v679_v14  ;;  %v608_v39 = vor.u32 %v606_v8, %v605_v27  ;;  %v848_v40 = vrot.slane %v846_v28, 5  ;;  %v4724_v41 = vcombine.high %v725_v5, %v725_v5  ;;  %5537 = vmatprep.subr.bf16.mxu1 %v5952_v12  ;;  %v5969_v8 = vld [vmem:[#allocation8 + $0x130] sm:$0xff]  }
 0x187   :  { %681 = vst [vmem:[#allocation2 + $0x78] sm:$0x1f] %v680_v38  ;;  %v689_v43 = vsel %vm6713_vm14, %v622_v32, %v688_v26  ;;  %v843_v44 = vor.u32 %v842_v37, %v839_v36  ;;  %v4725_v47 = vcombine.low %v726_v9, %v726_v9  ;;  %v4726_v48 = vcombine.high %v726_v9, %v726_v9  ;;  %v5960_v63 = vld [vmem:[#allocation2 + $0x68] ss:$8 sps:$4 sm:$0xff]  }
 0x188   :  { %690 = vst [vmem:[#allocation2 + $0x90] sm:$0x1f] %v689_v43  ;;  %v683_v51 = vsel %vm6713_vm14, %v608_v39, %v682_v35  ;;  %v851_v52 = vshrl.u32 %v4723_v29, 16  ;;  %v854_v53 = vshll.u32 %v4723_v29, 16  ;;  %v860_v54 = vshll.u32 %v4724_v41, 16 }
 0x189   :  { %684 = vst [vmem:[#allocation2 + $0x80] sm:$0x1f] %v683_v51  ;;  %v844_v62 = vrot.slane %v843_v44, 4  ;;  %v865_v55 = vshrl.u32 %v4725_v47, 16  ;;  %v868_v56 = vshll.u32 %v4725_v47, 16  ;;  %v874_v57 = vshll.u32 %v4726_v48, 16  ;;  %5538 = vmatpush3.bf16.msra.mxu1 %v5952_v12 }
 0x18a   :  { %v5954_v58 = vld [vmem:[#allocation2 + $0x58] ss:$8 sps:$4 sm:$0xff]   ;;  %v853_v22 = vrot.slane %v851_v52, 4  ;;  %v856_v59 = vrot.slane %v854_v53, 5  ;;  %v862_v60 = vrot.slane %v860_v54, 5  ;;  %5539 = vmatprep.subr.bf16.mxu1 %v5955_v42  ;;  %v4727_v61 = vcombine.low %v727_v49, %v727_v49 }
 0x18b   :  { %v849_v45 = vsel %vm6685_vm10, %v844_v62, %v848_v40  ;;  %v867_v1 = vrot.slane %v865_v55, 4  ;;  %v870_v2 = vrot.slane %v868_v56, 5  ;;  %v876_v3 = vrot.slane %v874_v57, 5  ;;  %5523 = vmatprep.mubr.bf16.mxu1 %v5954_v58  ;;  %v729_v14 = vld [vmem:[#allocation2 + $0x30] sm:$0x1f] }
 0x18c   :  { %v4751_v4 = vcombine.low %v6700_v30, %v849_v45  ;;  %v857_v5 = vor.u32 %v856_v59, %v853_v22  ;;  %v4728_v6 = vcombine.high %v727_v49, %v727_v49  ;;  %v4729_v7 = vcombine.low %v728_v50, %v728_v50  ;;  %5524 = vmatmul.mubr.bf16.gmra.mrb[8].mxu1 %v5960_v63  ;;  %v5984_v49 = vld [vmem:[#allocation8 + $0x138] sm:$0xff]   ;;  %v2045_v62 = vld [vmem:[#allocation2 + $0x8] sm:$0x1f]  ;;  %v3722_v15 = vld [vmem:[#allocation2 + $0x60] sm:$0x1e] }
 0x18d   :  { %v871_v10 = vor.u32 %v870_v2, %v867_v1  ;;  %v4730_v11 = vcombine.high %v728_v50, %v728_v50  ;;  %v879_v12 = vshrl.u32 %v4727_v61, 16  ;;  %v882_v13 = vshll.u32 %v4727_v61, 16  ;;  %5540 = vmatpush3.bf16.msra.mxu1 %v5955_v42  ;;  %v5953_v42 = vld [vmem:[#allocation8 + $0x8] sm:$0xff]   ;;  %v732_v54 = vld [vmem:[#allocation2 + $0x58] sm:$0x1f]  ;;  %v5965_v2 = vld [vmem:[#allocation8 + $0x10] sm:$0xff]  }
 0x18e   :  { %5419 = vmatprep.mubr.bf16.mxu0 %v4751_v4  ;;  %v858_v17 = vrot.slane %v857_v5, 4  ;;  %v888_v18 = vshll.u32 %v4728_v6, 16  ;;  %v893_v20 = vshrl.u32 %v4729_v7, 16  ;;  %v896_v26 = vshll.u32 %v4729_v7, 16  ;;  %5541 = vmatprep.subr.bf16.mxu1 %v5966_v0  ;;  %v6773_v7 = vld [vmem:[#allocation8 + $0x140] sm:$0xff]  }
 0x18f   :  { %v872_v27 = vrot.slane %v871_v10, 4  ;;  %v881_v30 = vrot.slane %v879_v12, 4  ;;  %v884_v28 = vrot.slane %v882_v13, 5  ;;  %v902_v9 = vshll.u32 %v4730_v11, 16  ;;  %v5974_v48 = vld [vmem:[#allocation2 + $0x88] ss:$8 sps:$4 sm:$0xff]  }
 0x190   :  { %v863_v29 = vsel %vm6685_vm10, %v858_v17, %v862_v60  ;;  %v890_v31 = vrot.slane %v888_v18, 5  ;;  %v895_v32 = vrot.slane %v893_v20, 4  ;;  %v898_v35 = vrot.slane %v896_v26, 5  ;;  %v5968_v40 = vld [vmem:[#allocation2 + $0x78] ss:$8 sps:$4 sm:$0xff]  }
 0x191   :  { %v877_v36 = vsel %vm6685_vm10, %v872_v27, %v876_v3  ;;  %v885_v37 = vor.u32 %v884_v28, %v881_v30  ;;  %v904_v38 = vrot.slane %v902_v9, 5  ;;  %v4731_v39 = vcombine.low %v729_v14, %v729_v14  ;;  %5542 = vmatpush3.bf16.msra.mxu1 %v5966_v0  ;;  %5527 = vmatprep.mubr.bf16.mxu1 %v5968_v40  ;;  %v2046_v3 = vld [vmem:[#allocation2 + $0x10] sm:$0x1f]  ;;  %v5967_v20 = vld [vmem:[#allocation8 + $0x18] sm:$0xff]   ;;  %v733_v28 = vld [vmem:[#allocation2 + $0x60] sm:$0x1f] }
 0x192   :  { %v4752_v41 = vcombine.low %v863_v29, %v877_v36  ;;  %v899_v43 = vor.u32 %v898_v35, %v895_v32  ;;  %v4732_v44 = vcombine.high %v729_v14, %v729_v14  ;;  %v4733_v47 = vcombine.low %v730_v16, %v730_v16  ;;  %5543 = vmatprep.subr.bf16.mxu1 %v5969_v8 }
 0x193   :  { %v886_v50 = vrot.slane %v885_v37, 4  ;;  %v4734_v51 = vcombine.high %v730_v16, %v730_v16  ;;  %v907_v52 = vshrl.u32 %v4731_v39, 16  ;;  %v910_v53 = vshll.u32 %v4731_v39, 16 }
 0x194   :  { %5420 = vmatmul.mubr.bf16.vlgmr.msra.gmra.mrb[16].mxu0 %v4752_v41  ;;  %v900_v55 = vrot.slane %v899_v43, 4  ;;  %v916_v56 = vshll.u32 %v4732_v44, 16  ;;  %v921_v57 = vshrl.u32 %v4733_v47, 16  ;;  %v924_v58 = vshll.u32 %v4733_v47, 16  ;;  %5528 = vmatmul.mubr.bf16.gmra.mrb[12].mxu1 %v5974_v48  ;;  %v734_v43 = vld [vmem:[#allocation2 + $0x68] sm:$0x1f] }
 0x195   :  { %5436 = vmatpush3.bf16.msra.mxu0 %v6673_v46  ;;  %v891_v22 = vsel %vm6685_vm10, %v886_v50, %v890_v31  ;;  %v909_v59 = vrot.slane %v907_v52, 4  ;;  %v912_v60 = vrot.slane %v910_v53, 5  ;;  %v930_v61 = vshll.u32 %v4734_v51, 16  ;;  %5544 = vmatpush3.bf16.msra.mxu1 %v5969_v8  ;;  %v5983_v50 = vld [vmem:[#allocation8 + $0x20] sm:$0xff]  }
 0x196   :  { %5437 = vmatprep.subr.bf16.mxu0 %v5953_v42  ;;  %v905_v63 = vsel %vm6685_vm10, %v900_v55, %v904_v38  ;;  %v918_v0 = vrot.slane %v916_v56, 5  ;;  %v923_v45 = vrot.slane %v921_v57, 4  ;;  %v926_v1 = vrot.slane %v924_v58, 5  ;;  %5545 = vmatprep.subr.bf16.mxu1 %v5984_v49  ;;  %v735_v58 = vld [vmem:[#allocation2 + $0x70] sm:$0x1f] }
 0x197   :  { %v4753_v4 = vcombine.low %v891_v22, %v905_v63  ;;  %v913_v5 = vor.u32 %v912_v60, %v909_v59  ;;  %v932_v46 = vrot.slane %v930_v61, 5  ;;  %v4737_v6 = vcombine.low %v732_v54, %v732_v54  ;;  %v5985_v63 = vld [vmem:[#allocation8 + $0x28] sm:$0xff]  }
 0x198   :  { %v927_v10 = vor.u32 %v926_v1, %v923_v45  ;;  %v4738_v11 = vcombine.high %v732_v54, %v732_v54  ;;  %v4863_v12 = vcombine.low %v2045_v62, %v2045_v62  ;;  %v4864_v8 = vcombine.high %v2045_v62, %v2045_v62 }
 0x199   :  { %5438 = vmatpush3.bf16.msra.mxu0 %v5953_v42  ;;  %5423 = vmatprep.mubr.bf16.mxu0 %v4753_v4  ;;  %v914_v13 = vrot.slane %v913_v5, 4  ;;  %v949_v14 = vshrl.u32 %v4737_v6, 16  ;;  %v952_v16 = vshll.u32 %v4737_v6, 16  ;;  %v4865_v17 = vcombine.low %v2046_v3, %v2046_v3 }
 0x19a   :  { %v928_v18 = vrot.slane %v927_v10, 4  ;;  %5439 = vmatprep.subr.bf16.mxu0 %v5965_v2  ;;  %v958_v26 = vshll.u32 %v4738_v11, 16  ;;  %v4866_v27 = vcombine.high %v2046_v3, %v2046_v3  ;;  %v2142_v30 = vshrl.u32 %v4863_v12, 16  ;;  %5546 = vmatpush3.bf16.msra.mxu1 %v5984_v49  ;;  %v736_v3 = vld [vmem:[#allocation2 + $0x78] sm:$0x1f] }
 0x19b   :  { %v919_v9 = vsel %vm6685_vm10, %v914_v13, %v918_v0  ;;  %v951_v29 = vrot.slane %v949_v14, 4  ;;  %v954_v31 = vrot.slane %v952_v16, 5  ;;  %v2145_v32 = vshll.u32 %v4863_v12, 16  ;;  %5563 = vmatprep.subr.bf16.mxu1 %v6773_v7 }
 0x19c   :  { %v933_v35 = vsel %vm6685_vm10, %v928_v18, %v932_v46  ;;  %v960_v36 = vrot.slane %v958_v26, 5  ;;  %v2144_v37 = vrot.slane %v2142_v30, 4  ;;  %v2151_v38 = vshll.u32 %v4864_v8, 16 }
 0x19d   :  { %v4754_v39 = vcombine.low %v919_v9, %v933_v35  ;;  %5440 = vmatpush3.bf16.msra.mxu0 %v5965_v2  ;;  %v955_v40 = vor.u32 %v954_v31, %v951_v29  ;;  %v2147_v41 = vrot.slane %v2145_v32, 5  ;;  %v2156_v42 = vshrl.u32 %v4865_v17, 16  ;;  %v2047_v31 = vld [vmem:[#allocation2 + $0x18] sm:$0x1f] }
 0x19e   :  { %5441 = vmatprep.subr.bf16.mxu0 %v5967_v20  ;;  %v2153_v44 = vrot.slane %v2151_v38, 5  ;;  %v2159_v47 = vshll.u32 %v4865_v17, 16  ;;  %v2165_v48 = vshll.u32 %v4866_v27, 16  ;;  %v4739_v49 = vcombine.low %v733_v28, %v733_v28  ;;  %v6003_v27 = vld [vmem:[#allocation8 + $0x30] sm:$0xff]  }
 0x19f   :  { %5424 = vmatmul.mubr.bf16.gmra.mrb[20].mxu0 %v4754_v39  ;;  %v956_v51 = vrot.slane %v955_v40, 4  ;;  %v2148_v52 = vor.u32 %v2147_v41, %v2144_v37  ;;  %v2158_v53 = vrot.slane %v2156_v42, 4  ;;  %v4740_v54 = vcombine.high %v733_v28, %v733_v28  ;;  %v2048_v42 = vld [vmem:[#allocation2 + $0x20] sm:$0x1f] }
 0x1a0   :  { %v2161_v62 = vrot.slane %v2159_v47, 5  ;;  %v2167_v55 = vrot.slane %v2165_v48, 5  ;;  %v4741_v56 = vcombine.low %v734_v43, %v734_v43  ;;  %v4742_v57 = vcombine.high %v734_v43, %v734_v43 }
 0x1a1   :  { %5442 = vmatpush3.bf16.msra.mxu0 %v5967_v20  ;;  %v961_v22 = vsel %vm6685_vm10, %v956_v51, %v960_v36  ;;  %v2149_v59 = vrot.slane %v2148_v52, 4  ;;  %v963_v60 = vshrl.u32 %v4739_v49, 16  ;;  %v966_v61 = vshll.u32 %v4739_v49, 16  ;;  %v6006_v49 = vld [vmem:[#allocation8 + $0x38] sm:$0xff]  }
 0x1a2   :  { %v4755_v0 = vcombine.low %v6704_v33, %v961_v22  ;;  %v2162_v45 = vor.u32 %v2161_v62, %v2158_v53  ;;  %v972_v1 = vshll.u32 %v4740_v54, 16  ;;  %v977_v2 = vshrl.u32 %v4741_v56, 16  ;;  %5443 = vmatprep.subr.bf16.mxu0 %v5983_v50 }
 0x1a3   :  { %v2154_v4 = vsel %vm6685_vm10, %v2149_v59, %v2153_v44  ;;  %v965_v5 = vrot.slane %v963_v60, 4  ;;  %v968_v46 = vrot.slane %v966_v61, 5  ;;  %v980_v6 = vshll.u32 %v4741_v56, 16  ;;  %v6791_v60 = vld [vmem:[#allocation8 + $0x80] sm:$0xff]  }
 0x1a4   :  { %5427 = vmatprep.mubr.bf16.mxu0 %v4755_v0  ;;  %v2163_v10 = vrot.slane %v2162_v45, 4  ;;  %v974_v11 = vrot.slane %v972_v1, 5  ;;  %v979_v12 = vrot.slane %v977_v2, 4  ;;  %v986_v8 = vshll.u32 %v4742_v57, 16  ;;  %v2049_v1 = vld [vmem:[#allocation2 + $0x28] sm:$0x1f] }
 0x1a5   :  { %v969_v13 = vor.u32 %v968_v46, %v965_v5  ;;  %v982_v14 = vrot.slane %v980_v6, 5  ;;  %5444 = vmatpush3.bf16.msra.mxu0 %v5983_v50  ;;  %v4743_v33 = vcombine.low %v735_v58, %v735_v58  ;;  %v4744_v16 = vcombine.high %v735_v58, %v735_v58  ;;  %v2050_v46 = vld [vmem:[#allocation2 + $0x30] sm:$0x1f] }
 0x1a6   :  { %v2168_v17 = vsel %vm6685_vm10, %v2163_v10, %v2167_v55  ;;  %v988_v18 = vrot.slane %v986_v8, 5  ;;  %5445 = vmatprep.subr.bf16.mxu0 %v5985_v63  ;;  %v4745_v20 = vcombine.low %v736_v3, %v736_v3  ;;  %v4746_v26 = vcombine.high %v736_v3, %v736_v3  ;;  %v737_v8 = vld [vmem:[#allocation2 + $0x80] sm:$0x1f] }
 0x1a7   :  { %v4895_v30 = vcombine.low %v2154_v4, %v2168_v17  ;;  %v970_v28 = vrot.slane %v969_v13, 4  ;;  %v983_v9 = vor.u32 %v982_v14, %v979_v12  ;;  %v991_v29 = vshrl.u32 %v4743_v33, 16 }
 0x1a8   :  { %v994_v32 = vshll.u32 %v4743_v33, 16  ;;  %v1000_v35 = vshll.u32 %v4744_v16, 16  ;;  %v1005_v36 = vshrl.u32 %v4745_v20, 16  ;;  %v1008_v37 = vshll.u32 %v4745_v20, 16 }
 0x1a9   :  { %5547 = vmatprep.mubr.bf16.mxu1 %v4895_v30  ;;  %v975_v38 = vsel %vm6685_vm10, %v970_v28, %v974_v11  ;;  %v984_v39 = vrot.slane %v983_v9, 4  ;;  %5446 = vmatpush3.bf16.msra.mxu0 %v5985_v63  ;;  %v993_v40 = vrot.slane %v991_v29, 4  ;;  %v1014_v41 = vshll.u32 %v4746_v26, 16 }
 0x1aa   :  { %v996_v43 = vrot.slane %v994_v32, 5  ;;  %v1002_v44 = vrot.slane %v1000_v35, 5  ;;  %v1007_v47 = vrot.slane %v1005_v36, 4  ;;  %v1010_v48 = vrot.slane %v1008_v37, 5  ;;  %5447 = vmatprep.subr.bf16.mxu0 %v6003_v27  ;;  %v2051_v36 = vld [vmem:[#allocation2 + $0x38] sm:$0x1f] }
 0x1ab   :  { %v989_v50 = vsel %vm6685_vm10, %v984_v39, %v988_v18  ;;  %v1016_v51 = vrot.slane %v1014_v41, 5  ;;  %v4867_v52 = vcombine.low %v2047_v31, %v2047_v31  ;;  %v4868_v53 = vcombine.high %v2047_v31, %v2047_v31  ;;  %v738_v41 = vld [vmem:[#allocation2 + $0x88] sm:$0x1f] }
 0x1ac   :  { %v4756_v54 = vcombine.low %v975_v38, %v989_v50  ;;  %v997_v62 = vor.u32 %v996_v43, %v993_v40  ;;  %v1011_v55 = vor.u32 %v1010_v48, %v1007_v47  ;;  %v4869_v56 = vcombine.low %v2048_v42, %v2048_v42 }
 0x1ad   :  { %v4870_v57 = vcombine.high %v2048_v42, %v2048_v42  ;;  %v2170_v58 = vshrl.u32 %v4867_v52, 16  ;;  %v2173_v22 = vshll.u32 %v4867_v52, 16  ;;  %v2179_v59 = vshll.u32 %v4868_v53, 16  ;;  %5448 = vmatpush3.bf16.msra.mxu0 %v6003_v27  ;;  %v6005_v52 = vld [vmem:[#allocation8 + $0x148] sm:$0xff]  }
 0x1ae   :  { %5428 = vmatmul.mubr.bf16.gmra.mrb[24].mxu0 %v4756_v54  ;;  %v998_v61 = vrot.slane %v997_v62, 4  ;;  %v1012_v63 = vrot.slane %v1011_v55, 4  ;;  %v2184_v0 = vshrl.u32 %v4869_v56, 16  ;;  %v2187_v45 = vshll.u32 %v4869_v56, 16  ;;  %5449 = vmatprep.subr.bf16.mxu0 %v6006_v49 }
 0x1af   :  { %v2172_v2 = vrot.slane %v2170_v58, 4  ;;  %v2175_v3 = vrot.slane %v2173_v22, 5  ;;  %v2181_v4 = vrot.slane %v2179_v59, 5  ;;  %v2193_v5 = vshll.u32 %v4870_v57, 16 }
 0x1b0   :  { %v1003_v6 = vsel %vm6685_vm10, %v998_v61, %v1002_v44  ;;  %v1017_v10 = vsel %vm6685_vm10, %v1012_v63, %v1016_v51  ;;  %v2186_v11 = vrot.slane %v2184_v0, 4  ;;  %v2189_v12 = vrot.slane %v2187_v45, 5  ;;  %v2052_v45 = vld [vmem:[#allocation2 + $0x40] sm:$0x1f] }
 0x1b1   :  { %v4757_v13 = vcombine.low %v1003_v6, %v1017_v10  ;;  %v2176_v14 = vor.u32 %v2175_v3, %v2172_v2  ;;  %v2195_v33 = vrot.slane %v2193_v5, 5  ;;  %v4871_v16 = vcombine.low %v2049_v1, %v2049_v1  ;;  %5450 = vmatpush3.bf16.msra.mxu0 %v6006_v49  ;;  %v6007_v5 = vld [vmem:[#allocation8 + $0x150] sm:$0xff]  }
 0x1b2   :  { %v2190_v17 = vor.u32 %v2189_v12, %v2186_v11  ;;  %v4872_v18 = vcombine.high %v2049_v1, %v2049_v1  ;;  %v4873_v20 = vcombine.low %v2050_v46, %v2050_v46  ;;  %v4874_v26 = vcombine.high %v2050_v46, %v2050_v46  ;;  %5467 = vmatprep.subr.bf16.mxu0 %v6791_v60 }
 0x1b3   :  { %5431 = vmatprep.mubr.bf16.mxu0 %v4757_v13  ;;  %v2177_v27 = vrot.slane %v2176_v14, 4  ;;  %v2198_v30 = vshrl.u32 %v4871_v16, 16  ;;  %v2201_v28 = vshll.u32 %v4871_v16, 16  ;;  %v4747_v9 = vcombine.low %v737_v8, %v737_v8 }
 0x1b4   :  { %v2191_v29 = vrot.slane %v2190_v17, 4  ;;  %v2207_v31 = vshll.u32 %v4872_v18, 16  ;;  %v2212_v32 = vshrl.u32 %v4873_v20, 16  ;;  %v2215_v35 = vshll.u32 %v4873_v20, 16  ;;  %v2053_v18 = vld [vmem:[#allocation2 + $0x58] sm:$0x1f] }
 0x1b5   :  { %v2182_v37 = vsel %vm6685_vm10, %v2177_v27, %v2181_v4  ;;  %v2200_v38 = vrot.slane %v2198_v30, 4  ;;  %v2203_v39 = vrot.slane %v2201_v28, 5  ;;  %v2221_v40 = vshll.u32 %v4874_v26, 16  ;;  %v6019_v20 = vld [vmem:[#allocation8 + $0x158] sm:$0xff]  }
 0x1b6   :  { %v2196_v42 = vsel %vm6685_vm10, %v2191_v29, %v2195_v33  ;;  %v2209_v43 = vrot.slane %v2207_v31, 5  ;;  %v2214_v44 = vrot.slane %v2212_v32, 4  ;;  %v2217_v47 = vrot.slane %v2215_v35, 5 }
 0x1b7   :  { %v4896_v48 = vcombine.low %v2182_v37, %v2196_v42  ;;  %v2204_v49 = vor.u32 %v2203_v39, %v2200_v38  ;;  %v2223_v50 = vrot.slane %v2221_v40, 5  ;;  %v4748_v51 = vcombine.high %v737_v8, %v737_v8 }
 0x1b8   :  { %v2218_v53 = vor.u32 %v2217_v47, %v2214_v44  ;;  %v4749_v54 = vcombine.low %v738_v41, %v738_v41  ;;  %v4750_v62 = vcombine.high %v738_v41, %v738_v41  ;;  %v1019_v55 = vshrl.u32 %v4747_v9, 16  ;;  %v6004_v41 = vld [vmem:[#allocation2] ss:$8 sps:$4 sm:$0xff]  }
 0x1b9   :  { %5548 = vmatmul.mubr.bf16.vlgmr.msra.gmra.mrb[0].mxu1 %v4896_v48  ;;  %v2205_v56 = vrot.slane %v2204_v49, 4  ;;  %v1022_v57 = vshll.u32 %v4747_v9, 16  ;;  %v1028_v58 = vshll.u32 %v4748_v51, 16  ;;  %v4875_v22 = vcombine.low %v2051_v36, %v2051_v36  ;;  %v2054_v9 = vld [vmem:[#allocation2 + $0x60] sm:$0x1f] }
 0x1ba   :  { %5564 = vmatpush3.bf16.msra.mxu1 %v6773_v7  ;;  %v2219_v59 = vrot.slane %v2218_v53, 4  ;;  %v1021_v61 = vrot.slane %v1019_v55, 4  ;;  %v1033_v63 = vshrl.u32 %v4749_v54, 16  ;;  %v1036_v0 = vshll.u32 %v4749_v54, 16  ;;  %v6021_v47 = vld [vmem:[#allocation8 + $0x160] sm:$0xff]  }
 0x1bb   :  { %v2210_v1 = vsel %vm6685_vm10, %v2205_v56, %v2209_v43  ;;  %v1024_v2 = vrot.slane %v1022_v57, 5  ;;  %v1030_v3 = vrot.slane %v1028_v58, 5  ;;  %v1042_v4 = vshll.u32 %v4750_v62, 16  ;;  %5565 = vmatprep.subr.bf16.mxu1 %v6005_v52 }
 0x1bc   :  { %v2224_v46 = vsel %vm6685_vm10, %v2219_v59, %v2223_v50  ;;  %v1035_v6 = vrot.slane %v1033_v63, 4  ;;  %v1038_v10 = vrot.slane %v1036_v0, 5  ;;  %v4876_v11 = vcombine.high %v2051_v36, %v2051_v36 }
 0x1bd   :  { %v4897_v7 = vcombine.low %v2210_v1, %v2224_v46  ;;  %v1025_v12 = vor.u32 %v1024_v2, %v1021_v61  ;;  %v1044_v8 = vrot.slane %v1042_v4, 5  ;;  %v4877_v13 = vcombine.low %v2052_v45, %v2052_v45 }
 0x1be   :  { %v1039_v14 = vor.u32 %v1038_v10, %v1035_v6  ;;  %5566 = vmatpush3.bf16.msra.mxu1 %v6005_v52  ;;  %v4878_v33 = vcombine.high %v2052_v45, %v2052_v45  ;;  %v2226_v16 = vshrl.u32 %v4875_v22, 16  ;;  %v2229_v17 = vshll.u32 %v4875_v22, 16  ;;  %v2055_v52 = vld [vmem:[#allocation2 + $0x68] sm:$0x1f]  ;;  %v2056_v45 = vld [vmem:[#allocation2 + $0x70] sm:$0x1f] }
 0x1bf   :  { %5551 = vmatprep.mubr.bf16.mxu1 %v4897_v7  ;;  %v1026_v26 = vrot.slane %v1025_v12, 4  ;;  %5567 = vmatprep.subr.bf16.mxu1 %v6007_v5  ;;  %v2235_v27 = vshll.u32 %v4876_v11, 16  ;;  %v2240_v30 = vshrl.u32 %v4877_v13, 16  ;;  %v2243_v28 = vshll.u32 %v4877_v13, 16  ;;  %v6033_v7 = vld [vmem:[#allocation8 + $0x168] sm:$0xff]  }
 0x1c0   :  { %v1040_v29 = vrot.slane %v1039_v14, 4  ;;  %v2228_v31 = vrot.slane %v2226_v16, 4  ;;  %v2231_v32 = vrot.slane %v2229_v17, 5  ;;  %v2249_v35 = vshll.u32 %v4878_v33, 16  ;;  %v6016_v16 = vld [vmem:[#allocation2 + $0x10] ss:$8 sps:$4 sm:$0xff]  }
 0x1c1   :  { %v1031_v36 = vsel %vm6685_vm10, %v1026_v26, %v1030_v3  ;;  %v2237_v37 = vrot.slane %v2235_v27, 5  ;;  %v2242_v38 = vrot.slane %v2240_v30, 4  ;;  %v2245_v39 = vrot.slane %v2243_v28, 5  ;;  %v6020_v17 = vld [vmem:[#allocation8 + $0x88] sm:$0xff]  }
 0x1c2   :  { %v1045_v40 = vsel %vm6685_vm10, %v1040_v29, %v1044_v8  ;;  %v2232_v42 = vor.u32 %v2231_v32, %v2228_v31  ;;  %v2251_v43 = vrot.slane %v2249_v35, 5  ;;  %5568 = vmatpush3.bf16.msra.mxu1 %v6007_v5  ;;  %v4879_v44 = vcombine.low %v2053_v18, %v2053_v18  ;;  %v2057_v5 = vld [vmem:[#allocation2 + $0x78] sm:$0x1f]  ;;  %v6018_v30 = vld [vmem:[#allocation2 + $0x20] ss:$8 sps:$4 sm:$0xff]  }
 0x1c3   :  { %v4758_v48 = vcombine.low %v1031_v36, %v1045_v40  ;;  %v2246_v49 = vor.u32 %v2245_v39, %v2242_v38  ;;  %v4880_v50 = vcombine.high %v2053_v18, %v2053_v18  ;;  %v4881_v51 = vcombine.low %v2054_v9, %v2054_v9  ;;  %5569 = vmatprep.subr.bf16.mxu1 %v6019_v20  ;;  %v6035_v38 = vld [vmem:[#allocation8 + $0x170] sm:$0xff]  }
 0x1c4   :  { %v2233_v53 = vrot.slane %v2232_v42, 4  ;;  %v4882_v54 = vcombine.high %v2054_v9, %v2054_v9  ;;  %v2254_v62 = vshrl.u32 %v4879_v44, 16  ;;  %v2257_v55 = vshll.u32 %v4879_v44, 16 }
 0x1c5   :  { %5432 = vmatmul.mubr.bf16.gmra.mrb[28].mxu0 %v4758_v48  ;;  %v2247_v56 = vrot.slane %v2246_v49, 4  ;;  %v2263_v57 = vshll.u32 %v4880_v50, 16  ;;  %v2268_v58 = vshrl.u32 %v4881_v51, 16  ;;  %v2271_v22 = vshll.u32 %v4881_v51, 16 }
 0x1c6   :  { %5451 = vmatprep.mubr.bf16.mxu0 %v6004_v41  ;;  %v2238_v59 = vsel %vm6685_vm10, %v2233_v53, %v2237_v37  ;;  %v2256_v61 = vrot.slane %v2254_v62, 4  ;;  %v2259_v63 = vrot.slane %v2257_v55, 5  ;;  %v2277_v0 = vshll.u32 %v4882_v54, 16  ;;  %5570 = vmatpush3.bf16.msra.mxu1 %v6019_v20  ;;  %v2058_v37 = vld [vmem:[#allocation2 + $0x80] sm:$0x1f]  ;;  %v6031_v54 = vld [vmem:[#allocation8 + $0x90] sm:$0xff]  }
 0x1c7   :  { %v2252_v1 = vsel %vm6685_vm10, %v2247_v56, %v2251_v43  ;;  %v2265_v2 = vrot.slane %v2263_v57, 5  ;;  %v2270_v3 = vrot.slane %v2268_v58, 4  ;;  %v2273_v4 = vrot.slane %v2271_v22, 5  ;;  %5571 = vmatprep.subr.bf16.mxu1 %v6021_v47  ;;  %v2059_v43 = vld [vmem:[#allocation2 + $0x88] sm:$0x1f]  ;;  %v6047_v58 = vld [vmem:[#allocation8 + $0x178] sm:$0xff]  }
 0x1c8   :  { %v4898_v46 = vcombine.low %v2238_v59, %v2252_v1  ;;  %v2260_v6 = vor.u32 %v2259_v63, %v2256_v61  ;;  %v2279_v10 = vrot.slane %v2277_v0, 5  ;;  %v4883_v11 = vcombine.low %v2055_v52, %v2055_v52  ;;  %v2060_v63 = vld [vmem:[#allocation2 + $0x90] sm:$0x1f] }
 0x1c9   :  { %v2274_v12 = vor.u32 %v2273_v4, %v2270_v3  ;;  %v4884_v8 = vcombine.high %v2055_v52, %v2055_v52  ;;  %v4885_v13 = vcombine.low %v2056_v45, %v2056_v45  ;;  %v4886_v14 = vcombine.high %v2056_v45, %v2056_v45 }
 0x1ca   :  { %5552 = vmatmul.mubr.bf16.gmra.mrb[4].mxu1 %v4898_v46  ;;  %v2261_v33 = vrot.slane %v2260_v6, 4  ;;  %v2282_v18 = vshrl.u32 %v4883_v11, 16  ;;  %v2285_v20 = vshll.u32 %v4883_v11, 16  ;;  %v4887_v26 = vcombine.low %v2057_v5, %v2057_v5  ;;  %v6030_v46 = vld [vmem:[#allocation2 + $0x30] ss:$8 sps:$4 sm:$0xff]  }
 0x1cb   :  { %v2275_v27 = vrot.slane %v2274_v12, 4  ;;  %v2291_v28 = vshll.u32 %v4884_v8, 16  ;;  %v2296_v9 = vshrl.u32 %v4885_v13, 16  ;;  %v2299_v29 = vshll.u32 %v4885_v13, 16  ;;  %5572 = vmatpush3.bf16.msra.mxu1 %v6021_v47  ;;  %v6032_v12 = vld [vmem:[#allocation2 + $0x50] ss:$8 sps:$4 sm:$0xff]  }
 0x1cc   :  { %v2266_v31 = vsel %vm6685_vm10, %v2261_v33, %v2265_v2  ;;  %v2284_v32 = vrot.slane %v2282_v18, 4  ;;  %v2287_v35 = vrot.slane %v2285_v20, 5  ;;  %v2305_v36 = vshll.u32 %v4886_v14, 16  ;;  %5573 = vmatprep.subr.bf16.mxu1 %v6033_v7  ;;  %v6034_v8 = vld [vmem:[#allocation8 + $0x98] sm:$0xff]   ;;  %v6824_v14 = vld [vmem:[#allocation8 + $0x180] sm:$0xff]  }
 0x1cd   :  { %v2280_v39 = vsel %vm6685_vm10, %v2275_v27, %v2279_v10  ;;  %5452 = vmatmul.mubr.bf16.vlgmr.msra.gmra.mrb[16].mxu0 %v6016_v16  ;;  %v2293_v40 = vrot.slane %v2291_v28, 5  ;;  %v2298_v41 = vrot.slane %v2296_v9, 4  ;;  %v2301_v42 = vrot.slane %v2299_v29, 5  ;;  %v2574_v28 = vld [vmem:[#allocation2 + $0x8] sm:$0x1e] }
 0x1ce   :  { %v4899_v44 = vcombine.low %v2266_v31, %v2280_v39  ;;  %5455 = vmatprep.mubr.bf16.mxu0 %v6018_v30  ;;  %5468 = vmatpush3.bf16.msra.mxu0 %v6791_v60  ;;  %v2288_v47 = vor.u32 %v2287_v35, %v2284_v32  ;;  %v2307_v48 = vrot.slane %v2305_v36, 5  ;;  %v4888_v49 = vcombine.high %v2057_v5, %v2057_v5  ;;  %v2575_v35 = vld [vmem:[#allocation2 + $0x10] sm:$0x1e] }
 0x1cf   :  { %5469 = vmatprep.subr.bf16.mxu0 %v6020_v17  ;;  %v2302_v50 = vor.u32 %v2301_v42, %v2298_v41  ;;  %v4889_v51 = vcombine.low %v2058_v37, %v2058_v37  ;;  %v4890_v52 = vcombine.high %v2058_v37, %v2058_v37  ;;  %v2310_v53 = vshrl.u32 %v4887_v26, 16  ;;  %5574 = vmatpush3.bf16.msra.mxu1 %v6033_v7  ;;  %v2576_v41 = vld [vmem:[#allocation2 + $0x18] sm:$0x1e] }
 0x1d0   :  { %5555 = vmatprep.mubr.bf16.mxu1 %v4899_v44  ;;  %v2289_v62 = vrot.slane %v2288_v47, 4  ;;  %v2313_v55 = vshll.u32 %v4887_v26, 16  ;;  %v2319_v56 = vshll.u32 %v4888_v49, 16  ;;  %5575 = vmatprep.subr.bf16.mxu1 %v6035_v38  ;;  %v4891_v57 = vcombine.low %v2059_v43, %v2059_v43 }
 0x1d1   :  { %v2303_v22 = vrot.slane %v2302_v50, 4  ;;  %v2312_v59 = vrot.slane %v2310_v53, 4  ;;  %v2324_v60 = vshrl.u32 %v4889_v51, 16  ;;  %v2327_v61 = vshll.u32 %v4889_v51, 16 }
 0x1d2   :  { %5470 = vmatpush3.bf16.msra.mxu0 %v6020_v17  ;;  %v2294_v0 = vsel %vm6685_vm10, %v2289_v62, %v2293_v40  ;;  %v2315_v45 = vrot.slane %v2313_v55, 5  ;;  %v2321_v1 = vrot.slane %v2319_v56, 5  ;;  %v2333_v2 = vshll.u32 %v4890_v52, 16  ;;  %v6045_v40 = vld [vmem:[#allocation8 + $0xa0] sm:$0xff]  }
 0x1d3   :  { %v2308_v3 = vsel %vm6685_vm10, %v2303_v22, %v2307_v48  ;;  %v2326_v4 = vrot.slane %v2324_v60, 4  ;;  %v2329_v5 = vrot.slane %v2327_v61, 5  ;;  %5471 = vmatprep.subr.bf16.mxu0 %v6031_v54  ;;  %v4892_v6 = vcombine.high %v2059_v43, %v2059_v43  ;;  %5576 = vmatpush3.bf16.msra.mxu1 %v6035_v38  ;;  %v2577_v52 = vld [vmem:[#allocation2 + $0x20] sm:$0x1e]  ;;  %v6048_v60 = vld [vmem:[#allocation8 + $0xa8] sm:$0xff]  }
 0x1d4   :  { %v4900_v10 = vcombine.low %v2294_v0, %v2308_v3  ;;  %v2316_v11 = vor.u32 %v2315_v45, %v2312_v59  ;;  %v2335_v7 = vrot.slane %v2333_v2, 5  ;;  %v4893_v13 = vcombine.low %v2060_v63, %v2060_v63  ;;  %5577 = vmatprep.subr.bf16.mxu1 %v6047_v58  ;;  %v6044_v55 = vld [vmem:[#allocation2 + $0x60] ss:$8 sps:$4 sm:$0xff]   ;;  %v6046_v59 = vld [vmem:[#allocation2 + $0x70] ss:$8 sps:$4 sm:$0xff]  }
 0x1d5   :  { %v2330_v33 = vor.u32 %v2329_v5, %v2326_v4  ;;  %5456 = vmatmul.mubr.bf16.gmra.mrb[20].mxu0 %v6030_v46  ;;  %v4894_v16 = vcombine.high %v2060_v63, %v2060_v63  ;;  %v2338_v17 = vshrl.u32 %v4891_v57, 16  ;;  %v2341_v18 = vshll.u32 %v4891_v57, 16  ;;  %v2578_v2 = vld [vmem:[#allocation2 + $0x28] sm:$0x1e] }
 0x1d6   :  { %5556 = vmatmul.mubr.bf16.gmra.mrb[8].mxu1 %v4900_v10  ;;  %v2317_v20 = vrot.slane %v2316_v11, 4  ;;  %5459 = vmatprep.mubr.bf16.mxu0 %v6032_v12  ;;  %v2347_v26 = vshll.u32 %v4892_v6, 16  ;;  %v2352_v27 = vshrl.u32 %v4893_v13, 16  ;;  %v2355_v30 = vshll.u32 %v4893_v13, 16  ;;  %v2579_v6 = vld [vmem:[#allocation2 + $0x30] sm:$0x1e] }
 0x1d7   :  { %v2331_v9 = vrot.slane %v2330_v33, 4  ;;  %5472 = vmatpush3.bf16.msra.mxu0 %v6031_v54  ;;  %v2340_v29 = vrot.slane %v2338_v17, 4  ;;  %v2343_v31 = vrot.slane %v2341_v18, 5  ;;  %v2361_v32 = vshll.u32 %v4894_v16, 16  ;;  %5578 = vmatpush3.bf16.msra.mxu1 %v6047_v58  ;;  %v1433_v10 = vld [vmem:[#allocation2 + $0x8] sm:$0x1e] }
 0x1d8   :  { %v2322_v36 = vsel %vm6685_vm10, %v2317_v20, %v2321_v1  ;;  %5473 = vmatprep.subr.bf16.mxu0 %v6034_v8  ;;  %v2349_v37 = vrot.slane %v2347_v26, 5  ;;  %v2354_v38 = vrot.slane %v2352_v27, 4  ;;  %v2357_v39 = vrot.slane %v2355_v30, 5  ;;  %5595 = vmatprep.subr.bf16.mxu1 %v6824_v14  ;;  %v6059_v18 = vld [vmem:[#allocation8 + $0xb0] sm:$0xff]   ;;  %v2580_v20 = vld [vmem:[#allocation2 + $0x38] sm:$0x1e] }
 0x1d9   :  { %v2336_v42 = vsel %vm6685_vm10, %v2331_v9, %v2335_v7  ;;  %v2344_v43 = vor.u32 %v2343_v31, %v2340_v29  ;;  %v2363_v44 = vrot.slane %v2361_v32, 5  ;;  %v4911_v47 = vcombine.low %v2574_v28, %v2574_v28  ;;  %v2581_v9 = vld [vmem:[#allocation2 + $0x40] sm:$0x1e] }
 0x1da   :  { %v4901_v48 = vcombine.low %v2322_v36, %v2336_v42  ;;  %v2358_v49 = vor.u32 %v2357_v39, %v2354_v38  ;;  %v4912_v50 = vcombine.high %v2574_v28, %v2574_v28  ;;  %v4913_v51 = vcombine.low %v2575_v35, %v2575_v35  ;;  %v2582_v36 = vld [vmem:[#allocation2 + $0x58] sm:$0x1e]  ;;  %v6058_v39 = vld [vmem:[#allocation2 + $0x80] ss:$8 sps:$4 sm:$0xff]  }
 0x1db   :  { %5474 = vmatpush3.bf16.msra.mxu0 %v6034_v8  ;;  %v2345_v53 = vrot.slane %v2344_v43, 4  ;;  %v4914_v54 = vcombine.high %v2575_v35, %v2575_v35  ;;  %v4943_v62 = vrot.slane %v4911_v47, 9  ;;  %v4915_v56 = vcombine.low %v2576_v41, %v2576_v41 }
 0x1dc   :  { %5559 = vmatprep.mubr.bf16.mxu1 %v4901_v48  ;;  %v2359_v57 = vrot.slane %v2358_v49, 4  ;;  %v2672_v58 = vrot.slane %v4912_v50, 5  ;;  %v4944_v22 = vrot.slane %v4913_v51, 9  ;;  %5475 = vmatprep.subr.bf16.mxu0 %v6045_v40  ;;  %v4916_v61 = vcombine.high %v2576_v41, %v2576_v41  ;;  %v2583_v49 = vld [vmem:[#allocation2 + $0x60] sm:$0x1e] }
 0x1dd   :  { %v2350_v63 = vsel %vm6685_vm10, %v2345_v53, %v2349_v37  ;;  %v2676_v0 = vrot.slane %v4914_v54, 5  ;;  %5460 = vmatmul.mubr.bf16.gmra.mrb[24].mxu0 %v6044_v55  ;;  %v4917_v45 = vcombine.low %v2577_v52, %v2577_v52  ;;  %v4918_v1 = vcombine.high %v2577_v52, %v2577_v52  ;;  %v1434_v54 = vld [vmem:[#allocation2 + $0x10] sm:$0x1e] }
 0x1de   :  { %v2364_v3 = vsel %vm6685_vm10, %v2359_v57, %v2363_v44  ;;  %v2673_v4 = vsel %vm6690_vm11, %v4943_v62, %v2672_v58  ;;  %5463 = vmatprep.mubr.bf16.mxu0 %v6046_v59  ;;  %v4945_v5 = vrot.slane %v4915_v56, 9  ;;  %v2680_v46 = vrot.slane %v4916_v61, 5  ;;  %v6065_v44 = vld [vmem:[#allocation8 + $0xb8] sm:$0xff]  }
 0x1df   :  { %v4902_v11 = vcombine.low %v2350_v63, %v2364_v3  ;;  %v2677_v7 = vsel %vm6690_vm11, %v4944_v22, %v2676_v0  ;;  %5476 = vmatpush3.bf16.msra.mxu0 %v6045_v40  ;;  %v4946_v12 = vrot.slane %v4917_v45, 9  ;;  %v2684_v8 = vrot.slane %v4918_v1, 5  ;;  %v6064_v22 = vld [vmem:[#allocation8 + $0x188] sm:$0xff]   ;;  %v1435_v63 = vld [vmem:[#allocation2 + $0x18] sm:$0x1e] }
 0x1e0   :  { %v4959_v13 = vcombine.low %v2673_v4, %v2677_v7  ;;  %5477 = vmatprep.subr.bf16.mxu0 %v6048_v60  ;;  %v2681_v33 = vsel %vm6690_vm11, %v4945_v5, %v2680_v46  ;;  %v4919_v16 = vcombine.low %v2578_v2, %v2578_v2  ;;  %v4920_v17 = vcombine.high %v2578_v2, %v2578_v2  ;;  %v1436_v3 = vld [vmem:[#allocation2 + $0x20] sm:$0x1e]  ;;  %v6066_v7 = vld [vmem:[#allocation8 + $0x190] sm:$0xff]  }
 0x1e1   :  { %5560 = vmatmul.mubr.bf16.gmra.mrb[12].mxu1 %v4902_v11  ;;  %v2685_v26 = vsel %vm6690_vm11, %v4946_v12, %v2684_v8  ;;  %v4921_v27 = vcombine.low %v2579_v6, %v2579_v6  ;;  %v4922_v30 = vcombine.high %v2579_v6, %v2579_v6  ;;  %v4785_v28 = vcombine.low %v1433_v10, %v1433_v10  ;;  %v1437_v11 = vld [vmem:[#allocation2 + $0x28] sm:$0x1e] }
 0x1e2   :  { %5579 = vmatprep.mubr.bf16.mxu1 %v4959_v13  ;;  %v4960_v29 = vcombine.low %v2681_v33, %v2685_v26  ;;  %v4947_v31 = vrot.slane %v4919_v16, 9  ;;  %v2688_v32 = vrot.slane %v4920_v17, 5  ;;  %v4786_v35 = vcombine.high %v1433_v10, %v1433_v10  ;;  %v2584_v16 = vld [vmem:[#allocation2 + $0x68] sm:$0x1e] }
 0x1e3   :  { %5478 = vmatpush3.bf16.msra.mxu0 %v6048_v60  ;;  %v4948_v37 = vrot.slane %v4921_v27, 9  ;;  %v2692_v38 = vrot.slane %v4922_v30, 5  ;;  %v4816_v40 = vrot.slane %v4785_v28, 9  ;;  %v4923_v41 = vcombine.low %v2580_v20, %v2580_v20 }
 0x1e4   :  { %v2689_v42 = vsel %vm6690_vm11, %v4947_v31, %v2688_v32  ;;  %5479 = vmatprep.subr.bf16.mxu0 %v6059_v18  ;;  %v1537_v43 = vrot.slane %v4786_v35, 5  ;;  %v4924_v47 = vcombine.high %v2580_v20, %v2580_v20  ;;  %v4925_v48 = vcombine.low %v2581_v9, %v2581_v9 }
 0x1e5   :  { %v2693_v50 = vsel %vm6690_vm11, %v4948_v37, %v2692_v38  ;;  %5464 = vmatmul.mubr.bf16.gmra.mrb[28].mxu0 %v6058_v39  ;;  %v4926_v51 = vcombine.high %v2581_v9, %v2581_v9  ;;  %v4949_v52 = vrot.slane %v4923_v41, 9  ;;  %v4927_v53 = vcombine.low %v2582_v36, %v2582_v36  ;;  %v2585_v9 = vld [vmem:[#allocation2 + $0x70] sm:$0x1e] }
 0x1e6   :  { %v4961_v62 = vcombine.low %v2689_v42, %v2693_v50  ;;  %v1538_v55 = vsel %vm6690_vm11, %v4816_v40, %v1537_v43  ;;  %v2696_v56 = vrot.slane %v4924_v47, 5  ;;  %v4950_v57 = vrot.slane %v4925_v48, 9  ;;  %v6083_v40 = vld [vmem:[#allocation8 + $0x198] sm:$0xff]   ;;  %v2587_v42 = vld [vmem:[#allocation2 + $0x80] sm:$0x1e] }
 0x1e7   :  { %5480 = vmatpush3.bf16.msra.mxu0 %v6059_v18  ;;  %v4831_v58 = vcombine.low %v1534_v34, %v1538_v55  ;;  %v2700_v59 = vrot.slane %v4926_v51, 5  ;;  %v4928_v60 = vcombine.high %v2582_v36, %v2582_v36  ;;  %v4929_v61 = vcombine.low %v2583_v49, %v2583_v49  ;;  %v2586_v36 = vld [vmem:[#allocation2 + $0x78] sm:$0x1e] }
 0x1e8   :  { %5481 = vmatprep.subr.bf16.mxu0 %v6065_v44  ;;  %v2697_v0 = vsel %vm6690_vm11, %v4949_v52, %v2696_v56  ;;  %v4930_v45 = vcombine.high %v2583_v49, %v2583_v49  ;;  %v4951_v1 = vrot.slane %v4927_v53, 9  ;;  %v4787_v2 = vcombine.low %v1434_v54, %v1434_v54  ;;  %v1438_v53 = vld [vmem:[#allocation2 + $0x30] sm:$0x1e] }
 0x1e9   :  { %5580 = vmatmul.mubr.bf16.vlgmr.msra.gmra.mrb[0].mxu1 %v4960_v29  ;;  %5483 = vmatprep.mubr.bf16.mxu0 %v4831_v58  ;;  %v2701_v4 = vsel %vm6690_vm11, %v4950_v57, %v2700_v59  ;;  %v2704_v24 = vrot.slane %v4928_v60, 5  ;;  %v4952_v25 = vrot.slane %v4929_v61, 9  ;;  %v4788_v34 = vcombine.high %v1434_v54, %v1434_v54  ;;  %v1439_v57 = vld [vmem:[#allocation2 + $0x38] sm:$0x1e]  ;;  %v6084_v58 = vld [vmem:[#allocation8 + $0x1a0] sm:$0xff]  }
 0x1ea   :  { %5596 = vmatpush3.bf16.msra.mxu1 %v6824_v14  ;;  %5583 = vmatprep.mubr.bf16.mxu1 %v4961_v62  ;;  %v4962_v5 = vcombine.low %v2697_v0, %v2701_v4  ;;  %v2708_v46 = vrot.slane %v4930_v45, 5  ;;  %v4789_v6 = vcombine.low %v1435_v63, %v1435_v63  ;;  %v4790_v10 = vcombine.high %v1435_v63, %v1435_v63  ;;  %v1440_v63 = vld [vmem:[#allocation2 + $0x50] sm:$0x1e] }
 0x1eb   :  { %5597 = vmatprep.subr.bf16.mxu1 %v6064_v22  ;;  %5482 = vmatpush3.bf16.msra.mxu0 %v6065_v44  ;;  %v2705_v12 = vsel %vm6690_vm11, %v4951_v1, %v2704_v24  ;;  %v4817_v8 = vrot.slane %v4787_v2, 9  ;;  %v1541_v13 = vrot.slane %v4788_v34, 5  ;;  %v4791_v33 = vcombine.low %v1436_v3, %v1436_v3 }
 0x1ec   :  { %v2709_v17 = vsel %vm6690_vm11, %v4952_v25, %v2708_v46  ;;  %v4818_v14 = vrot.slane %v4789_v6, 9  ;;  %v1545_v18 = vrot.slane %v4790_v10, 5  ;;  %v4792_v20 = vcombine.high %v1436_v3, %v1436_v3  ;;  %v1441_v3 = vld [vmem:[#allocation2 + $0x58] sm:$0x1e] }
 0x1ed   :  { %v4963_v26 = vcombine.low %v2705_v12, %v2709_v17  ;;  %v1542_v27 = vsel %vm6690_vm11, %v4817_v8, %v1541_v13  ;;  %v4793_v30 = vcombine.low %v1437_v11, %v1437_v11  ;;  %v4794_v28 = vcombine.high %v1437_v11, %v1437_v11  ;;  %v2588_v11 = vld [vmem:[#allocation2 + $0x88] sm:$0x1e] }
 0x1ee   :  { %5598 = vmatpush3.bf16.msra.mxu1 %v6064_v22  ;;  %v1546_v29 = vsel %vm6690_vm11, %v4818_v14, %v1545_v18  ;;  %v4819_v31 = vrot.slane %v4791_v33, 9  ;;  %v1549_v32 = vrot.slane %v4792_v20, 5  ;;  %v4931_v35 = vcombine.low %v2584_v16, %v2584_v16  ;;  %v6101_v33 = vld [vmem:[#allocation8 + $0x1a8] sm:$0xff]  }
 0x1ef   :  { %5599 = vmatprep.subr.bf16.mxu1 %v6066_v7  ;;  %v4832_v37 = vcombine.low %v1542_v27, %v1546_v29  ;;  %v4820_v38 = vrot.slane %v4793_v30, 9  ;;  %v1553_v39 = vrot.slane %v4794_v28, 5  ;;  %v4932_v41 = vcombine.high %v2584_v16, %v2584_v16  ;;  %v2589_v16 = vld [vmem:[#allocation2 + $0x90] sm:$0x1e] }
 0x1f0   :  { %v1550_v43 = vsel %vm6690_vm11, %v4819_v31, %v1549_v32  ;;  %v4933_v44 = vcombine.low %v2585_v9, %v2585_v9  ;;  %v4934_v47 = vcombine.high %v2585_v9, %v2585_v9  ;;  %v4953_v48 = vrot.slane %v4931_v35, 9  ;;  %v1442_v9 = vld [vmem:[#allocation2 + $0x60] sm:$0x1e] }
 0x1f1   :  { %5584 = vmatmul.mubr.bf16.gmra.mrb[4].mxu1 %v4962_v5  ;;  %5484 = vmatmul.mubr.bf16.vlgmr.msra.gmra.mrb[16].mxu0 %v4832_v37  ;;  %v1554_v49 = vsel %vm6690_vm11, %v4820_v38, %v1553_v39  ;;  %v2712_v50 = vrot.slane %v4932_v41, 5  ;;  %v4935_v51 = vcombine.low %v2586_v36, %v2586_v36  ;;  %v4936_v52 = vcombine.high %v2586_v36, %v2586_v36  ;;  %v1443_v36 = vld [vmem:[#allocation2 + $0x68] sm:$0x1e]  ;;  %v6102_v39 = vld [vmem:[#allocation8 + $0x1b0] sm:$0xff]  }
 0x1f2   :  { %5600 = vmatpush3.bf16.msra.mxu1 %v6066_v7  ;;  %5587 = vmatprep.mubr.bf16.mxu1 %v4963_v26  ;;  %v4833_v54 = vcombine.low %v1550_v43, %v1554_v49  ;;  %v4954_v62 = vrot.slane %v4933_v44, 9  ;;  %v2716_v55 = vrot.slane %v4934_v47, 5  ;;  %v4937_v56 = vcombine.low %v2587_v42, %v2587_v42 }
 0x1f3   :  { %5601 = vmatprep.subr.bf16.mxu1 %v6083_v40  ;;  %v2713_v22 = vsel %vm6690_vm11, %v4953_v48, %v2712_v50  ;;  %v4938_v59 = vcombine.high %v2587_v42, %v2587_v42  ;;  %v4955_v60 = vrot.slane %v4935_v51, 9  ;;  %v2720_v61 = vrot.slane %v4936_v52, 5  ;;  %v1444_v42 = vld [vmem:[#allocation2 + $0x70] sm:$0x1e] }
 0x1f4   :  { %5487 = vmatprep.mubr.bf16.mxu0 %v4833_v54  ;;  %v2717_v0 = vsel %vm6690_vm11, %v4954_v62, %v2716_v55  ;;  %v4956_v45 = vrot.slane %v4937_v56, 9  ;;  %v4795_v1 = vcombine.low %v1438_v53, %v1438_v53  ;;  %v4796_v2 = vcombine.high %v1438_v53, %v1438_v53  ;;  %v1445_v53 = vld [vmem:[#allocation2 + $0x78] sm:$0x1e] }
 0x1f5   :  { %v4964_v4 = vcombine.low %v2713_v22, %v2717_v0  ;;  %v2721_v24 = vsel %vm6690_vm11, %v4955_v60, %v2720_v61  ;;  %v2724_v25 = vrot.slane %v4938_v59, 5  ;;  %v4797_v34 = vcombine.low %v1439_v57, %v1439_v57 }
 0x1f6   :  { %5602 = vmatpush3.bf16.msra.mxu1 %v6083_v40  ;;  %v4798_v5 = vcombine.high %v1439_v57, %v1439_v57  ;;  %v4821_v46 = vrot.slane %v4795_v1, 9  ;;  %v1557_v6 = vrot.slane %v4796_v2, 5  ;;  %v4799_v10 = vcombine.low %v1440_v63, %v1440_v63  ;;  %v1446_v57 = vld [vmem:[#allocation2 + $0x80] sm:$0x1e]  ;;  %v6116_v1 = vld [vmem:[#allocation8 + $0x1b8] sm:$0xff]  }
 0x1f7   :  { %5603 = vmatprep.subr.bf16.mxu1 %v6084_v58  ;;  %v2725_v7 = vsel %vm6690_vm11, %v4956_v45, %v2724_v25  ;;  %v4822_v12 = vrot.slane %v4797_v34, 9  ;;  %v4800_v8 = vcombine.high %v1440_v63, %v1440_v63  ;;  %v4801_v13 = vcombine.low %v1441_v3, %v1441_v3  ;;  %v1447_v2 = vld [vmem:[#allocation2 + $0x88] sm:$0x1e] }
 0x1f8   :  { %v4965_v17 = vcombine.low %v2721_v24, %v2725_v7  ;;  %v1558_v14 = vsel %vm6690_vm11, %v4821_v46, %v1557_v6  ;;  %v1561_v18 = vrot.slane %v4798_v5, 5  ;;  %v4802_v20 = vcombine.high %v1441_v3, %v1441_v3  ;;  %v6107_v3 = vld [vmem:[#allocation2 + $0x10] ss:$8 sps:$4 sm:$0xff]   ;;  %v399_v5 = vld [vmem:[#allocation2 + $0x48] sm:$0x1] }
 0x1f9   :  { %5588 = vmatmul.mubr.bf16.gmra.mrb[8].mxu1 %v4964_v4  ;;  %v4823_v26 = vrot.slane %v4799_v10, 9  ;;  %v1565_v27 = vrot.slane %v4800_v8, 5  ;;  %v4824_v30 = vrot.slane %v4801_v13, 9  ;;  %v4939_v28 = vcombine.low %v2588_v11, %v2588_v11  ;;  %v429_v7 = vld [vmem:[#allocation2 + $0x98] sm:$0x1] }
 0x1fa   :  { %5604 = vmatpush3.bf16.msra.mxu1 %v6084_v58  ;;  %5591 = vmatprep.mubr.bf16.mxu1 %v4965_v17  ;;  %v1562_v29 = vsel %vm6690_vm11, %v4822_v12, %v1561_v18  ;;  %v1569_v31 = vrot.slane %v4802_v20, 5  ;;  %v4940_v32 = vcombine.high %v2588_v11, %v2588_v11  ;;  %v4941_v35 = vcombine.low %v2589_v16, %v2589_v16  ;;  %v3185_v12 = vld [vmem:[#allocation2 + $0x10] sm:$0x1f]  ;;  %v6897_v17 = vld [vmem:[#allocation2 + $0x18] sm:$0x1f]  ;;  %v6117_v18 = vld [vmem:[#allocation8 + $0x1c0] sm:$0xff]  }
 0x1fb   :  { %v4834_v37 = vcombine.low %v1558_v14, %v1562_v29  ;;  %v1566_v38 = vsel %vm6690_vm11, %v4823_v26, %v1565_v27  ;;  %5605 = vmatprep.subr.bf16.mxu1 %v6101_v33  ;;  %v4942_v40 = vcombine.high %v2589_v16, %v2589_v16  ;;  %v4957_v41 = vrot.slane %v4939_v28, 9  ;;  %v6905_v29 = vld [vmem:[#allocation2 + $0x20] sm:$0x1f] }
 0x1fc   :  { %v1570_v43 = vsel %vm6690_vm11, %v4824_v30, %v1569_v31  ;;  %v2728_v44 = vrot.slane %v4940_v32, 5  ;;  %v4958_v47 = vrot.slane %v4941_v35, 9  ;;  %v4803_v48 = vcombine.low %v1442_v9, %v1442_v9 }
 0x1fd   :  { %5488 = vmatmul.mubr.bf16.gmra.mrb[20].mxu0 %v4834_v37  ;;  %v4835_v49 = vcombine.low %v1566_v38, %v1570_v43  ;;  %v2732_v50 = vrot.slane %v4942_v40, 5  ;;  %v4804_v51 = vcombine.high %v1442_v9, %v1442_v9  ;;  %v4805_v52 = vcombine.low %v1443_v36, %v1443_v36  ;;  %v6118_v38 = vld [vmem:[#allocation2 + $0x20] ss:$8 sps:$4 sm:$0xff]  }
 0x1fe   :  { %5606 = vmatpush3.bf16.msra.mxu1 %v6101_v33  ;;  %v2729_v54 = vsel %vm6690_vm11, %v4957_v41, %v2728_v44  ;;  %v4806_v62 = vcombine.high %v1443_v36, %v1443_v36  ;;  %v4825_v55 = vrot.slane %v4803_v48, 9  ;;  %v4807_v56 = vcombine.low %v1444_v42, %v1444_v42  ;;  %v3188_v40 = vld [vmem:[#allocation2 + $0x28] sm:$0x1f] }
 0x1ff   :  { %5491 = vmatprep.mubr.bf16.mxu0 %v4835_v49  ;;  %5607 = vmatprep.subr.bf16.mxu1 %v6102_v39  ;;  %v2733_v58 = vsel %vm6690_vm11, %v4958_v47, %v2732_v50  ;;  %v1573_v22 = vrot.slane %v4804_v51, 5  ;;  %v4826_v59 = vrot.slane %v4805_v52, 9  ;;  %v4808_v60 = vcombine.high %v1444_v42, %v1444_v42  ;;  %v6119_v42 = vld [vmem:[#allocation2 + $0x30] ss:$8 sps:$4 sm:$0xff]  }
 0x200   :  { %v4966_v61 = vcombine.low %v2729_v54, %v2733_v58  ;;  %v1577_v63 = vrot.slane %v4806_v62, 5  ;;  %v4809_v0 = vcombine.low %v1445_v53, %v1445_v53  ;;  %v4810_v45 = vcombine.high %v1445_v53, %v1445_v53  ;;  %v6915_v49 = vld [vmem:[#allocation2 + $0x30] sm:$0x1f]  ;;  %v6917_v54 = vld [vmem:[#allocation2 + $0x38] sm:$0x1f] }
 0x201   :  { %v1574_v4 = vsel %vm6690_vm11, %v4825_v55, %v1573_v22  ;;  %v4827_v24 = vrot.slane %v4807_v56, 9  ;;  %v1581_v25 = vrot.slane %v4808_v60, 5  ;;  %v4811_v34 = vcombine.low %v1446_v57, %v1446_v57  ;;  %v6125_v62 = vld [vmem:[#allocation8 + $0x1d0] sm:$0xff]  }
 0x202   :  { %5592 = vmatmul.mubr.bf16.gmra.mrb[12].mxu1 %v4966_v61  ;;  %v1578_v46 = vsel %vm6690_vm11, %v4826_v59, %v1577_v63  ;;  %v4828_v6 = vrot.slane %v4809_v0, 9  ;;  %v1585_v10 = vrot.slane %v4810_v45, 5  ;;  %v4812_v11 = vcombine.high %v1446_v57, %v1446_v57 }
 0x203   :  { %5608 = vmatpush3.bf16.msra.mxu1 %v6102_v39  ;;  %5611 = vmatprep.mubr.bf16.mxu1 %v6107_v3  ;;  %v4836_v8 = vcombine.low %v1574_v4, %v1578_v46  ;;  %v1582_v13 = vsel %vm6690_vm11, %v4827_v24, %v1581_v25  ;;  %v4813_v33 = vcombine.low %v1447_v2, %v1447_v2  ;;  %v4829_v16 = vrot.slane %v4811_v34, 9  ;;  %v6128_v3 = vld [vmem:[#allocation8 + $0x1d8] sm:$0xff]  }
 0x204   :  { %v1586_v14 = vsel %vm6690_vm11, %v4828_v6, %v1585_v10  ;;  %5609 = vmatprep.subr.bf16.mxu1 %v6116_v1  ;;  %v4814_v20 = vcombine.high %v1447_v2, %v1447_v2  ;;  %v1589_v26 = vrot.slane %v4812_v11, 5  ;;  %v400_v27 = vsel %vm6590_vm4, 0, %v399_v5  ;;  %v6127_v5 = vld [vmem:[#allocation2 + $0x60] ss:$8 sps:$4 sm:$0xff]  }
 0x205   :  { %5492 = vmatmul.mubr.bf16.gmra.mrb[24].mxu0 %v4836_v8  ;;  %v4837_v30 = vcombine.low %v1582_v13, %v1586_v14  ;;  %401 = vst [vmem:[#allocation2 + $0x48] sm:$0x1] %v400_v27  ;;  %v430_v28 = vsel %vm6590_vm4, 0, %v429_v7  ;;  %v4991_v9 = vcombine.low %v3185_v12, %v3185_v12  ;;  %v4830_v31 = vrot.slane %v4813_v33, 9  ;;  %v462_v8 = vld [vmem:[#allocation2 + $0x48] sm:$0x10] }
 0x206   :  { %v1593_v32 = vrot.slane %v4814_v20, 5  ;;  %431 = vst [vmem:[#allocation2 + $0x98] sm:$0x1] %v430_v28  ;;  %v4993_v35 = vcombine.low %v6897_v17, %v6897_v17  ;;  %v1590_v39 = vsel %vm6690_vm11, %v4829_v16, %v1589_v26  ;;  %v4995_v41 = vcombine.low %v6905_v29, %v6905_v29  ;;  %v6927_v14 = vld [vmem:[#allocation2 + $0x40] sm:$0x1f] }
 0x207   :  { %5495 = vmatprep.mubr.bf16.mxu0 %v4837_v30  ;;  %5610 = vmatpush3.bf16.msra.mxu1 %v6116_v1  ;;  %v3282_v36 = vshrl.u32 %v4991_v9, 16  ;;  %v3285_v37 = vshll.u32 %v4991_v9, 16  ;;  %v4992_v44 = vcombine.high %v3185_v12, %v3185_v12  ;;  %v4997_v53 = vcombine.low %v3188_v40, %v3188_v40 }
 0x208   :  { %5627 = vmatprep.subr.bf16.mxu1 %v6117_v18  ;;  %v1594_v43 = vsel %vm6690_vm11, %v4830_v31, %v1593_v32  ;;  %v3296_v47 = vshrl.u32 %v4993_v35, 16  ;;  %v3299_v48 = vshll.u32 %v4993_v35, 16  ;;  %v3310_v55 = vshrl.u32 %v4995_v41, 16 }
 0x209   :  { %v4838_v50 = vcombine.low %v1590_v39, %v1594_v43  ;;  %v3284_v51 = vrot.slane %v3282_v36, 4  ;;  %v3287_v52 = vrot.slane %v3285_v37, 5  ;;  %v3313_v56 = vshll.u32 %v4995_v41, 16  ;;  %v6130_v39 = vld [vmem:[#allocation2 + $0x70] ss:$8 sps:$4 sm:$0xff]  }
 0x20a   :  { %5612 = vmatmul.mubr.bf16.vlgmr.msra.gmra.mrb[0].mxu1 %v6118_v38  ;;  %v4994_v57 = vcombine.high %v6897_v17, %v6897_v17  ;;  %v4999_v58 = vcombine.low %v6915_v49, %v6915_v49  ;;  %v3298_v22 = vrot.slane %v3296_v47, 4  ;;  %v3301_v59 = vrot.slane %v3299_v48, 5  ;;  %v6937_v38 = vld [vmem:[#allocation2 + $0x60] sm:$0x1f] }
 0x20b   :  { %5628 = vmatpush3.bf16.msra.mxu1 %v6117_v18  ;;  %5615 = vmatprep.mubr.bf16.mxu1 %v6119_v42  ;;  %v3324_v60 = vshrl.u32 %v4997_v53, 16  ;;  %v5001_v61 = vcombine.low %v6917_v54, %v6917_v54  ;;  %v3288_v63 = vor.u32 %v3287_v52, %v3284_v51  ;;  %v3291_v0 = vshll.u32 %v4992_v44, 16  ;;  %v6129_v18 = vld [vmem:[#allocation8 + $0x1e0] sm:$0xff]  }
 0x20c   :  { %5629 = vmatprep.subr.bf16.mxu1 %v6124_v19  ;;  %v4996_v45 = vcombine.high %v6905_v29, %v6905_v29  ;;  %v3327_v1 = vshll.u32 %v4997_v53, 16  ;;  %v6126_v2 = vld [vmem:[#allocation2 + $0x40] ss:$8 sps:$4 sm:$0xff]   ;;  %v4998_v4 = vcombine.high %v3188_v40, %v3188_v40  ;;  %v3312_v24 = vrot.slane %v3310_v55, 4 }
 0x20d   :  { %5496 = vmatmul.mubr.bf16.gmra.mrb[28].mxu0 %v4838_v50  ;;  %v3315_v25 = vrot.slane %v3313_v56, 5  ;;  %v3326_v34 = vrot.slane %v3324_v60, 4  ;;  %v3338_v6 = vshrl.u32 %v4999_v58, 16  ;;  %v3302_v10 = vor.u32 %v3301_v59, %v3298_v22  ;;  %v6131_v50 = vld [vmem:[#allocation2 + $0x80] ss:$8 sps:$4 sm:$0xff]  }
 0x20e   :  { %v3329_v46 = vrot.slane %v3327_v1, 5  ;;  %v3305_v11 = vshll.u32 %v4994_v57, 16  ;;  %v3341_v7 = vshll.u32 %v4999_v58, 16  ;;  %v3352_v12 = vshrl.u32 %v5001_v61, 16 }
 0x20f   :  { %5630 = vmatpush3.bf16.msra.mxu1 %v6124_v19  ;;  %v3289_v13 = vrot.slane %v3288_v63, 4  ;;  %v3293_v33 = vrot.slane %v3291_v0, 5  ;;  %v3355_v17 = vshll.u32 %v5001_v61, 16  ;;  %v3316_v20 = vor.u32 %v3315_v25, %v3312_v24  ;;  %v6132_v19 = vld [vmem:[#allocation8 + $0x1e8] sm:$0xff]   ;;  %v6133_v61 = vld [vmem:[#allocation8 + $0x1f0] sm:$0xff]  }
 0x210   :  { %5631 = vmatprep.subr.bf16.mxu1 %v6125_v62  ;;  %v3330_v16 = vor.u32 %v3329_v46, %v3326_v34  ;;  %v3319_v26 = vshll.u32 %v4996_v45, 16  ;;  %v3333_v27 = vshll.u32 %v4998_v4, 16  ;;  %v5000_v30 = vcombine.high %v6915_v49, %v6915_v49  ;;  %v6943_v49 = vld [vmem:[#allocation2 + $0x68] sm:$0x1f] }
 0x211   :  { %v5002_v28 = vcombine.high %v6917_v54, %v6917_v54  ;;  %v3340_v9 = vrot.slane %v3338_v6, 4  ;;  %v3343_v29 = vrot.slane %v3341_v7, 5  ;;  %v463_v31 = vsel %vm6596_vm5, 0, %v462_v8  ;;  %v6966_v6 = vld [vmem:[#allocation2 + $0x70] sm:$0x1f] }
 0x212   :  { %5616 = vmatmul.mubr.bf16.gmra.mrb[4].mxu1 %v6126_v2  ;;  %v3303_v32 = vrot.slane %v3302_v10, 4  ;;  %v3354_v35 = vrot.slane %v3352_v12, 4  ;;  %v3357_v36 = vrot.slane %v3355_v17, 5  ;;  %464 = vst [vmem:[#allocation2 + $0x48] sm:$0x10] %v463_v31  ;;  %v5003_v37 = vcombine.low %v6927_v14, %v6927_v14 }
 0x213   :  { %5632 = vmatpush3.bf16.msra.mxu1 %v6125_v62  ;;  %5619 = vmatprep.mubr.bf16.mxu1 %v6127_v5  ;;  %v6941_v40 = vsel %vm6685_vm10, %v3289_v13, %v3293_v33  ;;  %v3307_v41 = vrot.slane %v3305_v11, 5  ;;  %v3331_v42 = vrot.slane %v3330_v16, 4  ;;  %v3317_v43 = vrot.slane %v3316_v20, 4  ;;  %v6968_v10 = vld [vmem:[#allocation2 + $0x78] sm:$0x1f] }
 0x214   :  { %5633 = vmatprep.subr.bf16.mxu1 %v6128_v3  ;;  %v3347_v44 = vshll.u32 %v5000_v30, 16  ;;  %v3366_v47 = vshrl.u32 %v5003_v37, 16  ;;  %v3369_v48 = vshll.u32 %v5003_v37, 16  ;;  %v3335_v51 = vrot.slane %v3333_v27, 5  ;;  %v6134_v13 = vld [vmem:[#allocation2 + $0x90] ss:$8 sps:$4 sm:$0xff]  }
 0x215   :  { %v3344_v52 = vor.u32 %v3343_v29, %v3340_v9  ;;  %v3361_v53 = vshll.u32 %v5002_v28, 16  ;;  %v5007_v54 = vcombine.low %v6937_v38, %v6937_v38  ;;  %v3308_v62 = vsel %vm6685_vm10, %v3303_v32, %v3307_v41  ;;  %v6139_v33 = vld [vmem:[#allocation8 + $0x1f8] sm:$0xff]  }
 0x216   :  { %v3321_v55 = vrot.slane %v3319_v26, 5  ;;  %v3358_v56 = vor.u32 %v3357_v36, %v3354_v35  ;;  %v5004_v57 = vcombine.high %v6927_v14, %v6927_v14  ;;  %v6953_v58 = vsel %vm6685_vm10, %v3331_v42, %v3335_v51  ;;  %v3197_v42 = vld [vmem:[#allocation2 + $0x80] sm:$0x1f] }
 0x217   :  { %5634 = vmatpush3.bf16.msra.mxu1 %v6128_v3  ;;  %v3368_v22 = vrot.slane %v3366_v47, 4  ;;  %v3371_v59 = vrot.slane %v3369_v48, 5  ;;  %v5009_v60 = vcombine.low %v6943_v49, %v6943_v49  ;;  %v5023_v63 = vcombine.low %v6941_v40, %v3308_v62 }
 0x218   :  { %5635 = vmatprep.subr.bf16.mxu1 %v6129_v18  ;;  %v6960_v0 = vsel %vm6685_vm10, %v3317_v43, %v3321_v55  ;;  %v3349_v45 = vrot.slane %v3347_v44, 5  ;;  %v3345_v1 = vrot.slane %v3344_v52, 4  ;;  %v3363_v2 = vrot.slane %v3361_v53, 5 }
 0x219   :  { %v3192_v3 = vld [vmem:[#allocation2 + $0x48] sm:$0x1f]  ;;  %v5008_v4 = vcombine.high %v6937_v38, %v6937_v38  ;;  %v3394_v24 = vshrl.u32 %v5007_v54, 16  ;;  %v5024_v25 = vcombine.low %v6960_v0, %v6953_v58  ;;  %v3359_v34 = vrot.slane %v3358_v56, 4  ;;  %v6140_v38 = vld [vmem:[#allocation8 + $0x200] sm:$0xff]  }
 0x21a   :  { %5620 = vmatmul.mubr.bf16.gmra.mrb[8].mxu1 %v6130_v39  ;;  %v5005_v5 = vcombine.low %v3192_v3, %v3192_v3  ;;  %v3397_v46 = vshll.u32 %v5007_v54, 16  ;;  %v3372_v11 = vor.u32 %v3371_v59, %v3368_v22  ;;  %v3375_v7 = vshll.u32 %v5004_v57, 16  ;;  %v6149_v57 = vld [vmem:[#allocation8 + $0x208] sm:$0xff]  }
 0x21b   :  { %5636 = vmatpush3.bf16.msra.mxu1 %v6129_v18  ;;  %5623 = vmatprep.mubr.bf16.mxu1 %v6131_v50  ;;  %v3408_v12 = vshrl.u32 %v5009_v60, 16  ;;  %v3411_v8 = vshll.u32 %v5009_v60, 16  ;;  %v5006_v16 = vcombine.high %v3192_v3, %v3192_v3  ;;  %v5010_v18 = vcombine.high %v6943_v49, %v6943_v49  ;;  %v3198_v49 = vld [vmem:[#allocation2 + $0x88] sm:$0x1f] }
 0x21c   :  { %5637 = vmatprep.subr.bf16.mxu1 %v6132_v19  ;;  %v3380_v17 = vshrl.u32 %v5005_v5, 16  ;;  %v3383_v14 = vshll.u32 %v5005_v5, 16  ;;  %v3350_v20 = vsel %vm6685_vm10, %v3345_v1, %v3349_v45  ;;  %v3396_v26 = vrot.slane %v3394_v24, 4  ;;  %v492_v5 = vld [vmem:[#allocation2 + $0x98] sm:$0x10] }
 0x21d   :  { %v5011_v27 = vcombine.low %v6966_v6, %v6966_v6  ;;  %v5013_v30 = vcombine.low %v6968_v10, %v6968_v10  ;;  %v3399_v29 = vrot.slane %v3397_v46, 5  ;;  %v6978_v31 = vshll.u32 %v5008_v4, 16 }
 0x21e   :  { %v3382_v28 = vrot.slane %v3380_v17, 4  ;;  %v3385_v9 = vrot.slane %v3383_v14, 5  ;;  %v3364_v32 = vsel %vm6685_vm10, %v3359_v34, %v3363_v2  ;;  %v3373_v35 = vrot.slane %v3372_v11, 4 }
 0x21f   :  { %5638 = vmatpush3.bf16.msra.mxu1 %v6132_v19  ;;  %v3410_v36 = vrot.slane %v3408_v12, 4  ;;  %v3413_v37 = vrot.slane %v3411_v8, 5  ;;  %v3389_v19 = vshll.u32 %v5006_v16, 16  ;;  %v3436_v40 = vshrl.u32 %v5013_v30, 16  ;;  %v3199_v12 = vld [vmem:[#allocation2 + $0x90] sm:$0x1f] }
 0x220   :  { %5639 = vmatprep.subr.bf16.mxu1 %v6133_v61  ;;  %v3386_v39 = vor.u32 %v3385_v9, %v3382_v28  ;;  %v3439_v41 = vshll.u32 %v5013_v30, 16  ;;  %v5025_v43 = vcombine.low %v3350_v20, %v3364_v32  ;;  %v3377_v44 = vrot.slane %v3375_v7, 5  ;;  %v6150_v8 = vld [vmem:[#allocation8 + $0x210] sm:$0xff]  }
 0x221   :  { %v3422_v47 = vshrl.u32 %v5011_v27, 16  ;;  %v3425_v48 = vshll.u32 %v5011_v27, 16  ;;  %v3400_v50 = vor.u32 %v3399_v29, %v3396_v26  ;;  %v3405_v51 = vrot.slane %v6978_v31, 5  ;;  %v6159_v29 = vld [vmem:[#allocation8 + $0x218] sm:$0xff]  }
 0x222   :  { %5624 = vmatmul.mubr.bf16.gmra.mrb[12].mxu1 %v6134_v13  ;;  %v3417_v52 = vshll.u32 %v5010_v18, 16  ;;  %v5012_v53 = vcombine.high %v6966_v6, %v6966_v6  ;;  %v3414_v54 = vor.u32 %v3413_v37, %v3410_v36  ;;  %v3438_v62 = vrot.slane %v3436_v40, 4 }
 0x223   :  { %5640 = vmatpush3.bf16.msra.mxu1 %v6133_v61  ;;  %5643 = vmatprep.mubr.bf16.mxu1 %v5023_v63  ;;  %v3441_v55 = vrot.slane %v3439_v41, 5  ;;  %v5015_v56 = vcombine.low %v3197_v42, %v3197_v42  ;;  %v3378_v22 = vsel %vm6685_vm10, %v3373_v35, %v3377_v44  ;;  %v3387_v59 = vrot.slane %v3386_v39, 4 }
 0x224   :  { %5641 = vmatprep.subr.bf16.mxu1 %v6139_v33  ;;  %v3391_v60 = vrot.slane %v3389_v19, 5  ;;  %v5017_v61 = vcombine.low %v3198_v49, %v3198_v49  ;;  %v3424_v63 = vrot.slane %v3422_v47, 4  ;;  %v3427_v45 = vrot.slane %v3425_v48, 5  ;;  %v6160_v47 = vld [vmem:[#allocation8 + $0x220] sm:$0xff]  }
 0x225   :  { %v3450_v1 = vshrl.u32 %v5015_v56, 16  ;;  %v3453_v2 = vshll.u32 %v5015_v56, 16  ;;  %v3401_v3 = vrot.slane %v3400_v50, 4  ;;  %v5014_v4 = vcombine.high %v6968_v10, %v6968_v10 }
 0x226   :  { %v3464_v24 = vshrl.u32 %v5017_v61, 16  ;;  %v3467_v34 = vshll.u32 %v5017_v61, 16  ;;  %v3415_v46 = vrot.slane %v3414_v54, 4  ;;  %v3442_v6 = vor.u32 %v3441_v55, %v3438_v62 }
 0x227   :  { %5642 = vmatpush3.bf16.msra.mxu1 %v6139_v33  ;;  %v3452_v11 = vrot.slane %v3450_v1, 4  ;;  %v3455_v7 = vrot.slane %v3453_v2, 5  ;;  %v3392_v58 = vsel %vm6685_vm10, %v3387_v59, %v3391_v60  ;;  %v5016_v0 = vcombine.high %v3197_v42, %v3197_v42  ;;  %v3714_v42 = vld [vmem:[#allocation2 + $0x10] sm:$0x1e]  ;;  %v6169_v2 = vld [vmem:[#allocation8 + $0x228] sm:$0xff]  }
 0x228   :  { %5659 = vmatprep.subr.bf16.mxu1 %v6140_v38  ;;  %v3469_v13 = vrot.slane %v3467_v34, 5  ;;  %v3419_v33 = vrot.slane %v3417_v52, 5  ;;  %v3428_v10 = vor.u32 %v3427_v45, %v3424_v63  ;;  %v5018_v16 = vcombine.high %v3198_v49, %v3198_v49 }
 0x229   :  { %v493_v17 = vsel %vm6596_vm5, 0, %v492_v5  ;;  %v3406_v14 = vsel %vm6685_vm10, %v3401_v3, %v3405_v51  ;;  %v3445_v18 = vshll.u32 %v5014_v4, 16  ;;  %v3456_v20 = vor.u32 %v3455_v7, %v3452_v11  ;;  %v3715_v51 = vld [vmem:[#allocation2 + $0x18] sm:$0x1e] }
 0x22a   :  { %5644 = vmatmul.mubr.bf16.vlgmr.msra.gmra.mrb[0].mxu1 %v5024_v25  ;;  %v3466_v25 = vrot.slane %v3464_v24, 4  ;;  %494 = vst [vmem:[#allocation2 + $0x98] sm:$0x10] %v493_v17  ;;  %v5019_v26 = vcombine.low %v3199_v12, %v3199_v12  ;;  %v5026_v27 = vcombine.low %v3378_v22, %v3392_v58  ;;  %v3420_v30 = vsel %vm6685_vm10, %v3415_v46, %v3419_v33  ;;  %v3717_v46 = vld [vmem:[#allocation2 + $0x28] sm:$0x1e] }
 0x22b   :  { %5660 = vmatpush3.bf16.msra.mxu1 %v6140_v38  ;;  %5647 = vmatprep.mubr.bf16.mxu1 %v5025_v43  ;;  %v3431_v28 = vshll.u32 %v5012_v53, 16  ;;  %v3443_v9 = vrot.slane %v3442_v6, 4  ;;  %v3459_v31 = vshll.u32 %v5016_v0, 16  ;;  %v5027_v36 = vcombine.low %v3406_v14, %v3420_v30  ;;  %v3718_v17 = vld [vmem:[#allocation2 + $0x30] sm:$0x1e] }
 0x22c   :  { %5661 = vmatprep.subr.bf16.mxu1 %v6149_v57  ;;  %v3470_v32 = vor.u32 %v3469_v13, %v3466_v25  ;;  %v3478_v23 = vshrl.u32 %v5019_v26, 16  ;;  %v3481_v35 = vshll.u32 %v5019_v26, 16  ;;  %v3429_v37 = vrot.slane %v3428_v10, 4  ;;  %v3716_v10 = vld [vmem:[#allocation2 + $0x20] sm:$0x1e] }
 0x22d   :  { %v3473_v38 = vshll.u32 %v5018_v16, 16  ;;  %v3447_v39 = vrot.slane %v3445_v18, 5  ;;  %v3457_v19 = vrot.slane %v3456_v20, 4  ;;  %v3433_v43 = vrot.slane %v3431_v28, 5 }
 0x22e   :  { %v3480_v40 = vrot.slane %v3478_v23, 4  ;;  %v3483_v41 = vrot.slane %v3481_v35, 5  ;;  %v5020_v44 = vcombine.high %v3199_v12, %v3199_v12  ;;  %v3461_v49 = vrot.slane %v3459_v31, 5 }
 0x22f   :  { %5662 = vmatpush3.bf16.msra.mxu1 %v6149_v57  ;;  %v3448_v48 = vsel %vm6685_vm10, %v3443_v9, %v3447_v39  ;;  %v3471_v50 = vrot.slane %v3470_v32, 4  ;;  %v3434_v52 = vsel %vm6685_vm10, %v3429_v37, %v3433_v43  ;;  %v3475_v53 = vrot.slane %v3473_v38, 5 }
 0x230   :  { %5663 = vmatprep.subr.bf16.mxu1 %v6150_v8  ;;  %v5039_v62 = vcombine.low %v3714_v42, %v3714_v42  ;;  %v5040_v55 = vcombine.high %v3714_v42, %v3714_v42  ;;  %v3462_v56 = vsel %vm6685_vm10, %v3457_v19, %v3461_v49  ;;  %v3484_v59 = vor.u32 %v3483_v41, %v3480_v40  ;;  %v3720_v40 = vld [vmem:[#allocation2 + $0x40] sm:$0x1e] }
 0x231   :  { %v3200_v54 = vld [vmem:[#allocation2 + $0x98] sm:$0x1f]  ;;  %v5028_v60 = vcombine.low %v3434_v52, %v3448_v48  ;;  %v3487_v61 = vshll.u32 %v5020_v44, 16  ;;  %v5041_v63 = vcombine.low %v3715_v51, %v3715_v51  ;;  %v5042_v45 = vcombine.high %v3715_v51, %v3715_v51 }
 0x232   :  { %5648 = vmatmul.mubr.bf16.gmra.mrb[4].mxu1 %v5026_v27  ;;  %v5021_v57 = vcombine.low %v3200_v54, %v3200_v54  ;;  %v5022_v22 = vcombine.high %v3200_v54, %v3200_v54  ;;  %v3476_v1 = vsel %vm6685_vm10, %v3471_v50, %v3475_v53  ;;  %v5071_v5 = vrot.slane %v5039_v62, 9  ;;  %v3719_v27 = vld [vmem:[#allocation2 + $0x38] sm:$0x1e]  ;;  %v3723_v62 = vld [vmem:[#allocation2 + $0x68] sm:$0x1e] }
 0x233   :  { %5664 = vmatpush3.bf16.msra.mxu1 %v6150_v8  ;;  %5651 = vmatprep.mubr.bf16.mxu1 %v5027_v36  ;;  %v5029_v34 = vcombine.low %v3462_v56, %v3476_v1  ;;  %v3485_v6 = vrot.slane %v3484_v59, 4  ;;  %v3812_v12 = vrot.slane %v5040_v55, 5  ;;  %v6170_v8 = vld [vmem:[#allocation8 + $0x230] sm:$0xff]   ;;  %v3489_v58 = vrot.slane %v3487_v61, 5  ;;  %v6179_v36 = vld [vmem:[#allocation8 + $0x238] sm:$0xff]  }
 0x234   :  { %5665 = vmatprep.subr.bf16.mxu1 %v6159_v29  ;;  %v3492_v3 = vshrl.u32 %v5021_v57, 16  ;;  %v3495_v4 = vshll.u32 %v5021_v57, 16  ;;  %v3501_v24 = vshll.u32 %v5022_v22, 16  ;;  %v5072_v0 = vrot.slane %v5041_v63, 9 }
 0x235   :  { %v3816_v33 = vrot.slane %v5042_v45, 5  ;;  %v5045_v16 = vcombine.low %v3717_v46, %v3717_v46  ;;  %v5046_v14 = vcombine.high %v3717_v46, %v3717_v46  ;;  %v3490_v18 = vsel %vm6685_vm10, %v3485_v6, %v3489_v58  ;;  %v3726_v46 = vld [vmem:[#allocation2 + $0x80] sm:$0x1e] }
 0x236   :  { %v3494_v11 = vrot.slane %v3492_v3, 4  ;;  %v3497_v7 = vrot.slane %v3495_v4, 5  ;;  %v3503_v13 = vrot.slane %v3501_v24, 5  ;;  %v3813_v26 = vsel %vm6690_vm11, %v5071_v5, %v3812_v12  ;;  %v3725_v5 = vld [vmem:[#allocation2 + $0x78] sm:$0x1e] }
 0x237   :  { %5666 = vmatpush3.bf16.msra.mxu1 %v6159_v29  ;;  %v5043_v30 = vcombine.low %v3716_v10, %v3716_v10  ;;  %v5044_v28 = vcombine.high %v3716_v10, %v3716_v10  ;;  %v5047_v9 = vcombine.low %v3718_v17, %v3718_v17  ;;  %v5048_v29 = vcombine.high %v3718_v17, %v3718_v17 }
 0x238   :  { %5667 = vmatprep.subr.bf16.mxu1 %v6160_v47  ;;  %v3498_v25 = vor.u32 %v3497_v7, %v3494_v11  ;;  %v3817_v32 = vsel %vm6690_vm11, %v5072_v0, %v3816_v33  ;;  %v5074_v23 = vrot.slane %v5045_v16, 9  ;;  %v3824_v37 = vrot.slane %v5046_v14, 5  ;;  %v3724_v7 = vld [vmem:[#allocation2 + $0x70] sm:$0x1e] }
 0x239   :  { %v5049_v38 = vcombine.low %v3719_v27, %v3719_v27  ;;  %v5050_v39 = vcombine.high %v3719_v27, %v3719_v27  ;;  %v5087_v19 = vcombine.low %v3813_v26, %v3817_v32  ;;  %v5073_v41 = vrot.slane %v5043_v30, 9  ;;  %v3729_v32 = vld [vmem:[#allocation2 + $0x98] sm:$0x1e] }
 0x23a   :  { %5652 = vmatmul.mubr.bf16.gmra.mrb[8].mxu1 %v5028_v60  ;;  %v3499_v20 = vrot.slane %v3498_v25, 4  ;;  %v3820_v42 = vrot.slane %v5044_v28, 5  ;;  %v5075_v43 = vrot.slane %v5047_v9, 9  ;;  %v3828_v44 = vrot.slane %v5048_v29, 5  ;;  %v3727_v25 = vld [vmem:[#allocation2 + $0x88] sm:$0x1e] }
 0x23b   :  { %5668 = vmatpush3.bf16.msra.mxu1 %v6160_v47  ;;  %5655 = vmatprep.mubr.bf16.mxu1 %v5029_v34  ;;  %v3721_v47 = vld [vmem:[#allocation2 + $0x48] sm:$0x1e]  ;;  %v3825_v48 = vsel %vm6690_vm11, %v5074_v23, %v3824_v37  ;;  %v5076_v49 = vrot.slane %v5049_v38, 9  ;;  %v3832_v50 = vrot.slane %v5050_v39, 5  ;;  %v5051_v51 = vcombine.low %v3720_v40, %v3720_v40  ;;  %v3728_v9 = vld [vmem:[#allocation2 + $0x90] sm:$0x1e] }
 0x23c   :  { %5669 = vmatprep.subr.bf16.mxu1 %v6169_v2  ;;  %v3504_v31 = vsel %vm6685_vm10, %v3499_v20, %v3503_v13  ;;  %v5052_v52 = vcombine.high %v3720_v40, %v3720_v40  ;;  %v5053_v53 = vcombine.low %v3721_v47, %v3721_v47  ;;  %v5054_v54 = vcombine.high %v3721_v47, %v3721_v47 }
 0x23d   :  { %v5030_v35 = vcombine.low %v3490_v18, %v3504_v31  ;;  %v3821_v55 = vsel %vm6690_vm11, %v5073_v41, %v3820_v42  ;;  %v3829_v56 = vsel %vm6690_vm11, %v5075_v43, %v3828_v44  ;;  %v5055_v57 = vcombine.low %v3722_v15, %v3722_v15 }
 0x23e   :  { %v5056_v22 = vcombine.high %v3722_v15, %v3722_v15  ;;  %v5088_v59 = vcombine.low %v3821_v55, %v3825_v48  ;;  %v3833_v60 = vsel %vm6690_vm11, %v5076_v49, %v3832_v50  ;;  %v5077_v61 = vrot.slane %v5051_v51, 9  ;;  %v6209_v55 = vld [vmem:[#allocation9 + $0x8] sm:$0xff]  }
 0x23f   :  { %5670 = vmatpush3.bf16.msra.mxu1 %v6169_v2  ;;  %v5057_v63 = vcombine.low %v3723_v62, %v3723_v62  ;;  %v5058_v45 = vcombine.high %v3723_v62, %v3723_v62  ;;  %v5089_v1 = vcombine.low %v3829_v56, %v3833_v60  ;;  %v3836_v2 = vrot.slane %v5052_v52, 5  ;;  %v6208_v62 = vld [vmem:[#allocation9] sm:$0xff]   ;;  %v6210_v56 = vld [vmem:[#allocation9 + $0x10] sm:$0xff]   ;;  %v6215_v60 = vld [vmem:[#allocation9 + $0x38] sm:$0xff]  }
 0x240   :  { %5671 = vmatprep.subr.bf16.mxu1 %v6170_v8  ;;  %v5078_v3 = vrot.slane %v5053_v53, 9  ;;  %v3840_v4 = vrot.slane %v5054_v54, 5  ;;  %v5079_v24 = vrot.slane %v5055_v57, 9  ;;  %v3844_v34 = vrot.slane %v5056_v22, 5  ;;  %5691 = vmatprep.subr.bf16.mxu0 %v6208_v62  ;;  %v6211_v57 = vld [vmem:[#allocation9 + $0x18] sm:$0xff]   ;;  %v6212_v22 = vld [vmem:[#allocation9 + $0x20] sm:$0xff]  }
 0x241   :  { %v5080_v6 = vrot.slane %v5057_v63, 9  ;;  %v3848_v11 = vrot.slane %v5058_v45, 5  ;;  %v3837_v12 = vsel %vm6690_vm11, %v5077_v61, %v3836_v2  ;;  %v5061_v58 = vcombine.low %v3725_v5, %v3725_v5  ;;  %5692 = vmatpush3.bf16.msra.mxu0 %v6208_v62 }
 0x242   :  { %5656 = vmatmul.mubr.bf16.gmra.mrb[12].mxu1 %v5030_v35  ;;  %v5062_v0 = vcombine.high %v3725_v5, %v3725_v5  ;;  %v3845_v13 = vsel %vm6690_vm11, %v5079_v24, %v3844_v34  ;;  %v5063_v33 = vcombine.low %v3726_v46, %v3726_v46  ;;  %v5064_v10 = vcombine.high %v3726_v46, %v3726_v46 }
 0x243   :  { %5672 = vmatpush3.bf16.msra.mxu1 %v6170_v8  ;;  %5675 = vmatprep.mubr.bf16.mxu1 %v5087_v19  ;;  %v3841_v8 = vsel %vm6690_vm11, %v5078_v3, %v3840_v4  ;;  %v5059_v16 = vcombine.low %v3724_v7, %v3724_v7  ;;  %v5060_v17 = vcombine.high %v3724_v7, %v3724_v7  ;;  %v5082_v30 = vrot.slane %v5061_v58, 9 }
 0x244   :  { %5673 = vmatprep.subr.bf16.mxu1 %v6179_v36  ;;  %v5090_v14 = vcombine.low %v3837_v12, %v3841_v8  ;;  %v3849_v18 = vsel %vm6690_vm11, %v5080_v6, %v3848_v11  ;;  %v5065_v20 = vcombine.low %v3727_v25, %v3727_v25  ;;  %v5066_v26 = vcombine.high %v3727_v25, %v3727_v25 }
 0x245   :  { %v5091_v27 = vcombine.low %v3845_v13, %v3849_v18  ;;  %v3856_v28 = vrot.slane %v5062_v0, 5  ;;  %v5083_v29 = vrot.slane %v5063_v33, 9  ;;  %v3860_v31 = vrot.slane %v5064_v10, 5  ;;  %5693 = vmatprep.subr.bf16.mxu0 %v6209_v55  ;;  %v7053_v0 = vld [vmem:[%s7180_s4] ss:$0 sm:$0xff] }
 0x246   :  { %v5081_v23 = vrot.slane %v5059_v16, 9  ;;  %v3852_v35 = vrot.slane %v5060_v17, 5  ;;  %v3864_v37 = vrot.slane %v5066_v26, 5  ;;  %v5067_v38 = vcombine.low %v3728_v9, %v3728_v9  ;;  %5694 = vmatpush3.bf16.msra.mxu0 %v6209_v55 }
 0x247   :  { %5674 = vmatpush3.bf16.msra.mxu1 %v6179_v36  ;;  %v5084_v36 = vrot.slane %v5065_v20, 9  ;;  %v3857_v39 = vsel %vm6690_vm11, %v5082_v30, %v3856_v28  ;;  %v5068_v19 = vcombine.high %v3728_v9, %v3728_v9  ;;  %v5069_v40 = vcombine.low %v3729_v32, %v3729_v32  ;;  %5695 = vmatprep.subr.bf16.mxu0 %v6210_v56 }
 0x248   :  { %v5070_v41 = vcombine.high %v3729_v32, %v3729_v32  ;;  %v3861_v42 = vsel %vm6690_vm11, %v5083_v29, %v3860_v31  ;;  %v3853_v43 = vsel %vm6690_vm11, %v5081_v23, %v3852_v35  ;;  %v5085_v15 = vrot.slane %v5067_v38, 9 }
 0x249   :  { %v5092_v44 = vcombine.low %v3853_v43, %v3857_v39  ;;  %v3865_v47 = vsel %vm6690_vm11, %v5084_v36, %v3864_v37  ;;  %v3868_v49 = vrot.slane %v5068_v19, 5  ;;  %v5086_v50 = vrot.slane %v5069_v40, 9 }
 0x24a   :  { %5676 = vmatmul.mubr.bf16.vlgmr.msra.gmra.mrb[0].mxu1 %v5088_v59  ;;  %v5093_v48 = vcombine.low %v3861_v42, %v3865_v47  ;;  %v3872_v51 = vrot.slane %v5070_v41, 5  ;;  %5696 = vmatpush3.bf16.msra.mxu0 %v6210_v56  ;;  %v6213_v59 = vld [vmem:[#allocation9 + $0x28] sm:$0xff]  }
 0x24b   :  { %5679 = vmatprep.mubr.bf16.mxu1 %v5089_v1  ;;  %v3869_v52 = vsel %vm6690_vm11, %v5085_v15, %v3868_v49  ;;  %5697 = vmatprep.subr.bf16.mxu0 %v6211_v57 }
 0x24c   :  { %v3873_v53 = vsel %vm6690_vm11, %v5086_v50, %v3872_v51 }
 0x24d   :  { %v5094_v54 = vcombine.low %v3869_v52, %v3873_v53 }
 0x24e   :  { %5698 = vmatpush3.bf16.msra.mxu0 %v6211_v57 }
 0x24f   :  { %5699 = vmatprep.subr.bf16.mxu0 %v6212_v22 }
 0x252   :  { %5680 = vmatmul.mubr.bf16.gmra.mrb[4].mxu1 %v5090_v14  ;;  %5700 = vmatpush3.bf16.msra.mxu0 %v6212_v22 }
 0x253   :  { %5683 = vmatprep.mubr.bf16.mxu1 %v5091_v27  ;;  %5701 = vmatprep.subr.bf16.mxu0 %v6213_v59 }
 0x256   :  { %5702 = vmatpush3.bf16.msra.mxu0 %v6213_v59 }
 0x257   :  { %5703 = vmatprep.subr.bf16.mxu0 %v6214_v21 }
 0x25a   :  { %5684 = vmatmul.mubr.bf16.gmra.mrb[8].mxu1 %v5092_v44  ;;  %5704 = vmatpush3.bf16.msra.mxu0 %v6214_v21 }
 0x25b   :  { %5687 = vmatprep.mubr.bf16.mxu1 %v5093_v48  ;;  %5705 = vmatprep.subr.bf16.mxu0 %v6215_v60 }
 0x25e   :  { %5706 = vmatpush3.bf16.msra.mxu0 %v6215_v60 }
 0x262   :  { %5688 = vmatmul.mubr.bf16.gmra.mrb[12].mxu1 %v5094_v54 }
 0x2c4   :  { %v5485_v61 = vpop.f32.mrb[16].mxu0 }
 0x2c5   :  { %v1725_v63 = vpop.f32.mrb[17].mxu0 }
 0x2c6   :  { %v5486_v45 = vpop.f32.mrb[18].mxu0 }
 0x2c7   :  { %v1728_v1 = vpop.f32.mrb[19].mxu0 }
 0x2d0   :  { %v5489_v2 = vpop.f32.mrb[20].mxu0 }
 0x2d1   :  { %v1741_v3 = vpop.f32.mrb[21].mxu0 }
 0x2d2   :  { %v5490_v4 = vpop.f32.mrb[22].mxu0 }
 0x2d3   :  { %v1744_v24 = vpop.f32.mrb[23].mxu0 }
 0x2d8   :  { %v5493_v34 = vpop.f32.mrb[24].mxu0 }
 0x2d9   :  { %v1757_v5 = vpop.f32.mrb[25].mxu0 }
 0x2da   :  { %v5494_v46 = vpop.f32.mrb[26].mxu0 }
 0x2db   :  { %v1760_v6 = vpop.f32.mrb[27].mxu0 }
 0x2e0   :  { %v5497_v11 = vpop.f32.mrb[28].mxu0 }
 0x2e1   :  { %v7044_v7 = vpop.f32.mrb[29].mxu0 }
 0x2e2   :  { %v7046_v12 = vpop.f32.mrb[30].mxu0 }
 0x2e3   :  { %v7048_v8 = vpop.f32.mrb[31].mxu0 }
 0x31d   :  { %v5677_v58 = vpop.f32.mrb[0].mxu1 }
 0x31e   :  { %v5763_v25 = vadd.f32 %v5677_v58, %v5485_v61  ;;  %v4004_v13 = vpop.f32.mrb[1].mxu1 }
 0x31f   :  { %v5764_v33 = vadd.f32 %v4004_v13, %v1725_v63  ;;  %v5678_v10 = vpop.f32.mrb[2].mxu1 }
 0x320   :  { %v4092_v16 = vadd.f32 %v5763_v25, %v7053_v0  ;;  %v5765_v17 = vadd.f32 %v5678_v10, %v5486_v45  ;;  %v4007_v14 = vpop.f32.mrb[3].mxu1 }
 0x321   :  { %v4090_v18 = vadd.f32 %v5764_v33, %v7053_v0  ;;  %v5766_v20 = vadd.f32 %v4007_v14, %v1728_v1 }
 0x322   :  { %v4093_v26 = vadd.f32 %v5765_v17, %v7053_v0  ;;  %v4108_v30 = vmax.f32 %v4092_v16, 0.0 }
 0x323   :  { %v4091_v27 = vadd.f32 %v5766_v20, %v7053_v0  ;;  %v4106_v9 = vmax.f32 %v4090_v18, 0.0 }
 0x324   :  { %v4109_v28 = vmax.f32 %v4093_v26, 0.0 }
 0x325   :  { %v4107_v29 = vmax.f32 %v4091_v27, 0.0  ;;  %v5681_v31 = vpop.f32.mrb[4].mxu1  ;;  %v6425_v27 = vmov 0.0  }
 0x326   :  { %v4123_v32 = vpack.c.bf16 %v4109_v28, %v4108_v30  ;;  %v5767_v23 = vadd.f32 %v5681_v31, %v5489_v2  ;;  %v4020_v35 = vpop.f32.mrb[5].mxu1  ;;  %5723 = vmatprep.subr.bf16.mxu0 %v6425_v27  ;;  %v6219_v30 = vld [vmem:[#allocation11 + $0x18] sm:$0xff]   ;;  %v6220_v28 = vld [vmem:[#allocation11 + $0x20] sm:$0xff]  }
 0x327   :  { %v5768_v36 = vadd.f32 %v4020_v35, %v1741_v3  ;;  %v5682_v37 = vpop.f32.mrb[6].mxu1  ;;  %v4122_v38 = vpack.c.bf16 %v4107_v29, %v4106_v9  ;;  %v6221_v9 = vld [vmem:[#allocation11 + $0x28] sm:$0xff]   ;;  %v6222_v29 = vld [vmem:[#allocation11 + $0x30] sm:$0xff]   ;;  %v6223_v31 = vld [vmem:[#allocation11 + $0x38] sm:$0xff]  }
 0x328   :  { %v4096_v39 = vadd.f32 %v5767_v23, %v7053_v0  ;;  %v5769_v19 = vadd.f32 %v5682_v37, %v5490_v4  ;;  %v4023_v40 = vpop.f32.mrb[7].mxu1  ;;  %v5104_v23 = vld [vmem:[%s7182_s6] ss:$0 sm:$0xff]  ;;  %s6428_s6 = smov [#allocation14]  }
 0x329   :  { %v4094_v41 = vadd.f32 %v5768_v36, %v7053_v0  ;;  %v5770_v42 = vadd.f32 %v4023_v40, %v1744_v24  ;;  %5707 = vmatprep.mubr.bf16.mxu0 %v4122_v38  ;;  %s4687_s20 = sshll.u32 %s6428_s6, 4  ;;  %s4688_s20 = int_to_ptr.vmem [resolvable:$true] %s4687_s20 }
 0x32a   :  { %v4097_v43 = vadd.f32 %v5769_v19, %v7053_v0  ;;  %5708 = vmatmul.mubr.bf16.vlgmr.msra.gmra.mrb[32].mxu0 %v4123_v32  ;;  %v4112_v47 = vmax.f32 %v4096_v39, 0.0  ;;  %s6384_s23 = scalar_lea.vmem %s4688_s20, 1024  ;;  %p6389_p7 = scmp.lt.s32.totalorder %s4688_s20, %s4688_s20 }
 0x32b   :  { %v4095_v44 = vadd.f32 %v5770_v42, %v7053_v0  ;;  %v4110_v48 = vmax.f32 %v4094_v41, 0.0  ;;  %p6385_p6 = scmp.ne.s32.totalorder %s4688_s20, %s6384_s23  ;;  %p6390_p8 = scmp.lt.s32.totalorder %s6384_s23, %s6384_s23 }
 0x32c   :  { %v4113_v15 = vmax.f32 %v4097_v43, 0.0 }
 0x32d   :  { %v4111_v49 = vmax.f32 %v4095_v44, 0.0  ;;  %v5685_v50 = vpop.f32.mrb[8].mxu1  ;;  %p6391_p9 = por %p6390_p8, %p6389_p7 }
 0x32e   :  { %v5771_v51 = vadd.f32 %v5685_v50, %v5493_v34  ;;  %v4036_v52 = vpop.f32.mrb[9].mxu1  ;;  %v4125_v53 = vpack.c.bf16 %v4113_v15, %v4112_v47 }
 0x32f   :  { %v5772_v54 = vadd.f32 %v4036_v52, %v1757_v5  ;;  %v5686_v62 = vpop.f32.mrb[10].mxu1  ;;  %v4124_v55 = vpack.c.bf16 %v4111_v49, %v4110_v48  ;;  %p6392_p10 = pnand %p6391_p9, %p6385_p6 }
 0x330   :  { %v4100_v56 = vadd.f32 %v5771_v51, %v7053_v0  ;;  %v5773_v57 = vadd.f32 %v5686_v62, %v5494_v46  ;;  %v4039_v22 = vpop.f32.mrb[11].mxu1 }
 0x331   :  { %v4098_v59 = vadd.f32 %v5772_v54, %v7053_v0  ;;  %v5774_v21 = vadd.f32 %v4039_v22, %v1760_v6  ;;  %5711 = vmatprep.mubr.bf16.mxu0 %v4124_v55 }
 0x332   :  { %v4101_v60 = vadd.f32 %v5773_v57, %v7053_v0  ;;  %5712 = vmatmul.mubr.bf16.gmra.mrb[36].mxu0 %v4125_v53  ;;  %v4116_v63 = vmax.f32 %v4100_v56, 0.0 }
 0x333   :  { %v4099_v61 = vadd.f32 %v5774_v21, %v7053_v0  ;;  %v4114_v1 = vmax.f32 %v4098_v59, 0.0 }
 0x334   :  { %v4117_v45 = vmax.f32 %v4101_v60, 0.0 }
 0x335   :  { %v4115_v2 = vmax.f32 %v4099_v61, 0.0  ;;  %v5689_v3 = vpop.f32.mrb[12].mxu1 }
 0x336   :  { %v5775_v4 = vadd.f32 %v5689_v3, %v5497_v11  ;;  %v4052_v24 = vpop.f32.mrb[13].mxu1  ;;  %v4127_v34 = vpack.c.bf16 %v4117_v45, %v4116_v63 }
 0x337   :  { %v5776_v5 = vadd.f32 %v4052_v24, %v7044_v7  ;;  %v5690_v46 = vpop.f32.mrb[14].mxu1  ;;  %v4126_v58 = vpack.c.bf16 %v4115_v2, %v4114_v1 }
 0x338   :  { %v4104_v6 = vadd.f32 %v5775_v4, %v7053_v0  ;;  %v5777_v25 = vadd.f32 %v5690_v46, %v7046_v12  ;;  %v4055_v13 = vpop.f32.mrb[15].mxu1  ;;  %v6216_v12 = vld [vmem:[#allocation11] sm:$0xff]  }
 0x339   :  { %v4102_v33 = vadd.f32 %v5776_v5, %v7053_v0  ;;  %v5778_v10 = vadd.f32 %v4055_v13, %v7048_v8  ;;  %5715 = vmatprep.mubr.bf16.mxu0 %v4126_v58  ;;  %5724 = vmatpush3.bf16.msra.mxu0 %v6216_v12  ;;  %v6217_v8 = vld [vmem:[#allocation11 + $0x8] sm:$0xff]  }
 0x33a   :  { %v4105_v16 = vadd.f32 %v5777_v25, %v7053_v0  ;;  %5716 = vmatmul.mubr.bf16.gmra.mrb[40].mxu0 %v4127_v34  ;;  %v4120_v17 = vmax.f32 %v4104_v6, 0.0  ;;  %5725 = vmatprep.subr.bf16.mxu0 %v6425_v27 }
 0x33b   :  { %v4103_v11 = vadd.f32 %v5778_v10, %v7053_v0  ;;  %v4118_v7 = vmax.f32 %v4102_v33, 0.0  ;;  %v6218_v0 = vld [vmem:[#allocation11 + $0x10] sm:$0xff]  }
 0x33c   :  { %v4121_v14 = vmax.f32 %v4105_v16, 0.0 }
 0x33d   :  { %v4119_v18 = vmax.f32 %v4103_v11, 0.0  ;;  %5726 = vmatpush3.bf16.msra.mxu0 %v6217_v8 }
 0x33e   :  { %v4129_v20 = vpack.c.bf16 %v4121_v14, %v4120_v17  ;;  %5727 = vmatprep.subr.bf16.mxu0 %v6425_v27 }
 0x33f   :  { %v4128_v26 = vpack.c.bf16 %v4119_v18, %v4118_v7 }
 0x341   :  { %5719 = vmatprep.mubr.bf16.mxu0 %v4128_v26  ;;  %5728 = vmatpush3.bf16.msra.mxu0 %v6218_v0 }
 0x342   :  { %5720 = vmatmul.mubr.bf16.gmra.mrb[44].mxu0 %v4129_v20  ;;  %5729 = vmatprep.subr.bf16.mxu0 %v6425_v27 }
 0x343   :  { %5739 = vmatprep.mubr.msk.bf16.mxu0 %vm6426_vm15, %v6425_v27 }
 0x345   :  { %5730 = vmatpush3.bf16.msra.mxu0 %v6219_v30 }
 0x346   :  { %5731 = vmatprep.subr.bf16.mxu0 %v6425_v27 }
 0x349   :  { %5732 = vmatpush3.bf16.msra.mxu0 %v6220_v28 }
 0x34a   :  { %5733 = vmatprep.subr.bf16.mxu0 %v6425_v27 }
 0x34d   :  { %5734 = vmatpush3.bf16.msra.mxu0 %v6221_v9 }
 0x34e   :  { %5735 = vmatprep.subr.bf16.mxu0 %v6425_v27 }
 0x351   :  { %5736 = vmatpush3.bf16.msra.mxu0 %v6222_v29 }
 0x352   :  { %5737 = vmatprep.subr.bf16.mxu0 %v6425_v27 }
 0x355   :  { %5738 = vmatpush3.bf16.msra.mxu0 %v6223_v31 }
 0x356   :  { %5743 = vmatprep.subr.bf16.mxu0 %v6425_v27 }
 0x3fd   :  { %v5709_v32 = vpop.f32.mrb[32].mxu0 }
 0x3fe   :  { %v4235_v35 = vpop.f32.mrb[33].mxu0  ;;  %v7092_v19 = vadd.f32 %v5709_v32, %v5104_v23 }
 0x3ff   :  { %v5710_v36 = vpop.f32.mrb[34].mxu0  ;;  %v7088_v38 = vadd.f32 %v5104_v23, %v4235_v35 }
 0x400   :  { %v4238_v37 = vpop.f32.mrb[35].mxu0  ;;  %v7096_v41 = vadd.f32 %v5710_v36, %v5104_v23  ;;  %v6224_v36 = vld [vmem:[#allocation12] sm:$0xff]  }
 0x401   :  { %v7090_v39 = vadd.f32 %v5104_v23, %v4238_v37 }
 0x403   :  { %v4298_v40 = vadd.f32 %v7090_v39, %v7088_v38 }
 0x405   :  { %v4299_v42 = vadd.f32 %v4298_v40, %v7092_v19  ;;  %v5713_v43 = vpop.f32.mrb[36].mxu0  ;;  %v6225_v40 = vld [vmem:[#allocation12 + $0x8] sm:$0xff]  }
 0x406   :  { %v4251_v44 = vpop.f32.mrb[37].mxu0  ;;  %v7105_v52 = vadd.f32 %v5713_v43, %v5104_v23  ;;  %v6227_v43 = vld [vmem:[#allocation12 + $0x18] sm:$0xff]  }
 0x407   :  { %v7099_v47 = vadd.f32 %v5104_v23, %v4251_v44  ;;  %v4300_v15 = vadd.f32 %v4299_v42, %v7096_v41  ;;  %v5714_v48 = vpop.f32.mrb[38].mxu0  ;;  %v6226_v42 = vld [vmem:[#allocation12 + $0x10] sm:$0xff]   ;;  %v6228_v44 = vld [vmem:[#allocation12 + $0x20] sm:$0xff]  }
 0x408   :  { %v4254_v49 = vpop.f32.mrb[39].mxu0  ;;  %v7108_v54 = vadd.f32 %v5714_v48, %v5104_v23  ;;  %v6230_v48 = vld [vmem:[#allocation12 + $0x30] sm:$0xff]  }
 0x409   :  { %v4301_v50 = vadd.f32 %v4300_v15, %v7099_v47  ;;  %v7103_v51 = vadd.f32 %v5104_v23, %v4254_v49  ;;  %v6229_v15 = vld [vmem:[#allocation12 + $0x28] sm:$0xff]   ;;  %v6231_v49 = vld [vmem:[#allocation12 + $0x38] sm:$0xff]  }
 0x40b   :  { %v4302_v53 = vadd.f32 %v4301_v50, %v7103_v51 }
 0x40d   :  { %v4303_v62 = vadd.f32 %v4302_v53, %v7105_v52  ;;  %v5717_v55 = vpop.f32.mrb[40].mxu0 }
 0x40e   :  { %v4267_v56 = vpop.f32.mrb[41].mxu0  ;;  %v7116_v63 = vadd.f32 %v5717_v55, %v5104_v23 }
 0x40f   :  { %v4304_v57 = vadd.f32 %v4303_v62, %v7108_v54  ;;  %v5718_v22 = vpop.f32.mrb[42].mxu0  ;;  %v7112_v60 = vadd.f32 %v5104_v23, %v4267_v56 }
 0x410   :  { %v4270_v59 = vpop.f32.mrb[43].mxu0  ;;  %v7120_v2 = vadd.f32 %v5718_v22, %v5104_v23 }
 0x411   :  { %v4305_v21 = vrot.slane %v4304_v57, 4  ;;  %v7114_v61 = vadd.f32 %v5104_v23, %v4270_v59 }
 0x413   :  { %v4311_v45 = vadd.f32 %v7114_v61, %v7112_v60  ;;  %v4306_v1 = vadd.f32 %v4305_v21, %v4304_v57 }
 0x415   :  { %v4312_v3 = vadd.f32 %v4311_v45, %v7116_v63  ;;  %v5721_v4 = vpop.f32.mrb[44].mxu0  ;;  %v4307_v6 = vrot.slane %v4306_v1, 2 }
 0x416   :  { %v4283_v24 = vpop.f32.mrb[45].mxu0  ;;  %v7129_v33 = vadd.f32 %v5721_v4, %v5104_v23 }
 0x417   :  { %v7123_v34 = vadd.f32 %v5104_v23, %v4283_v24  ;;  %v4313_v5 = vadd.f32 %v4312_v3, %v7120_v2  ;;  %v5722_v46 = vpop.f32.mrb[46].mxu0  ;;  %v4308_v16 = vadd.f32 %v4307_v6, %v4306_v1  ;;  %v6427_v24 = vmov 1966171168  }
 0x418   :  { %v4286_v58 = vpop.f32.mrb[47].mxu0  ;;  %v7132_v11 = vadd.f32 %v5722_v46, %v5104_v23 }
 0x419   :  { %v4314_v25 = vadd.f32 %v4313_v5, %v7123_v34  ;;  %v7127_v13 = vadd.f32 %v5104_v23, %v4286_v58  ;;  %v4309_v7 = vrot.slane %v4308_v16, 1  ;;  %v4571_v5 = vunpack.c.l.s4 %v6427_v24 }
 0x41b   :  { %v4315_v10 = vadd.f32 %v4314_v25, %v7127_v13  ;;  %v4310_v26 = vadd.f32 %v4309_v7, %v4308_v16  ;;  %v4572_v46 = vunpack.c.0.s8 %v4571_v5 }
 0x41d   :  { %v4316_v17 = vadd.f32 %v4315_v10, %v7129_v33  ;;  %v4325_v0 = vmul.f32 0.015625, %v4310_v26 }
 0x41f   :  { %v4317_v14 = vadd.f32 %v4316_v17, %v7132_v11  ;;  %v4327_v9 = vpack.c.bf16 %v4325_v0, %v4325_v0  ;;  %v6244_v17 = vld [vmem:[#allocation3] sm:$0xff]  }
 0x420   :  { %v4554_v7 = vunpack.c.h.bf16 %v6244_v17 }
 0x421   :  { %v4318_v18 = vrot.slane %v4317_v14, 4  ;;  %v4347_v32 = vunpack.c.l.b16 %v4327_v9  ;;  %v6247_v9 = vld [vmem:[#allocation3 + $0x18] sm:$0xff]  }
 0x423   :  { %v4319_v20 = vadd.f32 %v4318_v18, %v4317_v14  ;;  %v4553_v14 = vunpack.c.l.bf16 %v6244_v17  ;;  %v6245_v18 = vld [vmem:[#allocation3 + $0x8] sm:$0xff]  }
 0x424   :  { %v4556_v26 = vunpack.c.h.bf16 %v6245_v18 }
 0x425   :  { %v4320_v12 = vrot.slane %v4319_v20, 2 }
 0x427   :  { %v4321_v8 = vadd.f32 %v4320_v12, %v4319_v20  ;;  %v4555_v20 = vunpack.c.l.bf16 %v6245_v18  ;;  %v6246_v12 = vld [vmem:[#allocation3 + $0x10] sm:$0xff]  }
 0x428   :  { %v4558_v0 = vunpack.c.h.bf16 %v6246_v12 }
 0x429   :  { %v4322_v30 = vrot.slane %v4321_v8, 1 }
 0x42b   :  { %v4323_v28 = vadd.f32 %v4322_v30, %v4321_v8  ;;  %v4557_v8 = vunpack.c.l.bf16 %v6246_v12 }
 0x42d   :  { %v4326_v29 = vmul.f32 0.015625, %v4323_v28 }
 0x42f   :  { %v4328_v31 = vpack.c.bf16 %v4326_v29, %v4326_v29  ;;  %v4559_v29 = vunpack.c.l.bf16 %v6247_v9 }
 0x431   :  { %v4348_v23 = vunpack.c.l.b16 %v4328_v31  ;;  %v4560_v31 = vunpack.c.h.bf16 %v6247_v9 }
 0x433   :  { %v4350_v35 = vsel %vm4349_vm0, %v4348_v23, %v4347_v32  ;;  %v6248_v32 = vld [vmem:[#allocation3 + $0x20] sm:$0xff]  }
 0x434   :  { %v4351_v37 = vpack.c.b16 %v4350_v35, %v4350_v35  ;;  %v4561_v23 = vunpack.c.l.bf16 %v6248_v32  ;;  %v4562_v35 = vunpack.c.h.bf16 %v6248_v32 }
 0x436   :  { %5740 = vmatmul.mubr.bf16.vlgmr.msra.gmra.mrb[48].mxu0 %v4351_v37 }
 0x437   :  { %5744 = vmatpush3.bf16.msra.mxu0 %v6224_v36  ;;  %5759 = vmatprep.mubr.msk.bf16.mxu0 %vm6426_vm15, %v6425_v27  ;;  %v6249_v36 = vld [vmem:[#allocation3 + $0x28] sm:$0xff]  }
 0x438   :  { %5745 = vmatprep.subr.bf16.mxu0 %v6425_v27  ;;  %v4563_v37 = vunpack.c.l.bf16 %v6249_v36 }
 0x43b   :  { %5746 = vmatpush3.bf16.msra.mxu0 %v6225_v40  ;;  %v4564_v40 = vunpack.c.h.bf16 %v6249_v36 }
 0x43c   :  { %5747 = vmatprep.subr.bf16.mxu0 %v6425_v27 }
 0x43f   :  { %5748 = vmatpush3.bf16.msra.mxu0 %v6226_v42 }
 0x440   :  { %5749 = vmatprep.subr.bf16.mxu0 %v6425_v27 }
 0x443   :  { %5750 = vmatpush3.bf16.msra.mxu0 %v6227_v43 }
 0x444   :  { %5751 = vmatprep.subr.bf16.mxu0 %v6425_v27 }
 0x447   :  { %5752 = vmatpush3.bf16.msra.mxu0 %v6228_v44  ;;  %v6250_v44 = vld [vmem:[#allocation3 + $0x30] sm:$0xff]  }
 0x448   :  { %5753 = vmatprep.subr.bf16.mxu0 %v6425_v27 }
 0x44b   :  { %5754 = vmatpush3.bf16.msra.mxu0 %v6229_v15  ;;  %v4565_v15 = vunpack.c.l.bf16 %v6250_v44 }
 0x44c   :  { %5755 = vmatprep.subr.bf16.mxu0 %v6425_v27 }
 0x44f   :  { %5756 = vmatpush3.bf16.msra.mxu0 %v6230_v48  ;;  %v4566_v48 = vunpack.c.h.bf16 %v6250_v44 }
 0x450   :  { %5757 = vmatprep.subr.bf16.mxu0 %v6425_v27  ;;  %v4573_v27 = vlaneseq }
 0x452   :  { %v4574_v58 = vshrl.u32 %v4573_v27, 7 }
 0x453   :  { %5758 = vmatpush3.bf16.msra.mxu0 %v6231_v49  ;;  %v6251_v49 = vld [vmem:[#allocation3 + $0x38] sm:$0xff]  }
 0x454   :  { %v4575_v6 = vsub.s32 %v4572_v46, %v4574_v58  ;;  %v4594_v16 = vsub.s32 0, %v4574_v58 }
 0x509   :  { %v4435_v50 = vpop.f32.mrb[48].mxu0 }
 0x50a   :  { %v4441_v53 = vmax.f32 %v4435_v50, 0.0  ;;  %v5741_v62 = vpop.f32.mrb[49].mxu0  ;;  %v4567_v50 = vunpack.c.l.bf16 %v6251_v49 }
 0x50b   :  { %v4438_v55 = vpop.f32.mrb[50].mxu0 }
 0x50c   :  { %v4442_v56 = vpack.c.bf16 %v4441_v53, %v4441_v53  ;;  %v5742_v57 = vpop.f32.mrb[51].mxu0  ;;  %v4568_v53 = vunpack.c.h.bf16 %v6251_v49 }
 0x50e   :  { %5760 = vmatmul.mubr.bf16.vlgmr.msra.gmra.mrb[52].mxu0 %v4442_v56 }
 0x5e1   :  { %v4541_v22 = vpop.f32.mrb[52].mxu0 }
 0x5e2   :  { %v5129_v59 = vmul.f32 -1.442695, %v4541_v22  ;;  %v5761_v21 = vpop.f32.mrb[53].mxu0 }
 0x5e3   :  { %v4544_v45 = vpop.f32.mrb[54].mxu0 }
 0x5e4   :  { %6240 = vpow2.f32 %v5129_v59  ;;  %v5762_v1 = vpop.f32.mrb[55].mxu0 }
 0x5ee   :  { %v6241_v3 = vpop.eup %6240 }
 0x5ef   :  { %v4550_v4 = vadd.f32 1.0, %v6241_v3 }
 0x5f1   :  { %6242 = vrcp.f32 %v4550_v4 }
 0x5fb   :  { %v6243_v25 = vpop.eup %6242 }
 0x5fc   :  { %v4576_v10 = vrot.slane %v6243_v25, %v4575_v6 }
 0x5fe   :  { %v4577_v30 = vcombine.high %v4576_v10, %v4576_v10  ;;  %v4584_v28 = vrot.slane %v4576_v10, %v4575_v6 }
 0x600   :  { %v4591_v42 = vrot.slane %v4577_v30, %v4575_v6  ;;  %v4595_v43 = vrot.slane %v4584_v28, %v4594_v16 }
 0x602   :  { %v4599_v62 = vrot.slane %v4591_v42, %v4594_v16  ;;  %v4602_v55 = vmul.f32 %v4595_v43, %v7088_v38  ;;  %v4603_v56 = vmul.f32 %v4595_v43, %v7090_v39  ;;  %v4604_v57 = vmul.f32 %v4595_v43, %v7092_v19 }
 0x603   :  { %v4605_v22 = vmul.f32 %v4595_v43, %v7096_v41  ;;  %v4606_v59 = vmul.f32 %v4595_v43, %v7099_v47  ;;  %v4607_v21 = vmul.f32 %v4595_v43, %v7103_v51  ;;  %v4608_v45 = vmul.f32 %v4595_v43, %v7105_v52 }
 0x604   :  { %v4609_v1 = vmul.f32 %v4595_v43, %v7108_v54  ;;  %v4610_v3 = vmul.f32 %v4599_v62, %v7112_v60  ;;  %v4611_v4 = vmul.f32 %v4599_v62, %v7114_v61  ;;  %v4612_v38 = vmul.f32 %v4599_v62, %v7116_v63 }
 0x605   :  { %v4613_v39 = vmul.f32 %v4599_v62, %v7120_v2  ;;  %v4614_v19 = vmul.f32 %v4599_v62, %v7123_v34  ;;  %v4615_v41 = vmul.f32 %v4599_v62, %v7127_v13  ;;  %v4616_v47 = vmul.f32 %v4599_v62, %v7129_v33 }
 0x606   :  { %v4617_v51 = vmul.f32 %v4599_v62, %v7132_v11  ;;  %v4618_v24 = vadd.f32 %v4602_v55, %v4553_v14  ;;  %v4619_v52 = vadd.f32 %v4603_v56, %v4554_v7  ;;  %v4620_v5 = vadd.f32 %v4604_v57, %v4555_v20 }
 0x607   :  { %v4621_v54 = vadd.f32 %v4605_v22, %v4556_v26  ;;  %v4622_v27 = vadd.f32 %v4606_v59, %v4557_v8  ;;  %v4623_v60 = vadd.f32 %v4607_v21, %v4558_v0  ;;  %v4624_v46 = vadd.f32 %v4608_v45, %v4559_v29 }
 0x608   :  { %v4625_v61 = vadd.f32 %v4609_v1, %v4560_v31  ;;  %v4626_v58 = vadd.f32 %v4610_v3, %v4561_v23  ;;  %v4627_v63 = vadd.f32 %v4611_v4, %v4562_v35  ;;  %v4628_v6 = vadd.f32 %v4612_v38, %v4563_v37 }
 0x609   :  { %v4629_v2 = vadd.f32 %v4613_v39, %v4564_v40  ;;  %v4630_v25 = vadd.f32 %v4614_v19, %v4565_v15  ;;  %v4631_v34 = vadd.f32 %v4615_v41, %v4566_v48  ;;  %v4632_v10 = vadd.f32 %v4616_v47, %v4567_v50 }
 0x60a   :  { %v4633_v13 = vadd.f32 %v4617_v51, %v4568_v53  ;;  %v4634_v16 = vmax.f32 %v4618_v24, 0.0  ;;  %v4635_v33 = vmax.f32 %v4619_v52, 0.0  ;;  %v4636_v17 = vmax.f32 %v4620_v5, 0.0 }
 0x60b   :  { %v4637_v11 = vmax.f32 %v4621_v54, 0.0  ;;  %v4638_v14 = vmax.f32 %v4622_v27, 0.0  ;;  %v4639_v7 = vmax.f32 %v4623_v60, 0.0  ;;  %v4640_v18 = vmax.f32 %v4624_v46, 0.0 }
 0x60c   :  { %v4641_v20 = vmax.f32 %v4625_v61, 0.0  ;;  %v4642_v26 = vmax.f32 %v4626_v58, 0.0  ;;  %v4643_v12 = vmax.f32 %v4627_v63, 0.0  ;;  %v4644_v8 = vmax.f32 %v4628_v6, 0.0 }
 0x60d   :  { %v4645_v0 = vmax.f32 %v4629_v2, 0.0  ;;  %v4646_v30 = vmax.f32 %v4630_v25, 0.0  ;;  %v4647_v28 = vmax.f32 %v4631_v34, 0.0  ;;  %v4648_v9 = vmax.f32 %v4632_v10, 0.0 }
 0x60e   :  { %v4649_v29 = vmax.f32 %v4633_v13, 0.0  ;;  %v5133_v31 = vpack.c.bf16 %v4635_v33, %v4634_v16  ;;  %v5138_v32 = vpack.c.bf16 %v4637_v11, %v4636_v17  ;;  %v5143_v23 = vpack.c.bf16 %v4639_v7, %v4638_v14 }
 0x60f   :  { %v5148_v35 = vpack.c.bf16 %v4641_v20, %v4640_v18  ;;  %v5153_v36 = vpack.c.bf16 %v4643_v12, %v4642_v26  ;;  %v5158_v37 = vpack.c.bf16 %v4645_v0, %v4644_v8  ;;  %v5163_v40 = vpack.c.bf16 %v4647_v28, %v4646_v30 }
 0x610   :  { %5134 = vst [vmem:[#allocation14] sm:$0xff] %v5133_v31   ;;  %5170 = vst [vmem:[#allocation14 + $0x8] sm:$0xff] %v5138_v32   ;;  %v5168_v42 = vpack.c.bf16 %v4649_v29, %v4648_v9 }
 0x611   :  { %5171 = vst [vmem:[#allocation14 + $0x10] sm:$0xff] %v5143_v23   ;;  %5172 = vst [vmem:[#allocation14 + $0x18] sm:$0xff] %v5148_v35  }
 0x612   :  { %5173 = vst [vmem:[#allocation14 + $0x20] sm:$0xff] %v5153_v36   ;;  %5174 = vst [vmem:[#allocation14 + $0x28] sm:$0xff] %v5158_v37  }
 0x613   :  { %5175 = vst [vmem:[#allocation14 + $0x30] sm:$0xff] %v5163_v40   ;;  %5176 = vst [vmem:[#allocation14 + $0x38] sm:$0xff] %v5168_v42  }
 0x614   :  { %6395 = shalt.err (!%p6392_p10)
}
 0x615   :  { %s6396_s26 = scalar_lea.hbm %s7185_s9, 1024 }
 0x616   :  { %p6397_p11 = scmp.ne.s32.totalorder %s7185_s9, %s6396_s26  ;;  %p6400_p12 = scmp.lt.u32.totalorder %s6396_s26, %s7185_s9 }
 0x618   :  { %p6402_p13 = pnand %p6400_p12, %p6397_p11 }
 0x61a   :  { %6405 = shalt.err (!%p6402_p13)
}
 0x61b   :  { %4693 = dma.vmem_to_hbm [thread:$0]  %s4688_s20, 1024, %s7185_s9, [#allocation5], %s6418_s21, %s6418_s21, %s6419_s22  }
 0x61c   :  { %6414 = dma.done.wait [#allocation5], 1024  }
 0x61d   :  { %6415 = vsyncadd [#allocation5], 4294966272 }
 0x61e   :  { %4697 = vsyncpa [#allocation4], 1 }
 0x61f   :  { %4698 = vsyncpa [#allocation7], 1 }
 0x620   :  { %4699 = vsyncpa [#allocation10], 1 }
 0x621   :  { %4700 = vsyncpa [#allocation13], 1 }
 0x622   :  { %4701 = vsyncpa [#allocation5], 1 }

</bundles_post_ra>
